<compile_context>
chip_gen: v7x
topology: tpu7x:2x2x1
jax: 0.10.0
libtpu: 0.0.40
codegen_flags: <defaults>
</compile_context>

<pallas_src>
import functools

import jax
import jax.numpy as jnp
import numpy as np
from jax.experimental import pallas as pl
from jax.experimental.pallas import tpu as pltpu

FEA_DIM = 512
EMB_DIM = 64
CONV_OUT = 32            # stand-in backbone conv channels
N_CLASSES_PER = 3        # out_linear final dim
EMB_OUT = 128            # out_fea_extractor final dim
D9_PAD = 32              # im2col contraction (C*9 = 27) zero-padded to 32
HEAD_HID = 2 * FEA_DIM   # fused head first-layer width (wo1 | wf1)
OUT_SLAB = 256           # lane-dense packed output: [:128]=emb, [128:131]=logits
PACK = 4                 # spatial positions packed per conv row (lane-dense MXU)


def _leaky(v):
    return jnp.where(v > 0, v, 0.01 * v)   # nn.LeakyReLU default slope


# ----------------------------------------------------------------------------
# Pallas kernel: lane-dense conv matmul backbone head + cond MLP + fused heads
# ----------------------------------------------------------------------------
def sag_kernel(patches_ref, cond_ref,
               wc_ref, wh_ref, w1_ref, w2_ref, w3_ref, w1h_ref, w2h_ref,
               bias_ref, out_ref):
    f32 = jnp.float32
    bf16 = jnp.bfloat16

    tile_b = cond_ref.shape[0]
    rows = patches_ref.shape[0]              # tile_b * hw // pack
    conv_lanes = wc_ref.shape[1]             # CONV_OUT * pack (lane-dense)

    # ---- stand-in backbone: lane-dense im2col conv as ONE matmul over tile ----
    conv = jnp.dot(patches_ref[...], wc_ref[...], preferred_element_type=f32)
    conv = jnp.maximum(conv + bias_ref[0:1, :conv_lanes], 0.0)      # (rows, 32*pack)

    # per-sample global average pool: sublane sum over hw//pack rows per sample;
    # the pack-group lane sum and the 1/hw scale are folded into wh (host side).
    gap = jnp.sum(conv.reshape(tile_b, rows // tile_b, conv_lanes), axis=1)

    feat = (jnp.dot(gap.astype(bf16), wh_ref[...], preferred_element_type=f32)
            + bias_ref[1:2, :FEA_DIM])                              # (tile_b, 512)

    # ---- cond_fea_extractor: 64 -> 128 -> 256 -> 512, sigmoid gate ----
    # (activations kept in f32: mandatory on v5e; cheap relative to matmuls)
    c = _leaky(jnp.dot(cond_ref[...], w1_ref[...], preferred_element_type=f32)
               + bias_ref[2:3, :128])
    c = _leaky(jnp.dot(c.astype(bf16), w2_ref[...], preferred_element_type=f32)
               + bias_ref[3:4, :256])
    c = jax.nn.sigmoid(jnp.dot(c.astype(bf16), w3_ref[...],
                               preferred_element_type=f32)
                       + bias_ref[4:5, :FEA_DIM])

    x = feat * c                   # gating; nn.Dropout(0.1) is eval-mode identity

    # ---- fused heads: hidden = leaky(x @ [wo1|wf1] + [bo1|bf1]) ----
    hidden = _leaky(jnp.dot(x.astype(bf16), w1h_ref[...],
                            preferred_element_type=f32)
                    + bias_ref[5:6, :HEAD_HID])                     # (tile_b, 1024)

    # block-diagonal packed second layers -> lane-dense (tile_b, 256) slab
    out_ref[...] = (jnp.dot(hidden.astype(bf16), w2h_ref[...],
                            preferred_element_type=f32)
                    + bias_ref[6:7, :OUT_SLAB])


# ----------------------------------------------------------------------------
# Glue: im2col, padding, weight fusion/packing, pallas_call wiring
# ----------------------------------------------------------------------------
def _im2col_3x3(x):
    """x: (N, C, H, W) -> patches (N, H*W, C*9), padding=1, stride=1."""
    n, c, h, w = x.shape
    xp = jnp.pad(x, ((0, 0), (0, 0), (1, 1), (1, 1)))
    cols = []
    for di in range(3):
        for dj in range(3):
            cols.append(xp[:, :, di:di + h, dj:dj + w])             # (N, C, H, W)
    p = jnp.stack(cols, axis=2)                                     # (N, C, 9, H, W)
    p = p.transpose(0, 3, 4, 1, 2).reshape(n, h * w, c * 9)
    return p


def init_params(key, in_chans=3):
    names_shapes = [
        ("emb_table", (5, EMB_DIM)),
        ("wc", (in_chans * 9, CONV_OUT)), ("bc", (1, CONV_OUT)),
        ("wh", (CONV_OUT, FEA_DIM)),      ("bh", (1, FEA_DIM)),
        ("w1", (EMB_DIM, 128)),           ("b1", (1, 128)),
        ("w2", (128, 256)),               ("b2", (1, 256)),
        ("w3", (256, FEA_DIM)),           ("b3", (1, FEA_DIM)),
        ("wo1", (FEA_DIM, FEA_DIM)),      ("bo1", (1, FEA_DIM)),
        ("wo2", (FEA_DIM, N_CLASSES_PER)), ("bo2", (1, N_CLASSES_PER)),
        ("wf1", (FEA_DIM, FEA_DIM)),      ("bf1", (1, FEA_DIM)),
        ("wf2", (FEA_DIM, EMB_OUT)),      ("bf2", (1, EMB_OUT)),
    ]
    keys = jax.random.split(key, len(names_shapes))
    return {n: (jax.random.normal(k, s, jnp.float32) * 0.05)
            for (n, s), k in zip(names_shapes, keys)}


def _pack_weights(params, d9, hw, pack):
    """Pad / fuse / cast weights for the kernel; bf16 weights + f32 bias slab."""
    f32 = jnp.float32
    bf16 = jnp.bfloat16
    wc = jnp.pad(params["wc"], ((0, D9_PAD - d9), (0, 0)))           # 27 -> 32

    # lane-dense conv: `pack` spatial positions per row via block-diagonal wc
    wc_pack = jnp.zeros((D9_PAD * pack, CONV_OUT * pack), f32)
    for g in range(pack):
        wc_pack = wc_pack.at[g * D9_PAD:(g + 1) * D9_PAD,
                             g * CONV_OUT:(g + 1) * CONV_OUT].set(wc)

    # GAP: fold 1/hw into wh (f32, host side) and the pack-group sum by stacking
    wh_scaled = params["wh"] * (1.0 / hw)
    wh_pack = jnp.concatenate([wh_scaled] * pack, axis=0)            # (32*pack, 512)

    # fused head first layer (wo1 | wf1) and block-diagonal packed second layer
    w1h = jnp.concatenate([params["wo1"], params["wf1"]], axis=1)    # (512, 1024)
    w2h = jnp.zeros((HEAD_HID, OUT_SLAB), f32)
    w2h = w2h.at[FEA_DIM:, :EMB_OUT].set(params["wf2"])
    w2h = w2h.at[:FEA_DIM, EMB_OUT:EMB_OUT + N_CLASSES_PER].set(params["wo2"])

    bias = jnp.zeros((8, HEAD_HID), f32)
    bias = bias.at[0, :CONV_OUT * pack].set(jnp.tile(params["bc"][0], pack))
    bias = bias.at[1, :FEA_DIM].set(params["bh"][0])
    bias = bias.at[2, :128].set(params["b1"][0])
    bias = bias.at[3, :256].set(params["b2"][0])
    bias = bias.at[4, :FEA_DIM].set(params["b3"][0])
    bias = bias.at[5, :FEA_DIM].set(params["bo1"][0])
    bias = bias.at[5, FEA_DIM:].set(params["bf1"][0])
    bias = bias.at[6, :EMB_OUT].set(params["bf2"][0])
    bias = bias.at[6, EMB_OUT:EMB_OUT + N_CLASSES_PER].set(params["bo2"][0])

    weights = [wc_pack.astype(bf16), wh_pack.astype(bf16),
               params["w1"].astype(bf16), params["w2"].astype(bf16),
               params["w3"].astype(bf16), w1h.astype(bf16), w2h.astype(bf16)]
    return weights, bias


def _pick_tile(bk, hw, pack, max_tile=128, patch_budget_bytes=24 << 20):
    """Row tile (multiple of 8).  Small batches: one big tile (best on 1-TC
    v5e/v6e; trivially fine on v7x).  Large batches: up to 128-row tiles,
    bounded so 2x bf16 patch buffers + the f32 conv intermediate stay well
    inside v7x's 64 MiB VMEM.  bk is padded UP to a tile multiple."""
    per_sample_bytes = (hw // pack) * (D9_PAD * pack) * (2 * 2 + 4)
    cap = (patch_budget_bytes // max(per_sample_bytes, 1)) // 8 * 8
    cap = max(8, min(max_tile, cap))
    bk8 = -(-bk // 8) * 8
    if bk8 <= cap:
        return bk8, bk8                       # single largest tile
    tile = cap
    bk_pad = -(-bk // tile) * tile            # pad up to a tile multiple
    return tile, bk_pad


@functools.partial(jax.jit, static_argnames=("with_emb",))
def sag_model_forward(x, cond, params, with_emb=True):
    b, k, d, h, w = x.shape
    levels = k // 5
    bk = b * k
    hw = h * w
    d9 = d * 9
    pack = PACK if hw % PACK == 0 else 1

    tile_b, bk_pad = _pick_tile(bk, hw, pack)
    n_tiles = bk_pad // tile_b
    row_blk = tile_b * hw // pack

    # im2col in the wrapper (negligible at toy sizes).
    # TODO(synk): for real image sizes, move im2col in-kernel (DMA raw NCHW
    # tiles + shifted VMEM slices) with an 'arbitrary' hw grid axis and a GAP
    # accumulator scratch, cutting patch HBM traffic ~9x.
    patches = _im2col_3x3(x.reshape(bk, d, h, w))                    # (bk, hw, 27)
    patches = jnp.pad(patches, ((0, bk_pad - bk), (0, 0), (0, D9_PAD - d9)))
    # lane-dense packing: `pack` spatial positions per 128-lane row
    patches = patches.reshape(bk_pad * hw // pack,
                              D9_PAD * pack).astype(jnp.bfloat16)

    cond_vec = params["emb_table"][cond.reshape(-1)]                 # (bk, 64) gather (glue)
    cond_vec = jnp.pad(cond_vec, ((0, bk_pad - bk), (0, 0))).astype(jnp.bfloat16)

    weights, bias = _pack_weights(params, d9, hw, pack)

    in_specs = [
        pl.BlockSpec((row_blk, D9_PAD * pack), lambda i: (i, 0)),    # patch row tile
        pl.BlockSpec((tile_b, EMB_DIM), lambda i: (i, 0)),           # cond embedding tile
    ]
    # invariant weights / bias slab: whole-array blocks, constant index map
    for wgt in weights + [bias]:
        in_specs.append(pl.BlockSpec(wgt.shape, lambda i: (0, 0)))

    # explicit VMEM budget (v7x has only 64 MiB/TC; default scoped limit 32 MiB)
    const_bytes = sum(int(np.prod(wgt.shape)) * wgt.dtype.itemsize
                      for wgt in weights) + int(bias.size) * 4
    vmem_est = (2 * row_blk * D9_PAD * pack * 2       # double-buffered patch tile (bf16)
                + 2 * const_bytes                     # invariant blocks (worst case 2x)
                + 2 * tile_b * OUT_SLAB * 4           # output block
                + row_blk * CONV_OUT * pack * 4       # f32 conv intermediate
                + (8 << 20))                          # headroom
    vmem_limit = int(min(48 << 20, max(32 << 20, vmem_est)))

    out_slab = pl.pallas_call(
        sag_kernel,
        out_shape=jax.ShapeDtypeStruct((bk_pad, OUT_SLAB), jnp.float32),
        grid=(n_tiles,),
        in_specs=in_specs,
        out_specs=pl.BlockSpec((tile_b, OUT_SLAB), lambda i: (i, 0)),
        compiler_params=pltpu.CompilerParams(
            dimension_semantics=("parallel",),
            vmem_limit_bytes=vmem_limit),
    )(patches, cond_vec, *weights, bias)

    out_slab = out_slab[:bk]
    logits = out_slab[:, EMB_OUT:EMB_OUT + N_CLASSES_PER]
    out = logits.reshape(b, k, N_CLASSES_PER).reshape(b, -1)

    if with_emb:
        embeds = out_slab[:, :EMB_OUT]
        embeds = embeds.reshape(b, -1, levels, EMB_OUT)              # (b, 5, levels, 128)
        embeds = embeds.transpose(0, 2, 1, 3)                        # (b, levels, 5, 128)
        embeds = embeds.reshape(b, 5, -1)
        return out, embeds
    return out


# ----------------------------------------------------------------------------
# Pure-JAX reference mirroring the model math (bf16 MXU inputs, f32 accumulation)
# ----------------------------------------------------------------------------
def reference_forward(x, cond, params):
    bf16 = jnp.bfloat16
    f32 = jnp.float32

    def mm(a, wgt):
        return jnp.dot(a.astype(bf16), wgt.astype(bf16), preferred_element_type=f32)

    b, k, d, h, w = x.shape
    levels = k // 5
    bk = b * k
    d9 = d * 9

    patches = _im2col_3x3(x.reshape(bk, d, h, w))
    patches = jnp.pad(patches, ((0, 0), (0, 0), (0, D9_PAD - d9)))
    wc = jnp.pad(params["wc"], ((0, D9_PAD - d9), (0, 0)))

    conv = jnp.einsum("bpc,co->bpo", patches.astype(bf16), wc.astype(bf16),
                      preferred_element_type=f32) + params["bc"]
    conv = jnp.maximum(conv, 0.0)
    gap = jnp.mean(conv, axis=1)                                     # (bk, 32)
    feat = mm(gap, params["wh"]) + params["bh"]

    c = params["emb_table"][cond.reshape(-1)]
    c = _leaky(mm(c, params["w1"]) + params["b1"])
    c = _leaky(mm(c, params["w2"]) + params["b2"])
    c = jax.nn.sigmoid(mm(c, params["w3"]) + params["b3"])

    xg = feat * c
    he = _leaky(mm(xg, params["wf1"]) + params["bf1"])
    emb = mm(he, params["wf2"]) + params["bf2"]
    ho = _leaky(mm(xg, params["wo1"]) + params["bo1"])
    logit = mm(ho, params["wo2"]) + params["bo2"]

    out = logit.reshape(b, k, 3).reshape(b, -1)
    emb = emb.reshape(b, -1, levels, EMB_OUT).transpose(0, 2, 1, 3).reshape(b, 5, -1)
    return out, emb


if __name__ == "__main__":
    key = jax.random.PRNGKey(0)
    k_x, k_c, k_p = jax.random.split(key, 3)

    b, k, d, h, w = 2, 5, 3, 16, 16                                  # k = 5 * levels, levels = 1
    x = jax.random.normal(k_x, (b, k, d, h, w), jnp.float32)
    cond = jax.random.randint(k_c, (b, k), 0, 5, jnp.int32)
    params = init_params(k_p, in_chans=d)

    out, embeds = sag_model_forward(x, cond, params, with_emb=True)
    out = jax.block_until_ready(out)
    embeds = jax.block_until_ready(embeds)

    assert out.shape == (b, k * 3), out.shape
    assert embeds.shape == (b, 5, (k // 5) * EMB_OUT), embeds.shape

    ref_out, ref_emb = reference_forward(x, cond, params)
    np.testing.assert_allclose(np.asarray(out), np.asarray(ref_out), rtol=1e-2, atol=1e-2)
    np.testing.assert_allclose(np.asarray(embeds), np.asarray(ref_emb), rtol=1e-2, atol=1e-2)

    print("KERNEL_OK")
</pallas_src>

<mosaic_0001>
module attributes {stable_mosaic.version = 11 : i64} {
  func.func @sag_kernel(%arg0: i32, %arg1: memref<1024x128xbf16, #tpu.memory_space<vmem>>, %arg2: memref<16x64xbf16, #tpu.memory_space<vmem>>, %arg3: memref<128x128xbf16, #tpu.memory_space<vmem>>, %arg4: memref<128x512xbf16, #tpu.memory_space<vmem>>, %arg5: memref<64x128xbf16, #tpu.memory_space<vmem>>, %arg6: memref<128x256xbf16, #tpu.memory_space<vmem>>, %arg7: memref<256x512xbf16, #tpu.memory_space<vmem>>, %arg8: memref<512x1024xbf16, #tpu.memory_space<vmem>>, %arg9: memref<1024x256xbf16, #tpu.memory_space<vmem>>, %arg10: memref<8x1024xf32, #tpu.memory_space<vmem>>, %arg11: memref<16x256xf32, #tpu.memory_space<vmem>>) attributes {dimension_semantics = [#tpu.dimension_semantics<parallel>], iteration_bounds = array<i64: 1>, scalar_prefetch = 0 : i64, scratch_operands = 0 : i64, tpu.core_type = #tpu.core_type<tc>, window_params = [{transform_indices = @transform_0, window_bounds = array<i64: 1024, 128>}, {transform_indices = @transform_1, window_bounds = array<i64: 16, 64>}, {pipeline_mode = #tpu.pipeline_mode<synchronous>, transform_indices = @transform_2, window_bounds = array<i64: 128, 128>}, {pipeline_mode = #tpu.pipeline_mode<synchronous>, transform_indices = @transform_3, window_bounds = array<i64: 128, 512>}, {pipeline_mode = #tpu.pipeline_mode<synchronous>, transform_indices = @transform_4, window_bounds = array<i64: 64, 128>}, {pipeline_mode = #tpu.pipeline_mode<synchronous>, transform_indices = @transform_5, window_bounds = array<i64: 128, 256>}, {pipeline_mode = #tpu.pipeline_mode<synchronous>, transform_indices = @transform_6, window_bounds = array<i64: 256, 512>}, {pipeline_mode = #tpu.pipeline_mode<synchronous>, transform_indices = @transform_7, window_bounds = array<i64: 512, 1024>}, {pipeline_mode = #tpu.pipeline_mode<synchronous>, transform_indices = @transform_8, window_bounds = array<i64: 1024, 256>}, {pipeline_mode = #tpu.pipeline_mode<synchronous>, transform_indices = @transform_9, window_bounds = array<i64: 8, 1024>}, {transform_indices = @transform_10, window_bounds = array<i64: 16, 256>}]} {
    %c0 = arith.constant 0 : index
    %c0_0 = arith.constant 0 : index
    %0 = vector.load %arg1[%c0, %c0_0] : memref<1024x128xbf16, #tpu.memory_space<vmem>>, vector<1024x128xbf16>
    %c0_1 = arith.constant 0 : index
    %c0_2 = arith.constant 0 : index
    %1 = vector.load %arg3[%c0_1, %c0_2] : memref<128x128xbf16, #tpu.memory_space<vmem>>, vector<128x128xbf16>
    %cst = arith.constant dense<0.000000e+00> : vector<1024x128xf32>
    %2 = tpu.matmul %0, %1, %cst {dimension_numbers = #tpu.dot_dimension_numbers<[1], [0], [0], [1], [0, 0, 1, 1], [], []>} : vector<1024x128xbf16>, vector<128x128xbf16>, vector<1024x128xf32> -> vector<1024x128xf32>
    %c0_3 = arith.constant 0 : index
    %c0_4 = arith.constant 0 : index
    %3 = vector.load %arg10[%c0_3, %c0_4] : memref<8x1024xf32, #tpu.memory_space<vmem>>, vector<1x128xf32>
    %4 = vector.broadcast %3 : vector<1x128xf32> to vector<1024x128xf32>
    %5 = arith.addf %2, %4 : vector<1024x128xf32>
    %cst_5 = arith.constant 0.000000e+00 : f32
    %6 = vector.broadcast %cst_5 : f32 to vector<1024x128xf32>
    %7 = arith.maximumf %5, %6 : vector<1024x128xf32>
    %8 = vector.shape_cast %7 : vector<1024x128xf32> to vector<16x64x128xf32>
    %cst_6 = arith.constant dense<0.000000e+00> : vector<16x128xf32>
    %9 = vector.multi_reduction <add>, %8, %cst_6 [1] : vector<16x64x128xf32> to vector<16x128xf32>
    %10 = arith.truncf %9 : vector<16x128xf32> to vector<16x128xbf16>
    %c0_7 = arith.constant 0 : index
    %c0_8 = arith.constant 0 : index
    %11 = vector.load %arg4[%c0_7, %c0_8] : memref<128x512xbf16, #tpu.memory_space<vmem>>, vector<128x512xbf16>
    %cst_9 = arith.constant dense<0.000000e+00> : vector<16x512xf32>
    %12 = tpu.matmul %10, %11, %cst_9 {dimension_numbers = #tpu.dot_dimension_numbers<[1], [0], [0], [1], [0, 0, 1, 1], [], []>} : vector<16x128xbf16>, vector<128x512xbf16>, vector<16x512xf32> -> vector<16x512xf32>
    %c1 = arith.constant 1 : index
    %c0_10 = arith.constant 0 : index
    %13 = vector.load %arg10[%c1, %c0_10] : memref<8x1024xf32, #tpu.memory_space<vmem>>, vector<1x512xf32>
    %14 = vector.broadcast %13 : vector<1x512xf32> to vector<16x512xf32>
    %15 = arith.addf %12, %14 : vector<16x512xf32>
    %c0_11 = arith.constant 0 : index
    %c0_12 = arith.constant 0 : index
    %16 = vector.load %arg2[%c0_11, %c0_12] : memref<16x64xbf16, #tpu.memory_space<vmem>>, vector<16x64xbf16>
    %c0_13 = arith.constant 0 : index
    %c0_14 = arith.constant 0 : index
    %17 = vector.load %arg5[%c0_13, %c0_14] : memref<64x128xbf16, #tpu.memory_space<vmem>>, vector<64x128xbf16>
    %cst_15 = arith.constant dense<0.000000e+00> : vector<16x128xf32>
    %18 = tpu.matmul %16, %17, %cst_15 {dimension_numbers = #tpu.dot_dimension_numbers<[1], [0], [0], [1], [0, 0, 1, 1], [], []>} : vector<16x64xbf16>, vector<64x128xbf16>, vector<16x128xf32> -> vector<16x128xf32>
    %c2 = arith.constant 2 : index
    %c0_16 = arith.constant 0 : index
    %19 = vector.load %arg10[%c2, %c0_16] : memref<8x1024xf32, #tpu.memory_space<vmem>>, vector<1x128xf32>
    %20 = vector.broadcast %19 : vector<1x128xf32> to vector<16x128xf32>
    %21 = arith.addf %18, %20 : vector<16x128xf32>
    %cst_17 = arith.constant 0.000000e+00 : f32
    %22 = vector.broadcast %cst_17 : f32 to vector<16x128xf32>
    %23 = arith.cmpf ogt, %21, %22 : vector<16x128xf32>
    %cst_18 = arith.constant 0.00999999977 : f32
    %24 = vector.broadcast %cst_18 : f32 to vector<16x128xf32>
    %25 = arith.mulf %24, %21 : vector<16x128xf32>
    %26 = arith.select %23, %21, %25 : vector<16x128xi1>, vector<16x128xf32>
    %27 = arith.truncf %26 : vector<16x128xf32> to vector<16x128xbf16>
    %c0_19 = arith.constant 0 : index
    %c0_20 = arith.constant 0 : index
    %28 = vector.load %arg6[%c0_19, %c0_20] : memref<128x256xbf16, #tpu.memory_space<vmem>>, vector<128x256xbf16>
    %cst_21 = arith.constant dense<0.000000e+00> : vector<16x256xf32>
    %29 = tpu.matmul %27, %28, %cst_21 {dimension_numbers = #tpu.dot_dimension_numbers<[1], [0], [0], [1], [0, 0, 1, 1], [], []>} : vector<16x128xbf16>, vector<128x256xbf16>, vector<16x256xf32> -> vector<16x256xf32>
    %c3 = arith.constant 3 : index
    %c0_22 = arith.constant 0 : index
    %30 = vector.load %arg10[%c3, %c0_22] : memref<8x1024xf32, #tpu.memory_space<vmem>>, vector<1x256xf32>
    %31 = vector.broadcast %30 : vector<1x256xf32> to vector<16x256xf32>
    %32 = arith.addf %29, %31 : vector<16x256xf32>
    %cst_23 = arith.constant 0.000000e+00 : f32
    %33 = vector.broadcast %cst_23 : f32 to vector<16x256xf32>
    %34 = arith.cmpf ogt, %32, %33 : vector<16x256xf32>
    %cst_24 = arith.constant 0.00999999977 : f32
    %35 = vector.broadcast %cst_24 : f32 to vector<16x256xf32>
    %36 = arith.mulf %35, %32 : vector<16x256xf32>
    %37 = arith.select %34, %32, %36 : vector<16x256xi1>, vector<16x256xf32>
    %38 = arith.truncf %37 : vector<16x256xf32> to vector<16x256xbf16>
    %c0_25 = arith.constant 0 : index
    %c0_26 = arith.constant 0 : index
    %39 = vector.load %arg7[%c0_25, %c0_26] : memref<256x512xbf16, #tpu.memory_space<vmem>>, vector<256x512xbf16>
    %cst_27 = arith.constant dense<0.000000e+00> : vector<16x512xf32>
    %40 = tpu.matmul %38, %39, %cst_27 {dimension_numbers = #tpu.dot_dimension_numbers<[1], [0], [0], [1], [0, 0, 1, 1], [], []>} : vector<16x256xbf16>, vector<256x512xbf16>, vector<16x512xf32> -> vector<16x512xf32>
    %c4 = arith.constant 4 : index
    %c0_28 = arith.constant 0 : index
    %41 = vector.load %arg10[%c4, %c0_28] : memref<8x1024xf32, #tpu.memory_space<vmem>>, vector<1x512xf32>
    %42 = vector.broadcast %41 : vector<1x512xf32> to vector<16x512xf32>
    %43 = arith.addf %40, %42 : vector<16x512xf32>
    %44 = arith.negf %43 : vector<16x512xf32>
    %45 = math.exp %44 : vector<16x512xf32>
    %cst_29 = arith.constant 1.000000e+00 : f32
    %46 = vector.broadcast %cst_29 : f32 to vector<16x512xf32>
    %47 = arith.addf %46, %45 : vector<16x512xf32>
    %48 = arith.divf %46, %47 : vector<16x512xf32>
    %49 = arith.mulf %15, %48 : vector<16x512xf32>
    %50 = arith.truncf %49 : vector<16x512xf32> to vector<16x512xbf16>
    %c0_30 = arith.constant 0 : index
    %c0_31 = arith.constant 0 : index
    %51 = vector.load %arg8[%c0_30, %c0_31] : memref<512x1024xbf16, #tpu.memory_space<vmem>>, vector<512x1024xbf16>
    %cst_32 = arith.constant dense<0.000000e+00> : vector<16x1024xf32>
    %52 = tpu.matmul %50, %51, %cst_32 {dimension_numbers = #tpu.dot_dimension_numbers<[1], [0], [0], [1], [0, 0, 1, 1], [], []>} : vector<16x512xbf16>, vector<512x1024xbf16>, vector<16x1024xf32> -> vector<16x1024xf32>
    %c5 = arith.constant 5 : index
    %c0_33 = arith.constant 0 : index
    %53 = vector.load %arg10[%c5, %c0_33] : memref<8x1024xf32, #tpu.memory_space<vmem>>, vector<1x1024xf32>
    %54 = vector.broadcast %53 : vector<1x1024xf32> to vector<16x1024xf32>
    %55 = arith.addf %52, %54 : vector<16x1024xf32>
    %cst_34 = arith.constant 0.000000e+00 : f32
    %56 = vector.broadcast %cst_34 : f32 to vector<16x1024xf32>
    %57 = arith.cmpf ogt, %55, %56 : vector<16x1024xf32>
    %cst_35 = arith.constant 0.00999999977 : f32
    %58 = vector.broadcast %cst_35 : f32 to vector<16x1024xf32>
    %59 = arith.mulf %58, %55 : vector<16x1024xf32>
    %60 = arith.select %57, %55, %59 : vector<16x1024xi1>, vector<16x1024xf32>
    %61 = arith.truncf %60 : vector<16x1024xf32> to vector<16x1024xbf16>
    %c0_36 = arith.constant 0 : index
    %c0_37 = arith.constant 0 : index
    %62 = vector.load %arg9[%c0_36, %c0_37] : memref<1024x256xbf16, #tpu.memory_space<vmem>>, vector<1024x256xbf16>
    %cst_38 = arith.constant dense<0.000000e+00> : vector<16x256xf32>
    %63 = tpu.matmul %61, %62, %cst_38 {dimension_numbers = #tpu.dot_dimension_numbers<[1], [0], [0], [1], [0, 0, 1, 1], [], []>} : vector<16x1024xbf16>, vector<1024x256xbf16>, vector<16x256xf32> -> vector<16x256xf32>
    %c6 = arith.constant 6 : index
    %c0_39 = arith.constant 0 : index
    %64 = vector.load %arg10[%c6, %c0_39] : memref<8x1024xf32, #tpu.memory_space<vmem>>, vector<1x256xf32>
    %65 = vector.broadcast %64 : vector<1x256xf32> to vector<16x256xf32>
    %66 = arith.addf %63, %65 : vector<16x256xf32>
    %c0_40 = arith.constant 0 : index
    %c0_41 = arith.constant 0 : index
    %67 = vector.load %arg11[%c0_40, %c0_41] : memref<16x256xf32, #tpu.memory_space<vmem>>, vector<16x256xf32>
    tpu.vector_store %arg11[%c0_40, %c0_41], %66 {strides = array<i32>} : memref<16x256xf32, #tpu.memory_space<vmem>>, vector<16x256xf32>,
    return
  }
  func.func @transform_0(%arg0: i32) -> (i32, i32) {
    %c0_i32 = arith.constant 0 : i32
    %c0_i32_0 = arith.constant 0 : i32
    return %arg0, %c0_i32 : i32, i32
  }
  func.func @transform_1(%arg0: i32) -> (i32, i32) {
    %c0_i32 = arith.constant 0 : i32
    %c0_i32_0 = arith.constant 0 : i32
    return %arg0, %c0_i32 : i32, i32
  }
  func.func @transform_2(%arg0: i32) -> (i32, i32) {
    %c0_i32 = arith.constant 0 : i32
    %c0_i32_0 = arith.constant 0 : i32
    %c0_i32_1 = arith.constant 0 : i32
    return %c0_i32, %c0_i32_0 : i32, i32
  }
  func.func @transform_3(%arg0: i32) -> (i32, i32) {
    %c0_i32 = arith.constant 0 : i32
    %c0_i32_0 = arith.constant 0 : i32
    %c0_i32_1 = arith.constant 0 : i32
    return %c0_i32, %c0_i32_0 : i32, i32
  }
  func.func @transform_4(%arg0: i32) -> (i32, i32) {
    %c0_i32 = arith.constant 0 : i32
    %c0_i32_0 = arith.constant 0 : i32
    %c0_i32_1 = arith.constant 0 : i32
    return %c0_i32, %c0_i32_0 : i32, i32
  }
  func.func @transform_5(%arg0: i32) -> (i32, i32) {
    %c0_i32 = arith.constant 0 : i32
    %c0_i32_0 = arith.constant 0 : i32
    %c0_i32_1 = arith.constant 0 : i32
    return %c0_i32, %c0_i32_0 : i32, i32
  }
  func.func @transform_6(%arg0: i32) -> (i32, i32) {
    %c0_i32 = arith.constant 0 : i32
    %c0_i32_0 = arith.constant 0 : i32
    %c0_i32_1 = arith.constant 0 : i32
    return %c0_i32, %c0_i32_0 : i32, i32
  }
  func.func @transform_7(%arg0: i32) -> (i32, i32) {
    %c0_i32 = arith.constant 0 : i32
    %c0_i32_0 = arith.constant 0 : i32
    %c0_i32_1 = arith.constant 0 : i32
    return %c0_i32, %c0_i32_0 : i32, i32
  }
  func.func @transform_8(%arg0: i32) -> (i32, i32) {
    %c0_i32 = arith.constant 0 : i32
    %c0_i32_0 = arith.constant 0 : i32
    %c0_i32_1 = arith.constant 0 : i32
    return %c0_i32, %c0_i32_0 : i32, i32
  }
  func.func @transform_9(%arg0: i32) -> (i32, i32) {
    %c0_i32 = arith.constant 0 : i32
    %c0_i32_0 = arith.constant 0 : i32
    %c0_i32_1 = arith.constant 0 : i32
    return %c0_i32, %c0_i32_0 : i32, i32
  }
  func.func @transform_10(%arg0: i32) -> (i32, i32) {
    %c0_i32 = arith.constant 0 : i32
    %c0_i32_0 = arith.constant 0 : i32
    return %arg0, %c0_i32 : i32, i32
  }
}

</mosaic_0001>

<bundles_post_ra>
// kernel: tile.6
= control target key start
LH: loop header
LB: loop body
LE: loop exit
PB: predicated region body
PF: predicated region fallthrough
CT: control target
= control target key end

     0   :  { %s22_s0 = inlined_call_operand.vmem [shape: f32[32], index: 0, kind: input, shape index: {}]   ;;  %s23_s1 = inlined_call_operand.vmem [shape: f32[4,32], index: 1, kind: output, shape index: {}]  }
   0x1   :  { %v4_v0 = vld [vmem:[%s22_s0] ss:$0 sm:$0xff] }
   0x2   :  { %5 = vst [vmem:[%s23_s1] sm:$0xf] %v4_v0 }

// kernel: sag_model_forward.1
= control target key start
LH: loop header
LB: loop body
LE: loop exit
PB: predicated region body
PF: predicated region fallthrough
CT: control target
= control target key end

     0   :  { %vm1597_vm0 = vcmask 1041409   ;;  %vm1599_vm1 = vcmask 1042434   ;;  %vm1601_vm2 = vcmask 1043459   ;;  %vm1603_vm3 = vcmask 1044484   ;;  %s9143_s2 = inlined_call_operand.vmem [shape: bf16[128,128], index: 2, kind: input, shape index: {}]   ;;  %s9144_s0 = inlined_call_operand.vmem [shape: bf16[1024,128], index: 0, kind: input, shape index: {}]   ;;  %s9145_s3 = inlined_call_operand.vmem [shape: bf16[128,512], index: 3, kind: input, shape index: {}]   ;;  %s9146_s9 = inlined_call_operand.vmem [shape: f32[8,1024], index: 9, kind: input, shape index: {}]   ;;  %s9147_s4 = inlined_call_operand.vmem [shape: bf16[64,128], index: 4, kind: input, shape index: {}]   ;;  %s9148_s1 = inlined_call_operand.vmem [shape: bf16[16,64], index: 1, kind: input, shape index: {}]   ;;  %s9149_s5 = inlined_call_operand.vmem [shape: bf16[128,256], index: 5, kind: input, shape index: {}]   ;;  %s9150_s6 = inlined_call_operand.vmem [shape: bf16[256,512], index: 6, kind: input, shape index: {}]   ;;  %s9151_s7 = inlined_call_operand.vmem [shape: bf16[512,1024], index: 7, kind: input, shape index: {}]   ;;  %s9152_s8 = inlined_call_operand.vmem [shape: bf16[1024,256], index: 8, kind: input, shape index: {}]   ;;  %s9153_s10 = inlined_call_operand.vmem [shape: f32[16,256], index: 10, kind: output, shape index: {}]  }
   0x1   :  { %v6507_v0 = vld [vmem:[%s9143_s2] sm:$0xff]   ;;  %v6508_v1 = vld [vmem:[%s9143_s2 + $0x8] sm:$0xff]   ;;  %v6509_v2 = vld [vmem:[%s9143_s2 + $0x10] sm:$0xff]   ;;  %vm1605_vm4 = vcmask 1045509   ;;  %vm1607_vm5 = vcmask 1046534   ;;  %vm1609_vm6 = vcmask 1047559  }
   0x2   :  { %6284 = vmatprep.subr.bf16.mxu0 %v6507_v0  ;;  %6440 = vmatprep.subr.bf16.mxu1 %v6507_v0  ;;  %v6510_v3 = vld [vmem:[%s9143_s2 + $0x18] sm:$0xff]   ;;  %v6515_v4 = vld [vmem:[%s9144_s0] sm:$0xff]   ;;  %v6521_v6 = vld [vmem:[%s9144_s0 + $0x110] sm:$0xff]   ;;  %vm6979_vm7 = vmmov 0   ;;  %vm1906_vm8 = vcmask 523264  }
   0x3   :  { %6285 = vmatpush3.bf16.msra.mxu0 %v6507_v0  ;;  %6448 = vmatpush3.bf16.msra.mxu1 %v6507_v0  ;;  %v6511_v5 = vld [vmem:[%s9143_s2 + $0x20] sm:$0xff]   ;;  %v6512_v7 = vld [vmem:[%s9143_s2 + $0x28] sm:$0xff]   ;;  %v6513_v8 = vld [vmem:[%s9143_s2 + $0x30] sm:$0xff]  }
   0x4   :  { %6286 = vmatprep.subr.bf16.mxu0 %v6508_v1  ;;  %6441 = vmatprep.subr.bf16.mxu1 %v6508_v1  ;;  %v6514_v9 = vld [vmem:[%s9143_s2 + $0x38] sm:$0xff]   ;;  %v6516_v10 = vld [vmem:[%s9144_s0 + $0x8] sm:$0xff]   ;;  %v6517_v11 = vld [vmem:[%s9144_s0 + $0x10] sm:$0xff]  }
   0x5   :  { %6300 = vmatprep.mubr.bf16.mxu0 %v6515_v4  ;;  %6368 = vmatprep.mubr.bf16.mxu1 %v6521_v6  ;;  %v6522_v12 = vld [vmem:[%s9144_s0 + $0x118] sm:$0xff]   ;;  %v6525_v13 = vld [vmem:[%s9144_s0 + $0x120] sm:$0xff]   ;;  %v6526_v16 = vld [vmem:[%s9144_s0 + $0x128] sm:$0xff]  }
   0x6   :  { %v6518_v14 = vld [vmem:[%s9144_s0 + $0x18] sm:$0xff]   ;;  %v6519_v15 = vld [vmem:[%s9144_s0 + $0x20] sm:$0xff]   ;;  %v6529_v17 = vld [vmem:[%s9144_s0 + $0x130] sm:$0xff]  }
   0x7   :  { %6287 = vmatpush3.bf16.msra.mxu0 %v6508_v1  ;;  %6449 = vmatpush3.bf16.msra.mxu1 %v6508_v1  ;;  %v6520_v18 = vld [vmem:[%s9144_s0 + $0x28] sm:$0xff]   ;;  %v6523_v19 = vld [vmem:[%s9144_s0 + $0x30] sm:$0xff]   ;;  %v6530_v20 = vld [vmem:[%s9144_s0 + $0x138] sm:$0xff]  }
   0x8   :  { %6288 = vmatprep.subr.bf16.mxu0 %v6509_v2  ;;  %6442 = vmatprep.subr.bf16.mxu1 %v6509_v2  ;;  %v6533_v21 = vld [vmem:[%s9144_s0 + $0x140] sm:$0xff]   ;;  %v6524_v22 = vld [vmem:[%s9144_s0 + $0x38] sm:$0xff]   ;;  %v6534_v24 = vld [vmem:[%s9144_s0 + $0x148] sm:$0xff]  }
   0x9   :  { %v6527_v23 = vld [vmem:[%s9144_s0 + $0x40] sm:$0xff]   ;;  %v6537_v25 = vld [vmem:[%s9144_s0 + $0x150] sm:$0xff]   ;;  %v6528_v26 = vld [vmem:[%s9144_s0 + $0x48] sm:$0xff]  }
   0xa   :  { %v6531_v27 = vld [vmem:[%s9144_s0 + $0x50] sm:$0xff]   ;;  %v6538_v28 = vld [vmem:[%s9144_s0 + $0x158] sm:$0xff]   ;;  %v6541_v29 = vld [vmem:[%s9144_s0 + $0x160] sm:$0xff]  }
   0xb   :  { %6289 = vmatpush3.bf16.msra.mxu0 %v6509_v2  ;;  %6450 = vmatpush3.bf16.msra.mxu1 %v6509_v2  ;;  %v6532_v30 = vld [vmem:[%s9144_s0 + $0x58] sm:$0xff]   ;;  %v6535_v31 = vld [vmem:[%s9144_s0 + $0x60] sm:$0xff]   ;;  %v6542_v32 = vld [vmem:[%s9144_s0 + $0x168] sm:$0xff]  }
   0xc   :  { %6290 = vmatprep.subr.bf16.mxu0 %v6510_v3  ;;  %6443 = vmatprep.subr.bf16.mxu1 %v6510_v3  ;;  %v6545_v33 = vld [vmem:[%s9144_s0 + $0x170] sm:$0xff]   ;;  %v6536_v34 = vld [vmem:[%s9144_s0 + $0x68] sm:$0xff]   ;;  %v6546_v35 = vld [vmem:[%s9144_s0 + $0x178] sm:$0xff]  }
   0xd   :  { %v6539_v36 = vld [vmem:[%s9144_s0 + $0x70] sm:$0xff]   ;;  %v6549_v37 = vld [vmem:[%s9144_s0 + $0x180] sm:$0xff]   ;;  %v6540_v38 = vld [vmem:[%s9144_s0 + $0x78] sm:$0xff]  }
   0xe   :  { %v6550_v39 = vld [vmem:[%s9144_s0 + $0x188] sm:$0xff]   ;;  %v6543_v40 = vld [vmem:[%s9144_s0 + $0x80] sm:$0xff]   ;;  %v6553_v41 = vld [vmem:[%s9144_s0 + $0x190] sm:$0xff]  }
   0xf   :  { %6291 = vmatpush3.bf16.msra.mxu0 %v6510_v3  ;;  %6451 = vmatpush3.bf16.msra.mxu1 %v6510_v3  ;;  %v6544_v42 = vld [vmem:[%s9144_s0 + $0x88] sm:$0xff]   ;;  %v6554_v43 = vld [vmem:[%s9144_s0 + $0x198] sm:$0xff]   ;;  %v6547_v44 = vld [vmem:[%s9144_s0 + $0x90] sm:$0xff]  }
  0x10   :  { %6292 = vmatprep.subr.bf16.mxu0 %v6511_v5  ;;  %6444 = vmatprep.subr.bf16.mxu1 %v6511_v5  ;;  %v6557_v45 = vld [vmem:[%s9144_s0 + $0x1a0] sm:$0xff]   ;;  %v6548_v46 = vld [vmem:[%s9144_s0 + $0x98] sm:$0xff]   ;;  %v6558_v47 = vld [vmem:[%s9144_s0 + $0x1a8] sm:$0xff]  }
  0x11   :  { %v6551_v48 = vld [vmem:[%s9144_s0 + $0xa0] sm:$0xff]   ;;  %v6561_v49 = vld [vmem:[%s9144_s0 + $0x1b0] sm:$0xff]   ;;  %v6552_v50 = vld [vmem:[%s9144_s0 + $0xa8] sm:$0xff]  }
  0x12   :  { %v6562_v51 = vld [vmem:[%s9144_s0 + $0x1b8] sm:$0xff]   ;;  %v6555_v52 = vld [vmem:[%s9144_s0 + $0xb0] sm:$0xff]   ;;  %v6565_v53 = vld [vmem:[%s9144_s0 + $0x1c0] sm:$0xff]  }
  0x13   :  { %6293 = vmatpush3.bf16.msra.mxu0 %v6511_v5  ;;  %6452 = vmatpush3.bf16.msra.mxu1 %v6511_v5  ;;  %v6556_v54 = vld [vmem:[%s9144_s0 + $0xb8] sm:$0xff]   ;;  %v6566_v55 = vld [vmem:[%s9144_s0 + $0x1c8] sm:$0xff]   ;;  %v6559_v56 = vld [vmem:[%s9144_s0 + $0xc0] sm:$0xff]  }
  0x14   :  { %6294 = vmatprep.subr.bf16.mxu0 %v6512_v7  ;;  %6445 = vmatprep.subr.bf16.mxu1 %v6512_v7  ;;  %v6569_v57 = vld [vmem:[%s9144_s0 + $0x1d0] sm:$0xff]   ;;  %v6560_v58 = vld [vmem:[%s9144_s0 + $0xc8] sm:$0xff]   ;;  %v6570_v59 = vld [vmem:[%s9144_s0 + $0x1d8] sm:$0xff]  }
  0x15   :  { %v6563_v60 = vld [vmem:[%s9144_s0 + $0xd0] sm:$0xff]   ;;  %v6573_v61 = vld [vmem:[%s9144_s0 + $0x1e0] sm:$0xff]   ;;  %v6564_v62 = vld [vmem:[%s9144_s0 + $0xd8] sm:$0xff]  }
  0x16   :  { %v6574_v63 = vld [vmem:[%s9144_s0 + $0x1e8] sm:$0xff]   ;;  %v6567_v0 = vld [vmem:[%s9144_s0 + $0xe0] sm:$0xff]   ;;  %v6577_v1 = vld [vmem:[%s9144_s0 + $0x1f0] sm:$0xff]  }
  0x17   :  { %6295 = vmatpush3.bf16.msra.mxu0 %v6512_v7  ;;  %6453 = vmatpush3.bf16.msra.mxu1 %v6512_v7  ;;  %v6568_v2 = vld [vmem:[%s9144_s0 + $0xe8] sm:$0xff]   ;;  %v6578_v3 = vld [vmem:[%s9144_s0 + $0x1f8] sm:$0xff]   ;;  %v6571_v4 = vld [vmem:[%s9144_s0 + $0xf0] sm:$0xff]  }
  0x18   :  { %6296 = vmatprep.subr.bf16.mxu0 %v6513_v8  ;;  %6446 = vmatprep.subr.bf16.mxu1 %v6513_v8  ;;  %v6572_v5 = vld [vmem:[%s9144_s0 + $0xf8] sm:$0xff]   ;;  %v6575_v6 = vld [vmem:[%s9144_s0 + $0x100] sm:$0xff]   ;;  %v6576_v7 = vld [vmem:[%s9144_s0 + $0x108] sm:$0xff]  }
  0x1b   :  { %6297 = vmatpush3.bf16.msra.mxu0 %v6513_v8  ;;  %6454 = vmatpush3.bf16.msra.mxu1 %v6513_v8  ;;  %v6579_v8 = vld [vmem:[%s9145_s3] ss:$16 sps:$4 sm:$0xff]  }
  0x1c   :  { %6298 = vmatprep.subr.bf16.mxu0 %v6514_v9  ;;  %6447 = vmatprep.subr.bf16.mxu1 %v6514_v9 }
  0x1f   :  { %6299 = vmatpush3.bf16.msra.mxu0 %v6514_v9  ;;  %6455 = vmatpush3.bf16.msra.mxu1 %v6514_v9  ;;  %v6581_v9 = vld [vmem:[%s9145_s3 + $0x4] ss:$16 sps:$4 sm:$0xff]  }
  0x20   :  { %1780 = vmatprep.subr.bf16.mxu1 %v6581_v9 }
  0x22   :  { %6301 = vmatmul.mubr.bf16.vlgmr.msra.gmra.mrb[0].mxu0 %v6516_v10  ;;  %6369 = vmatmul.mubr.bf16.vlgmr.msra.gmra.mrb[0].mxu1 %v6522_v12  ;;  %v6582_v10 = vld [vmem:[%s9145_s3 + $0x20] ss:$16 sps:$4 sm:$0xff]  }
  0x23   :  { %6304 = vmatprep.mubr.bf16.mxu0 %v6517_v11  ;;  %6372 = vmatprep.mubr.bf16.mxu1 %v6525_v13  ;;  %v6584_v11 = vld [vmem:[%s9145_s3 + $0x24] ss:$16 sps:$4 sm:$0xff]   ;;  %v6585_v12 = vld [vmem:[%s9145_s3 + $0x40] ss:$16 sps:$4 sm:$0xff]  }
  0x24   :  { %1781 = vmatpush1.bf16.msra.mxu1 %v6579_v8  ;;  %v6587_v13 = vld [vmem:[%s9145_s3 + $0x44] ss:$16 sps:$4 sm:$0xff]  }
  0x25   :  { %1782 = vmatprep.subr.bf16.mxu1 %v6584_v11 }
  0x28   :  { %1783 = vmatpush1.bf16.msra.mxu1 %v6582_v10 }
  0x29   :  { %1784 = vmatprep.subr.bf16.mxu1 %v6587_v13 }
  0x2a   :  { %6305 = vmatmul.mubr.bf16.gmra.mrb[4].mxu0 %v6518_v14  ;;  %6373 = vmatmul.mubr.bf16.gmra.mrb[4].mxu1 %v6526_v16  ;;  %v6588_v14 = vld [vmem:[%s9145_s3 + $0x60] ss:$16 sps:$4 sm:$0xff]  }
  0x2b   :  { %6308 = vmatprep.mubr.bf16.mxu0 %v6519_v15  ;;  %6376 = vmatprep.mubr.bf16.mxu1 %v6529_v17  ;;  %v6590_v15 = vld [vmem:[%s9145_s3 + $0x64] ss:$16 sps:$4 sm:$0xff]   ;;  %v7278_v16 = vld [vmem:[%s9146_s9] ss:$0 sm:$0xff] }
  0x2c   :  { %1785 = vmatpush1.bf16.msra.mxu1 %v6585_v12 }
  0x2d   :  { %1786 = vmatprep.subr.bf16.mxu1 %v6590_v15 }
  0x30   :  { %1787 = vmatpush1.bf16.msra.mxu1 %v6588_v14 }
  0x32   :  { %6309 = vmatmul.mubr.bf16.gmra.mrb[8].mxu0 %v6520_v18  ;;  %6377 = vmatmul.mubr.bf16.gmra.mrb[8].mxu1 %v6530_v20 }
  0x33   :  { %6312 = vmatprep.mubr.bf16.mxu0 %v6523_v19  ;;  %6380 = vmatprep.mubr.bf16.mxu1 %v6533_v21 }
  0x3a   :  { %6313 = vmatmul.mubr.bf16.gmra.mrb[12].mxu0 %v6524_v22  ;;  %6381 = vmatmul.mubr.bf16.gmra.mrb[12].mxu1 %v6534_v24 }
  0x3b   :  { %6316 = vmatprep.mubr.bf16.mxu0 %v6527_v23  ;;  %6384 = vmatprep.mubr.bf16.mxu1 %v6537_v25 }
  0x42   :  { %6317 = vmatmul.mubr.bf16.gmra.mrb[16].mxu0 %v6528_v26  ;;  %6385 = vmatmul.mubr.bf16.gmra.mrb[16].mxu1 %v6538_v28  ;;  %v6591_v28 = vld [vmem:[%s9145_s3 + $0x80] ss:$16 sps:$4 sm:$0xff]  }
  0x43   :  { %6320 = vmatprep.mubr.bf16.mxu0 %v6531_v27  ;;  %6388 = vmatprep.mubr.bf16.mxu1 %v6541_v29  ;;  %v6593_v29 = vld [vmem:[%s9145_s3 + $0x84] ss:$16 sps:$4 sm:$0xff]  }
  0x44   :  { %1788 = vmatprep.subr.bf16.mxu1 %v6593_v29 }
  0x45   :  { %1789 = vmatpush1.bf16.msra.mxu1 %v6591_v28 }
  0x4a   :  { %6321 = vmatmul.mubr.bf16.gmra.mrb[20].mxu0 %v6532_v30  ;;  %6389 = vmatmul.mubr.bf16.gmra.mrb[20].mxu1 %v6542_v32 }
  0x4b   :  { %6324 = vmatprep.mubr.bf16.mxu0 %v6535_v31  ;;  %6392 = vmatprep.mubr.bf16.mxu1 %v6545_v33 }
  0x52   :  { %6325 = vmatmul.mubr.bf16.gmra.mrb[24].mxu0 %v6536_v34  ;;  %6393 = vmatmul.mubr.bf16.gmra.mrb[24].mxu1 %v6546_v35 }
  0x53   :  { %6328 = vmatprep.mubr.bf16.mxu0 %v6539_v36  ;;  %6396 = vmatprep.mubr.bf16.mxu1 %v6549_v37 }
  0x5a   :  { %6329 = vmatmul.mubr.bf16.gmra.mrb[28].mxu0 %v6540_v38  ;;  %6397 = vmatmul.mubr.bf16.gmra.mrb[28].mxu1 %v6550_v39 }
  0x5b   :  { %6332 = vmatprep.mubr.bf16.mxu0 %v6543_v40  ;;  %6400 = vmatprep.mubr.bf16.mxu1 %v6553_v41 }
  0x62   :  { %6333 = vmatmul.mubr.bf16.gmra.mrb[32].mxu0 %v6544_v42  ;;  %6401 = vmatmul.mubr.bf16.gmra.mrb[32].mxu1 %v6554_v43 }
  0x63   :  { %6336 = vmatprep.mubr.bf16.mxu0 %v6547_v44  ;;  %6404 = vmatprep.mubr.bf16.mxu1 %v6557_v45 }
  0x6a   :  { %6337 = vmatmul.mubr.bf16.gmra.mrb[36].mxu0 %v6548_v46  ;;  %6405 = vmatmul.mubr.bf16.gmra.mrb[36].mxu1 %v6558_v47 }
  0x6b   :  { %6340 = vmatprep.mubr.bf16.mxu0 %v6551_v48  ;;  %6408 = vmatprep.mubr.bf16.mxu1 %v6561_v49 }
  0x72   :  { %6341 = vmatmul.mubr.bf16.gmra.mrb[40].mxu0 %v6552_v50  ;;  %6409 = vmatmul.mubr.bf16.gmra.mrb[40].mxu1 %v6562_v51 }
  0x73   :  { %6344 = vmatprep.mubr.bf16.mxu0 %v6555_v52  ;;  %6412 = vmatprep.mubr.bf16.mxu1 %v6565_v53 }
  0x7a   :  { %6345 = vmatmul.mubr.bf16.gmra.mrb[44].mxu0 %v6556_v54  ;;  %6413 = vmatmul.mubr.bf16.gmra.mrb[44].mxu1 %v6566_v55 }
  0x7b   :  { %6348 = vmatprep.mubr.bf16.mxu0 %v6559_v56  ;;  %6416 = vmatprep.mubr.bf16.mxu1 %v6569_v57 }
  0x82   :  { %6349 = vmatmul.mubr.bf16.gmra.mrb[48].mxu0 %v6560_v58  ;;  %6417 = vmatmul.mubr.bf16.gmra.mrb[48].mxu1 %v6570_v59 }
  0x83   :  { %6352 = vmatprep.mubr.bf16.mxu0 %v6563_v60  ;;  %6420 = vmatprep.mubr.bf16.mxu1 %v6573_v61 }
  0x8a   :  { %6353 = vmatmul.mubr.bf16.gmra.mrb[52].mxu0 %v6564_v62  ;;  %6421 = vmatmul.mubr.bf16.gmra.mrb[52].mxu1 %v6574_v63 }
  0x8b   :  { %6356 = vmatprep.mubr.bf16.mxu0 %v6567_v0  ;;  %6424 = vmatprep.mubr.bf16.mxu1 %v6577_v1 }
  0x92   :  { %6357 = vmatmul.mubr.bf16.gmra.mrb[56].mxu0 %v6568_v2  ;;  %6425 = vmatmul.mubr.bf16.gmra.mrb[56].mxu1 %v6578_v3 }
  0x93   :  { %6360 = vmatprep.mubr.bf16.mxu0 %v6571_v4 }
  0x9a   :  { %6361 = vmatmul.mubr.bf16.gmra.mrb[60].mxu0 %v6572_v5 }
  0x9b   :  { %6364 = vmatprep.mubr.bf16.mxu0 %v6575_v6 }
  0xa2   :  { %6365 = vmatmul.mubr.bf16.gmra.mrb[64].mxu0 %v6576_v7 }
  0xf5   :  { %v6302_v17 = vpop.f32.mrb[0].mxu0  ;;  %v7280_v18 = vpop.f32.mrb[0].mxu1 }
  0xf6   :  { %v647_v19 = vpop.f32.mrb[1].mxu0  ;;  %v7282_v20 = vpop.f32.mrb[1].mxu1  ;;  %v656_v26 = vadd.f32 %v6302_v17, %v7278_v16 }
  0xf7   :  { %v648_v21 = vadd.f32 %v647_v19, %v7278_v16  ;;  %v6303_v22 = vpop.f32.mrb[2].mxu0  ;;  %v7285_v23 = vpop.f32.mrb[2].mxu1 }
  0xf8   :  { %v650_v24 = vpop.f32.mrb[3].mxu0  ;;  %v7287_v25 = vpop.f32.mrb[3].mxu1  ;;  %v659_v31 = vadd.f32 %v6303_v22, %v7278_v16  ;;  %v1160_v33 = vmax.f32 %v656_v26, 0.0  ;;  %v6596_v22 = vld [vmem:[%s9145_s3 + $0xa4] ss:$16 sps:$4 sm:$0xff]  }
  0xf9   :  { %v651_v27 = vadd.f32 %v650_v24, %v7278_v16  ;;  %v1158_v30 = vmax.f32 %v648_v21, 0.0  ;;  %v6594_v21 = vld [vmem:[%s9145_s3 + $0xa0] ss:$16 sps:$4 sm:$0xff]   ;;  %1790 = vmatprep.subr.bf16.mxu1 %v6596_v22 }
  0xfa   :  { %v1161_v39 = vmax.f32 %v659_v31, 0.0  ;;  %1791 = vmatpush1.bf16.msra.mxu1 %v6594_v21 }
  0xfb   :  { %v1159_v32 = vmax.f32 %v651_v27, 0.0 }
  0xfd   :  { %v1286_v34 = vadd.f32 %v1159_v32, %v1158_v30  ;;  %v6306_v35 = vpop.f32.mrb[4].mxu0  ;;  %v6374_v36 = vpop.f32.mrb[4].mxu1 }
  0xfe   :  { %v663_v37 = vpop.f32.mrb[5].mxu0  ;;  %v935_v38 = vpop.f32.mrb[5].mxu1  ;;  %v944_v46 = vadd.f32 %v6374_v36, %v7278_v16  ;;  %v672_v48 = vadd.f32 %v6306_v35, %v7278_v16 }
  0xff   :  { %v1287_v40 = vadd.f32 %v1286_v34, %v1160_v33  ;;  %v664_v41 = vadd.f32 %v663_v37, %v7278_v16  ;;  %v6307_v42 = vpop.f32.mrb[6].mxu0  ;;  %v936_v43 = vadd.f32 %v935_v38, %v7278_v16  ;;  %v6375_v44 = vpop.f32.mrb[6].mxu1 }
 0x100   :  { %v666_v45 = vpop.f32.mrb[7].mxu0  ;;  %v938_v47 = vpop.f32.mrb[7].mxu1  ;;  %v947_v53 = vadd.f32 %v6375_v44, %v7278_v16  ;;  %v675_v56 = vadd.f32 %v6307_v42, %v7278_v16  ;;  %v1232_v58 = vmax.f32 %v944_v46, 0.0  ;;  %v1164_v60 = vmax.f32 %v672_v48, 0.0 }
 0x101   :  { %v1162_v49 = vmax.f32 %v664_v41, 0.0  ;;  %v1288_v50 = vadd.f32 %v1287_v40, %v1161_v39  ;;  %v667_v51 = vadd.f32 %v666_v45, %v7278_v16  ;;  %v1230_v52 = vmax.f32 %v936_v43, 0.0 }
 0x102   :  { %v939_v54 = vadd.f32 %v938_v47, %v7278_v16  ;;  %v1233_v1 = vmax.f32 %v947_v53, 0.0  ;;  %v1165_v4 = vmax.f32 %v675_v56, 0.0 }
 0x103   :  { %v1289_v55 = vadd.f32 %v1288_v50, %v1162_v49  ;;  %v1163_v57 = vmax.f32 %v667_v51, 0.0 }
 0x104   :  { %v1231_v59 = vmax.f32 %v939_v54, 0.0 }
 0x105   :  { %v1290_v61 = vadd.f32 %v1289_v55, %v1163_v57  ;;  %v6310_v62 = vpop.f32.mrb[8].mxu0  ;;  %v6378_v63 = vpop.f32.mrb[8].mxu1 }
 0x106   :  { %v679_v0 = vpop.f32.mrb[9].mxu0  ;;  %v1403_v2 = vadd.f32 %v1231_v59, %v1230_v52  ;;  %v951_v3 = vpop.f32.mrb[9].mxu1  ;;  %v960_v12 = vadd.f32 %v6378_v63, %v7278_v16  ;;  %v688_v15 = vadd.f32 %v6310_v62, %v7278_v16 }
 0x107   :  { %v1291_v5 = vadd.f32 %v1290_v61, %v1164_v60  ;;  %v680_v6 = vadd.f32 %v679_v0, %v7278_v16  ;;  %v6311_v7 = vpop.f32.mrb[10].mxu0  ;;  %v952_v8 = vadd.f32 %v951_v3, %v7278_v16  ;;  %v6379_v9 = vpop.f32.mrb[10].mxu1 }
 0x108   :  { %v682_v10 = vpop.f32.mrb[11].mxu0  ;;  %v1404_v11 = vadd.f32 %v1403_v2, %v1232_v58  ;;  %v954_v13 = vpop.f32.mrb[11].mxu1  ;;  %v963_v26 = vadd.f32 %v6379_v9, %v7278_v16  ;;  %v691_v30 = vadd.f32 %v6311_v7, %v7278_v16  ;;  %v1236_v32 = vmax.f32 %v960_v12, 0.0 }
 0x109   :  { %v1292_v14 = vadd.f32 %v1291_v5, %v1165_v4  ;;  %v683_v17 = vadd.f32 %v682_v10, %v7278_v16  ;;  %v1234_v19 = vmax.f32 %v952_v8, 0.0  ;;  %v955_v27 = vadd.f32 %v954_v13, %v7278_v16 }
 0x10a   :  { %v1405_v24 = vadd.f32 %v1404_v11, %v1233_v1  ;;  %v1166_v29 = vmax.f32 %v680_v6, 0.0  ;;  %v1168_v36 = vmax.f32 %v688_v15, 0.0  ;;  %v1237_v41 = vmax.f32 %v963_v26, 0.0 }
 0x10b   :  { %v1293_v28 = vrot.slane %v1292_v14, 4  ;;  %v1167_v31 = vmax.f32 %v683_v17, 0.0  ;;  %v1235_v34 = vmax.f32 %v955_v27, 0.0  ;;  %v1169_v44 = vmax.f32 %v691_v30, 0.0  ;;  %v6599_v30 = vld [vmem:[%s9145_s3 + $0xc4] ss:$16 sps:$4 sm:$0xff]  }
 0x10c   :  { %v1406_v33 = vadd.f32 %v1405_v24, %v1234_v19  ;;  %1792 = vmatprep.subr.bf16.mxu1 %v6599_v30 }
 0x10d   :  { %v1294_v35 = vadd.f32 %v1293_v28, %v1292_v14  ;;  %v1299_v37 = vadd.f32 %v1167_v31, %v1166_v29  ;;  %v6314_v38 = vpop.f32.mrb[12].mxu0  ;;  %v6382_v39 = vpop.f32.mrb[12].mxu1  ;;  %v6597_v29 = vld [vmem:[%s9145_s3 + $0xc0] ss:$16 sps:$4 sm:$0xff]  }
 0x10e   :  { %v695_v40 = vpop.f32.mrb[13].mxu0  ;;  %v1407_v42 = vadd.f32 %v1406_v33, %v1235_v34  ;;  %v967_v43 = vpop.f32.mrb[13].mxu1  ;;  %v704_v50 = vadd.f32 %v6314_v38, %v7278_v16  ;;  %v976_v60 = vadd.f32 %v6382_v39, %v7278_v16  ;;  %1793 = vmatpush1.bf16.msra.mxu1 %v6597_v29 }
 0x10f   :  { %v1300_v45 = vadd.f32 %v1299_v37, %v1168_v36  ;;  %v696_v46 = vadd.f32 %v695_v40, %v7278_v16  ;;  %v6315_v47 = vpop.f32.mrb[14].mxu0  ;;  %v968_v48 = vadd.f32 %v967_v43, %v7278_v16  ;;  %v6383_v49 = vpop.f32.mrb[14].mxu1  ;;  %v1295_v54 = vrot.slane %v1294_v35, 2  ;;  %v6600_v43 = vld [vmem:[%s9145_s3 + $0xe0] ss:$16 sps:$4 sm:$0xff]  }
 0x110   :  { %v698_v51 = vpop.f32.mrb[15].mxu0  ;;  %v1408_v52 = vadd.f32 %v1407_v42, %v1236_v32  ;;  %v970_v53 = vpop.f32.mrb[15].mxu1  ;;  %v707_v58 = vadd.f32 %v6315_v47, %v7278_v16  ;;  %v979_v1 = vadd.f32 %v6383_v49, %v7278_v16  ;;  %v1172_v3 = vmax.f32 %v704_v50, 0.0 }
 0x111   :  { %v1170_v55 = vmax.f32 %v696_v46, 0.0  ;;  %v1301_v56 = vadd.f32 %v1300_v45, %v1169_v44  ;;  %v699_v57 = vadd.f32 %v698_v51, %v7278_v16  ;;  %v1238_v63 = vmax.f32 %v968_v48, 0.0  ;;  %v6605_v51 = vld [vmem:[%s9145_s3 + $0xc] ss:$16 sps:$4 sm:$0xff]  }
 0x112   :  { %v7325_v59 = vadd.f32 %v1408_v52, %v1237_v41  ;;  %v971_v0 = vadd.f32 %v970_v53, %v7278_v16  ;;  %v1296_v2 = vadd.f32 %v1295_v54, %v1294_v35  ;;  %v1240_v9 = vmax.f32 %v976_v60, 0.0  ;;  %v6602_v35 = vld [vmem:[%s9145_s3 + $0xe4] ss:$16 sps:$4 sm:$0xff]  }
 0x113   :  { %v1302_v61 = vadd.f32 %v1301_v56, %v1170_v55  ;;  %v1171_v62 = vmax.f32 %v699_v57, 0.0  ;;  %v1173_v11 = vmax.f32 %v707_v58, 0.0  ;;  %v1241_v21 = vmax.f32 %v979_v1, 0.0  ;;  %1794 = vmatprep.subr.bf16.mxu1 %v6602_v35 }
 0x114   :  { %v1239_v6 = vmax.f32 %v971_v0, 0.0  ;;  %v1297_v24 = vrot.slane %v1296_v2, 1  ;;  %v6977_v50 = vmov 0   ;;  %1795 = vmatpush1.bf16.msra.mxu1 %v6600_v43 }
 0x115   :  { %v1303_v4 = vadd.f32 %v1302_v61, %v1171_v62  ;;  %v6318_v5 = vpop.f32.mrb[16].mxu0  ;;  %v6386_v7 = vpop.f32.mrb[16].mxu1  ;;  %1812 = vmatprep.mubr.bf16.mxu1 %v6977_v50  ;;  %1823 = vmatprep.subr.bf16.mxu1 %v6605_v51 }
 0x116   :  { %v711_v8 = vpop.f32.mrb[17].mxu0  ;;  %v983_v10 = vpop.f32.mrb[17].mxu1  ;;  %v1416_v15 = vadd.f32 %v1239_v6, %v1238_v63  ;;  %v720_v27 = vadd.f32 %v6318_v5, %v7278_v16  ;;  %v992_v33 = vadd.f32 %v6386_v7, %v7278_v16  ;;  %v1298_v52 = vadd.f32 %v1297_v24, %v1296_v2 }
 0x117   :  { %v1304_v12 = vadd.f32 %v1303_v4, %v1172_v3  ;;  %v712_v13 = vadd.f32 %v711_v8, %v7278_v16  ;;  %v6319_v14 = vpop.f32.mrb[18].mxu0  ;;  %v6387_v17 = vpop.f32.mrb[18].mxu1  ;;  %v984_v34 = vadd.f32 %v983_v10, %v7278_v16 }
 0x118   :  { %v714_v19 = vpop.f32.mrb[19].mxu0  ;;  %v986_v22 = vpop.f32.mrb[19].mxu1  ;;  %v723_v31 = vadd.f32 %v6319_v14, %v7278_v16  ;;  %v1417_v32 = vadd.f32 %v1416_v15, %v1240_v9  ;;  %v995_v42 = vadd.f32 %v6387_v17, %v7278_v16  ;;  %v1176_v45 = vmax.f32 %v720_v27, 0.0 }
 0x119   :  { %v1305_v26 = vadd.f32 %v1304_v12, %v1173_v11  ;;  %v715_v28 = vadd.f32 %v714_v19, %v7278_v16  ;;  %v1174_v37 = vmax.f32 %v712_v13, 0.0  ;;  %v987_v39 = vadd.f32 %v986_v22, %v7278_v16 }
 0x11a   :  { %v1242_v40 = vmax.f32 %v984_v34, 0.0  ;;  %v1418_v41 = vadd.f32 %v1417_v32, %v1241_v21  ;;  %v1244_v54 = vmax.f32 %v992_v33, 0.0  ;;  %v1177_v58 = vmax.f32 %v723_v31, 0.0 }
 0x11b   :  { %v1306_v36 = vrot.slane %v1305_v26, 4  ;;  %v1175_v38 = vmax.f32 %v715_v28, 0.0  ;;  %v1243_v48 = vmax.f32 %v987_v39, 0.0  ;;  %v1245_v3 = vmax.f32 %v995_v42, 0.0 }
 0x11c   :  { %v1419_v55 = vadd.f32 %v1418_v41, %v1242_v40  ;;  %v1494_v10 = vpack.c.bf16 %v1298_v52, %v1298_v52 }
 0x11d   :  { %v1307_v44 = vadd.f32 %v1306_v36, %v1305_v26  ;;  %v1312_v46 = vadd.f32 %v1175_v38, %v1174_v37  ;;  %v6322_v47 = vpop.f32.mrb[20].mxu0  ;;  %v6390_v49 = vpop.f32.mrb[20].mxu1 }
 0x11e   :  { %v727_v53 = vpop.f32.mrb[21].mxu0  ;;  %v999_v56 = vpop.f32.mrb[21].mxu1  ;;  %v736_v0 = vadd.f32 %v6322_v47, %v7278_v16  ;;  %v1420_v4 = vadd.f32 %v1419_v55, %v1243_v48  ;;  %v1008_v12 = vadd.f32 %v6390_v49, %v7278_v16  ;;  %v1581_v41 = vunpack.c.l.b16 %v1494_v10 }
 0x11f   :  { %v1308_v57 = vrot.slane %v1307_v44, 2  ;;  %v1313_v60 = vadd.f32 %v1312_v46, %v1176_v45  ;;  %v728_v61 = vadd.f32 %v727_v53, %v7278_v16  ;;  %v6323_v62 = vpop.f32.mrb[22].mxu0  ;;  %v6391_v63 = vpop.f32.mrb[22].mxu1  ;;  %v1000_v5 = vadd.f32 %v999_v56, %v7278_v16 }
 0x120   :  { %v730_v1 = vpop.f32.mrb[23].mxu0  ;;  %v1002_v6 = vpop.f32.mrb[23].mxu1  ;;  %v1421_v11 = vadd.f32 %v1420_v4, %v1244_v54  ;;  %v739_v15 = vadd.f32 %v6323_v62, %v7278_v16  ;;  %v1011_v22 = vadd.f32 %v6391_v63, %v7278_v16  ;;  %v1180_v27 = vmax.f32 %v736_v0, 0.0 }
 0x121   :  { %v1309_v2 = vadd.f32 %v1308_v57, %v1307_v44  ;;  %v1178_v7 = vmax.f32 %v728_v61, 0.0  ;;  %v1314_v8 = vadd.f32 %v1313_v60, %v1177_v58  ;;  %v731_v9 = vadd.f32 %v730_v1, %v7278_v16 }
 0x122   :  { %v7360_v19 = vadd.f32 %v1421_v11, %v1245_v3  ;;  %v1246_v21 = vmax.f32 %v1000_v5, 0.0  ;;  %v1003_v24 = vadd.f32 %v1002_v6, %v7278_v16  ;;  %v1248_v32 = vmax.f32 %v1008_v12, 0.0 }
 0x123   :  { %v1310_v13 = vrot.slane %v1309_v2, 1  ;;  %v1315_v14 = vadd.f32 %v1314_v8, %v1178_v7  ;;  %v1179_v17 = vmax.f32 %v731_v9, 0.0  ;;  %v1181_v36 = vmax.f32 %v739_v15, 0.0 }
 0x124   :  { %v1247_v33 = vmax.f32 %v1003_v24, 0.0  ;;  %v1249_v43 = vmax.f32 %v1011_v22, 0.0 }
 0x125   :  { %v1311_v26 = vadd.f32 %v1310_v13, %v1309_v2  ;;  %v1316_v28 = vadd.f32 %v1315_v14, %v1179_v17  ;;  %v6326_v29 = vpop.f32.mrb[24].mxu0  ;;  %v6394_v30 = vpop.f32.mrb[24].mxu1 }
 0x126   :  { %v743_v31 = vpop.f32.mrb[25].mxu0  ;;  %v1015_v34 = vpop.f32.mrb[25].mxu1  ;;  %v1429_v44 = vadd.f32 %v1247_v33, %v1246_v21  ;;  %v752_v48 = vadd.f32 %v6326_v29, %v7278_v16  ;;  %v1024_v58 = vadd.f32 %v6394_v30, %v7278_v16 }
 0x127   :  { %v1495_v35 = vpack.c.bf16 %v1311_v26, %v1311_v26  ;;  %v1317_v37 = vadd.f32 %v1316_v28, %v1180_v27  ;;  %v744_v38 = vadd.f32 %v743_v31, %v7278_v16  ;;  %v6327_v39 = vpop.f32.mrb[26].mxu0  ;;  %v6395_v40 = vpop.f32.mrb[26].mxu1  ;;  %v1016_v57 = vadd.f32 %v1015_v34, %v7278_v16 }
 0x128   :  { %v746_v42 = vpop.f32.mrb[27].mxu0  ;;  %v1018_v45 = vpop.f32.mrb[27].mxu1  ;;  %v755_v52 = vadd.f32 %v6327_v39, %v7278_v16  ;;  %v1430_v53 = vadd.f32 %v1429_v44, %v1248_v32  ;;  %v1184_v63 = vmax.f32 %v752_v48, 0.0  ;;  %v1027_v2 = vadd.f32 %v6395_v40, %v7278_v16 }
 0x129   :  { %v1582_v46 = vunpack.c.l.b16 %v1495_v35  ;;  %v1318_v47 = vadd.f32 %v1317_v37, %v1181_v36  ;;  %v747_v49 = vadd.f32 %v746_v42, %v7278_v16  ;;  %v1182_v51 = vmax.f32 %v744_v38, 0.0 }
 0x12a   :  { %v1431_v60 = vadd.f32 %v1430_v53, %v1249_v43  ;;  %v1019_v61 = vadd.f32 %v1018_v45, %v7278_v16  ;;  %v1250_v3 = vmax.f32 %v1016_v57, 0.0  ;;  %v1185_v5 = vmax.f32 %v755_v52, 0.0 }
 0x12b   :  { %v7369_v54 = vsel %vm1597_vm0, %v1582_v46, %v1581_v41  ;;  %v1319_v55 = vrot.slane %v1318_v47, 4  ;;  %v1183_v56 = vmax.f32 %v747_v49, 0.0  ;;  %v1252_v21 = vmax.f32 %v1024_v58, 0.0 }
 0x12c   :  { %v1251_v7 = vmax.f32 %v1019_v61, 0.0  ;;  %v1432_v13 = vadd.f32 %v1431_v60, %v1250_v3  ;;  %v1253_v30 = vmax.f32 %v1027_v2, 0.0 }
 0x12d   :  { %v1320_v62 = vadd.f32 %v1319_v55, %v1318_v47  ;;  %v1325_v0 = vadd.f32 %v1183_v56, %v1182_v51  ;;  %v6330_v1 = vpop.f32.mrb[28].mxu0  ;;  %v6398_v4 = vpop.f32.mrb[28].mxu1 }
 0x12e   :  { %v759_v6 = vpop.f32.mrb[29].mxu0  ;;  %v1031_v8 = vpop.f32.mrb[29].mxu1  ;;  %v768_v15 = vadd.f32 %v6330_v1, %v7278_v16  ;;  %v1433_v31 = vadd.f32 %v1432_v13, %v1251_v7  ;;  %v1040_v32 = vadd.f32 %v6398_v4, %v7278_v16 }
 0x12f   :  { %v1321_v9 = vrot.slane %v1320_v62, 2  ;;  %v1326_v10 = vadd.f32 %v1325_v0, %v1184_v63  ;;  %v760_v11 = vadd.f32 %v759_v6, %v7278_v16  ;;  %v6331_v12 = vpop.f32.mrb[30].mxu0  ;;  %v6399_v14 = vpop.f32.mrb[30].mxu1  ;;  %v1032_v36 = vadd.f32 %v1031_v8, %v7278_v16 }
 0x130   :  { %v762_v17 = vpop.f32.mrb[31].mxu0  ;;  %v1034_v22 = vpop.f32.mrb[31].mxu1  ;;  %v771_v29 = vadd.f32 %v6331_v12, %v7278_v16  ;;  %v1434_v37 = vadd.f32 %v1433_v31, %v1252_v21  ;;  %v1043_v38 = vadd.f32 %v6399_v14, %v7278_v16  ;;  %v1188_v41 = vmax.f32 %v768_v15, 0.0 }
 0x131   :  { %v1322_v24 = vadd.f32 %v1321_v9, %v1320_v62  ;;  %v1186_v26 = vmax.f32 %v760_v11, 0.0  ;;  %v1327_v27 = vadd.f32 %v1326_v10, %v1185_v5  ;;  %v763_v28 = vadd.f32 %v762_v17, %v7278_v16 }
 0x132   :  { %v1035_v39 = vadd.f32 %v1034_v22, %v7278_v16  ;;  %v1254_v44 = vmax.f32 %v1032_v36, 0.0  ;;  %v7383_v47 = vadd.f32 %v1434_v37, %v1253_v30  ;;  %v1256_v48 = vmax.f32 %v1040_v32, 0.0 }
 0x133   :  { %v1323_v33 = vrot.slane %v1322_v24, 1  ;;  %v1328_v34 = vadd.f32 %v1327_v27, %v1186_v26  ;;  %v1187_v35 = vmax.f32 %v763_v28, 0.0  ;;  %v1189_v53 = vmax.f32 %v771_v29, 0.0 }
 0x134   :  { %v1255_v49 = vmax.f32 %v1035_v39, 0.0  ;;  %v1257_v61 = vmax.f32 %v1043_v38, 0.0 }
 0x135   :  { %v1324_v40 = vadd.f32 %v1323_v33, %v1322_v24  ;;  %v1329_v42 = vadd.f32 %v1328_v34, %v1187_v35  ;;  %v6334_v43 = vpop.f32.mrb[32].mxu0  ;;  %v6402_v45 = vpop.f32.mrb[32].mxu1 }
 0x136   :  { %v775_v46 = vpop.f32.mrb[33].mxu0  ;;  %v1047_v51 = vpop.f32.mrb[33].mxu1  ;;  %v1442_v62 = vadd.f32 %v1255_v49, %v1254_v44  ;;  %v784_v3 = vadd.f32 %v6334_v43, %v7278_v16  ;;  %v1056_v11 = vadd.f32 %v6402_v45, %v7278_v16 }
 0x137   :  { %v1496_v52 = vpack.c.bf16 %v1324_v40, %v1324_v40  ;;  %v1330_v55 = vadd.f32 %v1329_v42, %v1188_v41  ;;  %v776_v56 = vadd.f32 %v775_v46, %v7278_v16  ;;  %v6335_v57 = vpop.f32.mrb[34].mxu0  ;;  %v6403_v58 = vpop.f32.mrb[34].mxu1  ;;  %v1048_v10 = vadd.f32 %v1047_v51, %v7278_v16 }
 0x138   :  { %v778_v60 = vpop.f32.mrb[35].mxu0  ;;  %v1050_v63 = vpop.f32.mrb[35].mxu1  ;;  %v787_v6 = vadd.f32 %v6335_v57, %v7278_v16  ;;  %v1443_v2 = vadd.f32 %v1442_v62, %v1256_v48  ;;  %v1192_v15 = vmax.f32 %v784_v3, 0.0  ;;  %v1260_v38 = vmax.f32 %v1056_v11, 0.0 }
 0x139   :  { %v1583_v0 = vunpack.c.l.b16 %v1496_v52  ;;  %v1331_v1 = vadd.f32 %v1330_v55, %v1189_v53  ;;  %v779_v4 = vadd.f32 %v778_v60, %v7278_v16  ;;  %v1190_v5 = vmax.f32 %v776_v56, 0.0 }
 0x13a   :  { %v1444_v12 = vadd.f32 %v1443_v2, %v1257_v61  ;;  %v1051_v13 = vadd.f32 %v1050_v63, %v7278_v16  ;;  %v1258_v22 = vmax.f32 %v1048_v10, 0.0  ;;  %v1193_v26 = vmax.f32 %v787_v6, 0.0 }
 0x13b   :  { %v7391_v7 = vsel %vm1599_vm1, %v1583_v0, %v7369_v54  ;;  %v1332_v8 = vrot.slane %v1331_v1, 4  ;;  %v1191_v9 = vmax.f32 %v779_v4, 0.0  ;;  %v1059_v54 = vadd.f32 %v6403_v58, %v7278_v16 }
 0x13c   :  { %v1259_v28 = vmax.f32 %v1051_v13, 0.0  ;;  %v1445_v34 = vadd.f32 %v1444_v12, %v1258_v22 }
 0x13d   :  { %v1333_v14 = vadd.f32 %v1332_v8, %v1331_v1  ;;  %v1338_v17 = vadd.f32 %v1191_v9, %v1190_v5  ;;  %v6338_v21 = vpop.f32.mrb[36].mxu0  ;;  %v6406_v24 = vpop.f32.mrb[36].mxu1  ;;  %v1261_v45 = vmax.f32 %v1059_v54, 0.0 }
 0x13e   :  { %v791_v27 = vpop.f32.mrb[37].mxu0  ;;  %v1063_v29 = vpop.f32.mrb[37].mxu1  ;;  %v800_v36 = vadd.f32 %v6338_v21, %v7278_v16  ;;  %v1446_v46 = vadd.f32 %v1445_v34, %v1259_v28  ;;  %v1072_v55 = vadd.f32 %v6406_v24, %v7278_v16 }
 0x13f   :  { %v1334_v30 = vrot.slane %v1333_v14, 2  ;;  %v1339_v31 = vadd.f32 %v1338_v17, %v1192_v15  ;;  %v792_v32 = vadd.f32 %v791_v27, %v7278_v16  ;;  %v6339_v33 = vpop.f32.mrb[38].mxu0  ;;  %v6407_v35 = vpop.f32.mrb[38].mxu1  ;;  %v1064_v52 = vadd.f32 %v1063_v29, %v7278_v16 }
 0x140   :  { %v794_v37 = vpop.f32.mrb[39].mxu0  ;;  %v1066_v39 = vpop.f32.mrb[39].mxu1  ;;  %v803_v44 = vadd.f32 %v6339_v33, %v7278_v16  ;;  %v1447_v53 = vadd.f32 %v1446_v46, %v1260_v38  ;;  %v1196_v58 = vmax.f32 %v800_v36, 0.0  ;;  %v1075_v4 = vadd.f32 %v6407_v35, %v7278_v16 }
 0x141   :  { %v1335_v40 = vadd.f32 %v1334_v30, %v1333_v14  ;;  %v1194_v41 = vmax.f32 %v792_v32, 0.0  ;;  %v1340_v42 = vadd.f32 %v1339_v31, %v1193_v26  ;;  %v795_v43 = vadd.f32 %v794_v37, %v7278_v16 }
 0x142   :  { %v1067_v56 = vadd.f32 %v1066_v39, %v7278_v16  ;;  %v1197_v63 = vmax.f32 %v803_v44, 0.0  ;;  %v7404_v1 = vadd.f32 %v1447_v53, %v1261_v45  ;;  %v1262_v3 = vmax.f32 %v1064_v52, 0.0 }
 0x143   :  { %v1336_v48 = vrot.slane %v1335_v40, 1  ;;  %v1341_v49 = vadd.f32 %v1340_v42, %v1194_v41  ;;  %v1195_v51 = vmax.f32 %v795_v43, 0.0  ;;  %v1264_v13 = vmax.f32 %v1072_v55, 0.0 }
 0x144   :  { %v1263_v10 = vmax.f32 %v1067_v56, 0.0  ;;  %v1265_v27 = vmax.f32 %v1075_v4, 0.0 }
 0x145   :  { %v1337_v57 = vadd.f32 %v1336_v48, %v1335_v40  ;;  %v1342_v60 = vadd.f32 %v1341_v49, %v1195_v51  ;;  %v6342_v61 = vpop.f32.mrb[40].mxu0  ;;  %v6410_v62 = vpop.f32.mrb[40].mxu1 }
 0x146   :  { %v807_v0 = vpop.f32.mrb[41].mxu0  ;;  %v1079_v5 = vpop.f32.mrb[41].mxu1  ;;  %v816_v21 = vadd.f32 %v6342_v61, %v7278_v16  ;;  %v1455_v54 = vadd.f32 %v1263_v10, %v1262_v3  ;;  %v1088_v33 = vadd.f32 %v6410_v62, %v7278_v16 }
 0x147   :  { %v1497_v6 = vpack.c.bf16 %v1337_v57, %v1337_v57  ;;  %v1343_v2 = vadd.f32 %v1342_v60, %v1196_v58  ;;  %v808_v8 = vadd.f32 %v807_v0, %v7278_v16  ;;  %v6343_v9 = vpop.f32.mrb[42].mxu0  ;;  %v6411_v11 = vpop.f32.mrb[42].mxu1  ;;  %v1080_v31 = vadd.f32 %v1079_v5, %v7278_v16 }
 0x148   :  { %v810_v12 = vpop.f32.mrb[43].mxu0  ;;  %v1082_v14 = vpop.f32.mrb[43].mxu1  ;;  %v819_v26 = vadd.f32 %v6343_v9, %v7278_v16  ;;  %v1456_v32 = vadd.f32 %v1455_v54, %v1264_v13  ;;  %v1200_v36 = vmax.f32 %v816_v21, 0.0  ;;  %v1268_v56 = vmax.f32 %v1088_v33, 0.0 }
 0x149   :  { %v1584_v15 = vunpack.c.l.b16 %v1497_v6  ;;  %v1344_v17 = vadd.f32 %v1343_v2, %v1197_v63  ;;  %v811_v22 = vadd.f32 %v810_v12, %v7278_v16  ;;  %v1198_v24 = vmax.f32 %v808_v8, 0.0 }
 0x14a   :  { %v1083_v34 = vadd.f32 %v1082_v14, %v7278_v16  ;;  %v1266_v39 = vmax.f32 %v1080_v31, 0.0  ;;  %v1201_v41 = vmax.f32 %v819_v26, 0.0  ;;  %v1457_v43 = vadd.f32 %v1456_v32, %v1265_v27 }
 0x14b   :  { %v7413_v28 = vsel %vm1601_vm2, %v1584_v15, %v7391_v7  ;;  %v1345_v29 = vrot.slane %v1344_v17, 4  ;;  %v1199_v30 = vmax.f32 %v811_v22, 0.0  ;;  %v1091_v7 = vadd.f32 %v6411_v11, %v7278_v16 }
 0x14c   :  { %v1267_v51 = vmax.f32 %v1083_v34, 0.0  ;;  %v1458_v57 = vadd.f32 %v1457_v43, %v1266_v39 }
 0x14d   :  { %v1346_v35 = vadd.f32 %v1345_v29, %v1344_v17  ;;  %v1351_v37 = vadd.f32 %v1199_v30, %v1198_v24  ;;  %v6346_v38 = vpop.f32.mrb[44].mxu0  ;;  %v6414_v40 = vpop.f32.mrb[44].mxu1  ;;  %v1269_v3 = vmax.f32 %v1091_v7, 0.0 }
 0x14e   :  { %v823_v42 = vpop.f32.mrb[45].mxu0  ;;  %v1095_v44 = vpop.f32.mrb[45].mxu1  ;;  %v832_v53 = vadd.f32 %v6346_v38, %v7278_v16  ;;  %v1459_v4 = vadd.f32 %v1458_v57, %v1267_v51  ;;  %v1104_v10 = vadd.f32 %v6414_v40, %v7278_v16 }
 0x14f   :  { %v1347_v45 = vrot.slane %v1346_v35, 2  ;;  %v1352_v46 = vadd.f32 %v1351_v37, %v1200_v36  ;;  %v824_v48 = vadd.f32 %v823_v42, %v7278_v16  ;;  %v6347_v49 = vpop.f32.mrb[46].mxu0  ;;  %v6415_v52 = vpop.f32.mrb[46].mxu1  ;;  %v1096_v8 = vadd.f32 %v1095_v44, %v7278_v16 }
 0x150   :  { %v826_v55 = vpop.f32.mrb[47].mxu0  ;;  %v1098_v58 = vpop.f32.mrb[47].mxu1  ;;  %v835_v0 = vadd.f32 %v6347_v49, %v7278_v16  ;;  %v1460_v9 = vadd.f32 %v1459_v4, %v1268_v56  ;;  %v1204_v12 = vmax.f32 %v832_v53, 0.0  ;;  %v1107_v27 = vadd.f32 %v6415_v52, %v7278_v16 }
 0x151   :  { %v1348_v60 = vadd.f32 %v1347_v45, %v1346_v35  ;;  %v1202_v61 = vmax.f32 %v824_v48, 0.0  ;;  %v1353_v62 = vadd.f32 %v1352_v46, %v1201_v41  ;;  %v827_v63 = vadd.f32 %v826_v55, %v7278_v16 }
 0x152   :  { %v1099_v15 = vadd.f32 %v1098_v58, %v7278_v16  ;;  %v1205_v21 = vmax.f32 %v835_v0, 0.0  ;;  %v7426_v24 = vadd.f32 %v1460_v9, %v1269_v3  ;;  %v1270_v26 = vmax.f32 %v1096_v8, 0.0 }
 0x153   :  { %v1349_v5 = vrot.slane %v1348_v60, 1  ;;  %v1354_v6 = vadd.f32 %v1353_v62, %v1202_v61  ;;  %v1203_v2 = vmax.f32 %v827_v63, 0.0  ;;  %v1272_v36 = vmax.f32 %v1104_v10, 0.0 }
 0x154   :  { %v1271_v33 = vmax.f32 %v1099_v15, 0.0  ;;  %v1273_v7 = vmax.f32 %v1107_v27, 0.0 }
 0x155   :  { %v1350_v11 = vadd.f32 %v1349_v5, %v1348_v60  ;;  %v1355_v13 = vadd.f32 %v1354_v6, %v1203_v2  ;;  %v6350_v14 = vpop.f32.mrb[48].mxu0  ;;  %v6418_v17 = vpop.f32.mrb[48].mxu1 }
 0x156   :  { %v839_v22 = vpop.f32.mrb[49].mxu0  ;;  %v1111_v54 = vpop.f32.mrb[49].mxu1  ;;  %v848_v40 = vadd.f32 %v6350_v14, %v7278_v16  ;;  %v1468_v44 = vadd.f32 %v1271_v33, %v1270_v26  ;;  %v1120_v52 = vadd.f32 %v6418_v17, %v7278_v16 }
 0x157   :  { %v1498_v29 = vpack.c.bf16 %v1350_v11, %v1350_v11  ;;  %v1356_v30 = vadd.f32 %v1355_v13, %v1204_v12  ;;  %v840_v31 = vadd.f32 %v839_v22, %v7278_v16  ;;  %v6351_v32 = vpop.f32.mrb[50].mxu0  ;;  %v6419_v34 = vpop.f32.mrb[50].mxu1  ;;  %v1112_v49 = vadd.f32 %v1111_v54, %v7278_v16 }
 0x158   :  { %v842_v35 = vpop.f32.mrb[51].mxu0  ;;  %v1114_v37 = vpop.f32.mrb[51].mxu1  ;;  %v851_v43 = vadd.f32 %v6351_v32, %v7278_v16  ;;  %v1469_v51 = vadd.f32 %v1468_v44, %v1272_v36  ;;  %v1208_v56 = vmax.f32 %v848_v40, 0.0  ;;  %v1276_v12 = vmax.f32 %v1120_v52, 0.0 }
 0x159   :  { %v1585_v38 = vunpack.c.l.b16 %v1498_v29  ;;  %v1357_v39 = vadd.f32 %v1356_v30, %v1205_v21  ;;  %v843_v41 = vadd.f32 %v842_v35, %v7278_v16  ;;  %v1206_v42 = vmax.f32 %v840_v31, 0.0 }
 0x15a   :  { %v1115_v53 = vadd.f32 %v1114_v37, %v7278_v16  ;;  %v1274_v60 = vmax.f32 %v1112_v49, 0.0  ;;  %v1209_v62 = vmax.f32 %v851_v43, 0.0  ;;  %v1470_v0 = vadd.f32 %v1469_v51, %v1273_v7 }
 0x15b   :  { %v7435_v45 = vsel %vm1603_vm3, %v1585_v38, %v7413_v28  ;;  %v1358_v46 = vrot.slane %v1357_v39, 4  ;;  %v1207_v48 = vmax.f32 %v843_v41, 0.0  ;;  %v1123_v28 = vadd.f32 %v6419_v34, %v7278_v16 }
 0x15c   :  { %v1275_v8 = vmax.f32 %v1115_v53, 0.0  ;;  %v1471_v13 = vadd.f32 %v1470_v0, %v1274_v60 }
 0x15d   :  { %v1359_v55 = vadd.f32 %v1358_v46, %v1357_v39  ;;  %v1364_v57 = vadd.f32 %v1207_v48, %v1206_v42  ;;  %v6354_v58 = vpop.f32.mrb[52].mxu0  ;;  %v6422_v61 = vpop.f32.mrb[52].mxu1  ;;  %v1277_v27 = vmax.f32 %v1123_v28, 0.0 }
 0x15e   :  { %v855_v63 = vpop.f32.mrb[53].mxu0  ;;  %v1127_v3 = vpop.f32.mrb[53].mxu1  ;;  %v864_v10 = vadd.f32 %v6354_v58, %v7278_v16  ;;  %v1472_v54 = vadd.f32 %v1471_v13, %v1275_v8  ;;  %v1136_v34 = vadd.f32 %v6422_v61, %v7278_v16 }
 0x15f   :  { %v1360_v4 = vrot.slane %v1359_v55, 2  ;;  %v1365_v5 = vadd.f32 %v1364_v57, %v1208_v56  ;;  %v856_v6 = vadd.f32 %v855_v63, %v7278_v16  ;;  %v6355_v2 = vpop.f32.mrb[54].mxu0  ;;  %v6423_v9 = vpop.f32.mrb[54].mxu1  ;;  %v1128_v32 = vadd.f32 %v1127_v3, %v7278_v16 }
 0x160   :  { %v858_v11 = vpop.f32.mrb[55].mxu0  ;;  %v1130_v14 = vpop.f32.mrb[55].mxu1  ;;  %v867_v26 = vadd.f32 %v6355_v2, %v7278_v16  ;;  %v1473_v33 = vadd.f32 %v1472_v54, %v1276_v12  ;;  %v1212_v36 = vmax.f32 %v864_v10, 0.0  ;;  %v1139_v44 = vadd.f32 %v6423_v9, %v7278_v16 }
 0x161   :  { %v1361_v15 = vadd.f32 %v1360_v4, %v1359_v55  ;;  %v1210_v17 = vmax.f32 %v856_v6, 0.0  ;;  %v1366_v21 = vadd.f32 %v1365_v5, %v1209_v62  ;;  %v859_v22 = vadd.f32 %v858_v11, %v7278_v16  ;;  %v7455_v62 = vld [vmem:[%s9146_s9] ss:$0 sm:$0xff] }
 0x162   :  { %v1131_v39 = vadd.f32 %v1130_v14, %v7278_v16  ;;  %v1213_v41 = vmax.f32 %v867_v26, 0.0  ;;  %v7448_v43 = vadd.f32 %v1473_v33, %v1277_v27  ;;  %v1278_v7 = vmax.f32 %v1128_v32, 0.0 }
 0x163   :  { %v1362_v29 = vrot.slane %v1361_v15, 1  ;;  %v1367_v30 = vadd.f32 %v1366_v21, %v1210_v17  ;;  %v1211_v31 = vmax.f32 %v859_v22, 0.0  ;;  %v1280_v57 = vmax.f32 %v1136_v34, 0.0 }
 0x164   :  { %v1279_v53 = vmax.f32 %v1131_v39, 0.0  ;;  %v1281_v28 = vmax.f32 %v1139_v44, 0.0 }
 0x165   :  { %v1363_v35 = vadd.f32 %v1362_v29, %v1361_v15  ;;  %v1368_v37 = vadd.f32 %v1367_v30, %v1211_v31  ;;  %v6358_v38 = vpop.f32.mrb[56].mxu0  ;;  %v6426_v40 = vpop.f32.mrb[56].mxu1 }
 0x166   :  { %v871_v42 = vpop.f32.mrb[57].mxu0  ;;  %v1143_v46 = vpop.f32.mrb[57].mxu1  ;;  %v880_v63 = vadd.f32 %v7455_v62, %v6358_v38  ;;  %v1481_v3 = vadd.f32 %v1279_v53, %v1278_v7  ;;  %v1152_v9 = vadd.f32 %v7455_v62, %v6426_v40 }
 0x167   :  { %v1499_v48 = vpack.c.bf16 %v1363_v35, %v1363_v35  ;;  %v1369_v49 = vadd.f32 %v1368_v37, %v1212_v36  ;;  %v872_v51 = vadd.f32 %v871_v42, %v7278_v16  ;;  %v6359_v52 = vpop.f32.mrb[58].mxu0  ;;  %v6427_v55 = vpop.f32.mrb[58].mxu1  ;;  %v1144_v2 = vadd.f32 %v7455_v62, %v1143_v46 }
 0x168   :  { %v874_v56 = vpop.f32.mrb[59].mxu0  ;;  %v1146_v58 = vpop.f32.mrb[59].mxu1  ;;  %v883_v16 = vadd.f32 %v7455_v62, %v6359_v52  ;;  %v1482_v8 = vadd.f32 %v1481_v3, %v1280_v57  ;;  %v1216_v13 = vmax.f32 %v880_v63, 0.0  ;;  %v1155_v26 = vadd.f32 %v7455_v62, %v6427_v55 }
 0x169   :  { %v1586_v60 = vunpack.c.l.b16 %v1499_v48  ;;  %v1370_v61 = vadd.f32 %v1369_v49, %v1213_v41  ;;  %v875_v0 = vadd.f32 %v7455_v62, %v874_v56  ;;  %v1214_v5 = vmax.f32 %v872_v51, 0.0 }
 0x16a   :  { %v1147_v10 = vadd.f32 %v7455_v62, %v1146_v58  ;;  %v1282_v17 = vmax.f32 %v1144_v2, 0.0  ;;  %v1483_v22 = vadd.f32 %v1482_v8, %v1281_v28  ;;  %v1217_v29 = vmax.f32 %v883_v16, 0.0 }
 0x16b   :  { %v1371_v4 = vrot.slane %v1370_v61, 4  ;;  %v1215_v6 = vmax.f32 %v875_v0, 0.0  ;;  %v1606_v11 = vsel %vm1605_vm4, %v1586_v60, %v7435_v45  ;;  %v1284_v45 = vmax.f32 %v1152_v9, 0.0 }
 0x16c   :  { %v1283_v27 = vmax.f32 %v1147_v10, 0.0  ;;  %v1484_v35 = vadd.f32 %v1483_v22, %v1282_v17  ;;  %v1285_v40 = vmax.f32 %v1155_v26, 0.0  ;;  %v920_v10 = vadd.f32 %v7455_v62, %v7282_v20 }
 0x16d   :  { %v1372_v12 = vadd.f32 %v1371_v4, %v1370_v61  ;;  %v1377_v14 = vadd.f32 %v1215_v6, %v1214_v5  ;;  %v6362_v15 = vpop.f32.mrb[60].mxu0  ;;  %v923_v17 = vadd.f32 %v7455_v62, %v7287_v25  ;;  %v1436_v22 = vrot.slane %v7383_v47, 4 }
 0x16e   :  { %v887_v21 = vpop.f32.mrb[61].mxu0  ;;  %v896_v33 = vadd.f32 %v7455_v62, %v6362_v15  ;;  %v1485_v41 = vadd.f32 %v1484_v35, %v1283_v27  ;;  %v1449_v20 = vrot.slane %v7404_v1, 4  ;;  %v931_v25 = vadd.f32 %v7455_v62, %v7285_v23 }
 0x16f   :  { %v1373_v54 = vrot.slane %v1372_v12, 2  ;;  %v1378_v30 = vadd.f32 %v1377_v14, %v1216_v13  ;;  %v888_v31 = vadd.f32 %v7455_v62, %v887_v21  ;;  %v6363_v32 = vpop.f32.mrb[62].mxu0  ;;  %v1423_v21 = vrot.slane %v7360_v19, 4 }
 0x170   :  { %v890_v34 = vpop.f32.mrb[63].mxu0  ;;  %v899_v44 = vadd.f32 %v7455_v62, %v6363_v32  ;;  %v1486_v48 = vadd.f32 %v1485_v41, %v1284_v45  ;;  %v1220_v51 = vmax.f32 %v896_v33, 0.0  ;;  %v1475_v35 = vrot.slane %v7448_v43, 4 }
 0x171   :  { %v1374_v36 = vadd.f32 %v1373_v54, %v1372_v12  ;;  %v1218_v37 = vmax.f32 %v888_v31, 0.0  ;;  %v1379_v38 = vadd.f32 %v1378_v30, %v1217_v29  ;;  %v891_v39 = vadd.f32 %v7455_v62, %v890_v34 }
 0x172   :  { %v1487_v56 = vadd.f32 %v1486_v48, %v1285_v40  ;;  %v1221_v58 = vmax.f32 %v899_v44, 0.0  ;;  %v1410_v12 = vrot.slane %v7325_v59, 4  ;;  %v1226_v29 = vmax.f32 %v920_v10, 0.0 }
 0x173   :  { %v1375_v42 = vrot.slane %v1374_v36, 1  ;;  %v1380_v7 = vadd.f32 %v1379_v38, %v1218_v37  ;;  %v1219_v46 = vmax.f32 %v891_v39, 0.0  ;;  %v1462_v31 = vrot.slane %v7426_v24, 4 }
 0x174   :  { %v1411_v30 = vadd.f32 %v1410_v12, %v7325_v59  ;;  %v1227_v34 = vmax.f32 %v923_v17, 0.0  ;;  %v1424_v45 = vadd.f32 %v1423_v21, %v7360_v19  ;;  %v1488_v38 = vrot.slane %v1487_v56, 4 }
 0x175   :  { %v1376_v49 = vadd.f32 %v1375_v42, %v1374_v36  ;;  %v1381_v52 = vadd.f32 %v1380_v7, %v1219_v46  ;;  %v6366_v53 = vpop.f32.mrb[64].mxu0  ;;  %v1437_v36 = vadd.f32 %v1436_v22, %v7383_v47  ;;  %v1450_v59 = vadd.f32 %v1449_v20, %v7404_v1 }
 0x176   :  { %v903_v55 = vpop.f32.mrb[65].mxu0  ;;  %v912_v3 = vadd.f32 %v7455_v62, %v6366_v53  ;;  %v1412_v40 = vrot.slane %v1411_v30, 2  ;;  %v1463_v41 = vadd.f32 %v1462_v31, %v7426_v24  ;;  %v1229_v44 = vmax.f32 %v931_v25, 0.0 }
 0x177   :  { %v1500_v57 = vpack.c.bf16 %v1376_v49, %v1376_v49  ;;  %v1382_v60 = vadd.f32 %v1381_v52, %v1220_v51  ;;  %v904_v61 = vadd.f32 %v7455_v62, %v903_v55  ;;  %v6367_v63 = vpop.f32.mrb[66].mxu0  ;;  %v1425_v23 = vrot.slane %v1424_v45, 2 }
 0x178   :  { %v906_v0 = vpop.f32.mrb[67].mxu0  ;;  %v915_v5 = vadd.f32 %v7455_v62, %v6367_v63  ;;  %v1224_v14 = vmax.f32 %v912_v3, 0.0  ;;  %v1438_v19 = vrot.slane %v1437_v36, 2  ;;  %v1489_v49 = vadd.f32 %v1488_v38, %v1487_v56 }
 0x179   :  { %v1587_v16 = vunpack.c.l.b16 %v1500_v57  ;;  %v1383_v28 = vadd.f32 %v1382_v60, %v1221_v58  ;;  %v907_v4 = vadd.f32 %v7455_v62, %v906_v0  ;;  %v1222_v2 = vmax.f32 %v904_v61, 0.0 }
 0x17a   :  { %v1225_v27 = vmax.f32 %v915_v5, 0.0  ;;  %v1451_v47 = vrot.slane %v1450_v59, 2  ;;  %v1413_v51 = vadd.f32 %v1412_v40, %v1411_v30  ;;  %v1464_v52 = vrot.slane %v1463_v41, 2 }
 0x17b   :  { %v1384_v6 = vrot.slane %v1383_v28, 4  ;;  %v1223_v8 = vmax.f32 %v907_v4, 0.0  ;;  %v1608_v9 = vsel %vm1607_vm5, %v1587_v16, %v1606_v11  ;;  %v928_v11 = vadd.f32 %v7455_v62, %v7280_v18 }
 0x17c   :  { %v1476_v62 = vadd.f32 %v1475_v35, %v7448_v43  ;;  %v1426_v1 = vadd.f32 %v1425_v23, %v1424_v45  ;;  %v1439_v58 = vadd.f32 %v1438_v19, %v1437_v36  ;;  %v1490_v60 = vrot.slane %v1489_v49, 2  ;;  %v6608_v19 = vld [vmem:[%s9145_s3 + $0x2c] ss:$16 sps:$4 sm:$0xff]  }
 0x17d   :  { %v1385_v13 = vadd.f32 %v1384_v6, %v1383_v28  ;;  %v1390_v15 = vadd.f32 %v1223_v8, %v1222_v2  ;;  %v1228_v39 = vmax.f32 %v928_v11, 0.0  ;;  %v1452_v63 = vadd.f32 %v1451_v47, %v1450_v59  ;;  %v6614_v47 = vld [vmem:[%s9145_s3 + $0x6c] ss:$16 sps:$4 sm:$0xff]  }
 0x17e   :  { %v1477_v57 = vrot.slane %v1476_v62, 2  ;;  %v1414_v0 = vrot.slane %v1413_v51, 1  ;;  %v1465_v43 = vadd.f32 %v1464_v52, %v1463_v41  ;;  %v1427_v28 = vrot.slane %v1426_v1, 1  ;;  %v6617_v52 = vld [vmem:[%s9145_s3 + $0x8c] ss:$16 sps:$4 sm:$0xff]  }
 0x17f   :  { %v1386_v26 = vrot.slane %v1385_v13, 2  ;;  %v1391_v54 = vadd.f32 %v1390_v15, %v1224_v14  ;;  %v1440_v56 = vrot.slane %v1439_v58, 1  ;;  %v1491_v5 = vadd.f32 %v1490_v60, %v1489_v49  ;;  %v6609_v49 = vld [vmem:[%s9145_s3 + $0x48] ss:$16 sps:$4 sm:$0xff]  }
 0x180   :  { %v1478_v3 = vadd.f32 %v1477_v57, %v1476_v62  ;;  %v1453_v6 = vrot.slane %v1452_v63, 1  ;;  %v1415_v2 = vadd.f32 %v1414_v0, %v1413_v51  ;;  %v1466_v8 = vrot.slane %v1465_v43, 1  ;;  %v6612_v51 = vld [vmem:[%s9145_s3 + $0x68] ss:$16 sps:$4 sm:$0xff]   ;;  %v6623_v57 = vld [vmem:[%s9145_s3 + $0xcc] ss:$16 sps:$4 sm:$0xff]  }
 0x181   :  { %v1387_v32 = vadd.f32 %v1386_v26, %v1385_v13  ;;  %v1392_v33 = vadd.f32 %v1391_v54, %v1225_v27  ;;  %v1428_v12 = vadd.f32 %v1427_v28, %v1426_v1  ;;  %v1441_v14 = vadd.f32 %v1440_v56, %v1439_v58  ;;  %v6618_v1 = vld [vmem:[%s9145_s3 + $0xa8] ss:$16 sps:$4 sm:$0xff]   ;;  %v6631_v28 = vld [vmem:[%s9148_s1] sm:$0xff]  }
 0x182   :  { %v1479_v13 = vrot.slane %v1478_v3, 1  ;;  %v1492_v17 = vrot.slane %v1491_v5, 1  ;;  %v1454_v21 = vadd.f32 %v1453_v6, %v1452_v63  ;;  %v1467_v22 = vadd.f32 %v1466_v8, %v1465_v43  ;;  %v6621_v58 = vld [vmem:[%s9145_s3 + $0xc8] ss:$16 sps:$4 sm:$0xff]   ;;  %v6629_v43 = vld [vmem:[%s9147_s4 + $0x10] sm:$0xff]  }
 0x183   :  { %v1388_v18 = vrot.slane %v1387_v32, 1  ;;  %v1393_v37 = vadd.f32 %v1392_v33, %v1226_v29  ;;  %v1504_v27 = vpack.c.bf16 %v1428_v12, %v1428_v12  ;;  %v1505_v11 = vpack.c.bf16 %v1441_v14, %v1441_v14  ;;  %v6624_v60 = vld [vmem:[%s9145_s3 + $0xe8] ss:$16 sps:$4 sm:$0xff]   ;;  %v6634_v56 = vld [vmem:[%s9149_s5 + $0x4] ss:$8 sps:$4 sm:$0xff]  }
 0x184   :  { %v1480_v54 = vadd.f32 %v1479_v13, %v1478_v3  ;;  %v1493_v20 = vadd.f32 %v1492_v17, %v1491_v5  ;;  %v1506_v30 = vpack.c.bf16 %v1454_v21, %v1454_v21  ;;  %v6978_v63 = vmov 0.0   ;;  %v6628_v0 = vld [vmem:[%s9147_s4 + $0x8] sm:$0xff]   ;;  %v6637_v5 = vld [vmem:[%s9149_s5 + $0x14] ss:$8 sps:$4 sm:$0xff]   ;;  %v6647_v14 = vld [vmem:[%s9149_s5 + $0x50] ss:$8 sps:$4 sm:$0xff]  }
 0x185   :  { %v1389_v42 = vadd.f32 %v1388_v18, %v1387_v32  ;;  %v1394_v7 = vadd.f32 %v1393_v37, %v1227_v34  ;;  %v1507_v32 = vpack.c.bf16 %v1467_v22, %v1467_v22  ;;  %v1591_v25 = vunpack.c.l.b16 %v1504_v27  ;;  %v6632_v3 = vld [vmem:[%s9149_s5] ss:$8 sps:$4 sm:$0xff]   ;;  %v6643_v8 = vld [vmem:[%s9149_s5 + $0x34] ss:$8 sps:$4 sm:$0xff]  }
 0x186   :  { %v1508_v34 = vpack.c.bf16 %v1480_v54, %v1480_v54  ;;  %v1592_v45 = vunpack.c.l.b16 %v1505_v11  ;;  %v1509_v35 = vpack.c.bf16 %v1493_v20, %v1493_v20  ;;  %v1593_v18 = vunpack.c.l.b16 %v1506_v30  ;;  %v6638_v6 = vld [vmem:[%s9149_s5 + $0x20] ss:$8 sps:$4 sm:$0xff]   ;;  %v6649_v13 = vld [vmem:[%s9149_s5 + $0x54] ss:$8 sps:$4 sm:$0xff]  }
 0x187   :  { %v1501_v46 = vpack.c.bf16 %v1389_v42, %v1389_v42  ;;  %v1395_v48 = vadd.f32 %v1394_v7, %v1228_v39  ;;  %v1594_v38 = vunpack.c.l.b16 %v1507_v32  ;;  %v6644_v12 = vld [vmem:[%s9149_s5 + $0x40] ss:$8 sps:$4 sm:$0xff]   ;;  %v6655_v21 = vld [vmem:[%s9149_s5 + $0x74] ss:$8 sps:$4 sm:$0xff]  }
 0x188   :  { %v1595_v59 = vunpack.c.l.b16 %v1508_v34  ;;  %v1596_v41 = vunpack.c.l.b16 %v1509_v35  ;;  %v6650_v17 = vld [vmem:[%s9149_s5 + $0x60] ss:$8 sps:$4 sm:$0xff]   ;;  %v6658_v22 = vld [vmem:[%s9150_s6 + $0x4] ss:$16 sps:$4 sm:$0xff]  }
 0x189   :  { %v1588_v53 = vunpack.c.l.b16 %v1501_v46  ;;  %v1396_v55 = vadd.f32 %v1395_v48, %v1229_v44  ;;  %v6603_v44 = vld [vmem:[%s9145_s3 + $0x8] ss:$16 sps:$4 sm:$0xff]   ;;  %v6611_v48 = vld [vmem:[%s9145_s3 + $0x4c] ss:$16 sps:$4 sm:$0xff]   ;;  %v1876_v32 = vld [vmem:[%s9146_s9 + $0x2] ss:$0 sm:$0xff] }
 0x18a   :  { %v6606_v46 = vld [vmem:[%s9145_s3 + $0x28] ss:$16 sps:$4 sm:$0xff]  }
 0x18b   :  { %v1397_v24 = vrot.slane %v1396_v55, 4  ;;  %v1610_v61 = vsel %vm1609_vm6, %v1588_v53, %v1608_v9  ;;  %v1503_v9 = vpack.c.bf16 %v1415_v2, %v1415_v2  ;;  %v6615_v53 = vld [vmem:[%s9145_s3 + $0x88] ss:$16 sps:$4 sm:$0xff]  }
 0x18c   :  { %v6641_v2 = vld [vmem:[%s9149_s5 + $0x30] ss:$8 sps:$4 sm:$0xff]  }
 0x18d   :  { %v1398_v16 = vadd.f32 %v1397_v24, %v1396_v55  ;;  %v1590_v31 = vunpack.c.l.b16 %v1503_v9  ;;  %v6620_v55 = vld [vmem:[%s9145_s3 + $0xac] ss:$16 sps:$4 sm:$0xff]   ;;  %v6653_v9 = vld [vmem:[%s9149_s5 + $0x70] ss:$8 sps:$4 sm:$0xff]  }
 0x18e   :  { %v6626_v24 = vld [vmem:[%s9145_s3 + $0xec] ss:$16 sps:$4 sm:$0xff]  }
 0x18f   :  { %v1399_v4 = vrot.slane %v1398_v16, 2 }
 0x191   :  { %v1400_v10 = vadd.f32 %v1399_v4, %v1398_v16  ;;  %v6630_v16 = vld [vmem:[%s9147_s4 + $0x18] sm:$0xff]  }
 0x192   :  { %v6635_v4 = vld [vmem:[%s9149_s5 + $0x10] ss:$8 sps:$4 sm:$0xff]  }
 0x193   :  { %v1401_v15 = vrot.slane %v1400_v10, 1 }
 0x195   :  { %v1402_v26 = vadd.f32 %v1401_v15, %v1400_v10  ;;  %v6646_v10 = vld [vmem:[%s9149_s5 + $0x44] ss:$8 sps:$4 sm:$0xff]  }
 0x196   :  { %v6652_v15 = vld [vmem:[%s9149_s5 + $0x64] ss:$8 sps:$4 sm:$0xff]  }
 0x197   :  { %v1502_v29 = vpack.c.bf16 %v1402_v26, %v1402_v26 }
 0x199   :  { %v1589_v33 = vunpack.c.l.b16 %v1502_v29 }
 0x19b   :  { %v1611_v36 = vsel %vm1597_vm0, %v1590_v31, %v1589_v33 }
 0x19c   :  { %v1612_v37 = vsel %vm1599_vm1, %v1591_v25, %v1611_v36 }
 0x19d   :  { %v1613_v39 = vsel %vm1601_vm2, %v1592_v45, %v1612_v37 }
 0x19e   :  { %v1614_v40 = vsel %vm1603_vm3, %v1593_v18, %v1613_v39 }
 0x19f   :  { %v1615_v42 = vsel %vm1605_vm4, %v1594_v38, %v1614_v40 }
 0x1a0   :  { %v1616_v7 = vsel %vm1607_vm5, %v1595_v59, %v1615_v42  ;;  %v6656_v59 = vld [vmem:[%s9150_s6] ss:$16 sps:$4 sm:$0xff]  }
 0x1a1   :  { %v1617_v23 = vsel %vm1609_vm6, %v1596_v41, %v1616_v7  ;;  %v6661_v41 = vld [vmem:[%s9150_s6 + $0x24] ss:$16 sps:$4 sm:$0xff]   ;;  %v6659_v42 = vld [vmem:[%s9150_s6 + $0x20] ss:$16 sps:$4 sm:$0xff]  }
 0x1a2   :  { %v1618_v62 = vpack.c.b16 %v1617_v23, %v1610_v61  ;;  %v6627_v61 = vld [vmem:[%s9147_s4] sm:$0xff]  }
 0x1a3   :  { %v6664_v7 = vld [vmem:[%s9150_s6 + $0x44] ss:$16 sps:$4 sm:$0xff]  }
 0x1a4   :  { %1813 = vmatmul.mubr.bf16.vlgmr.msra.gmra.mrb[60].mxu1 %v1618_v62  ;;  %v6667_v23 = vld [vmem:[%s9150_s6 + $0x64] ss:$16 sps:$4 sm:$0xff]  }
 0x1a5   :  { %1824 = vmatpush1.bf16.msra.mxu1 %v6603_v44  ;;  %1855 = vmatprep.mubr.bf16.mxu1 %v6977_v50  ;;  %v6662_v44 = vld [vmem:[%s9150_s6 + $0x40] ss:$16 sps:$4 sm:$0xff]  }
 0x1a6   :  { %1825 = vmatprep.subr.bf16.mxu1 %v6608_v19  ;;  %v6670_v19 = vld [vmem:[%s9150_s6 + $0x84] ss:$16 sps:$4 sm:$0xff]  }
 0x1a9   :  { %1826 = vmatpush1.bf16.msra.mxu1 %v6606_v46  ;;  %v6668_v46 = vld [vmem:[%s9150_s6 + $0x80] ss:$16 sps:$4 sm:$0xff]  }
 0x1aa   :  { %1827 = vmatprep.subr.bf16.mxu1 %v6611_v48  ;;  %v6673_v48 = vld [vmem:[%s9150_s6 + $0xa4] ss:$16 sps:$4 sm:$0xff]  }
 0x1ad   :  { %1828 = vmatpush1.bf16.msra.mxu1 %v6609_v49  ;;  %v6671_v49 = vld [vmem:[%s9150_s6 + $0xa0] ss:$16 sps:$4 sm:$0xff]  }
 0x1ae   :  { %1829 = vmatprep.subr.bf16.mxu1 %v6614_v47  ;;  %v6676_v47 = vld [vmem:[%s9150_s6 + $0xc4] ss:$16 sps:$4 sm:$0xff]  }
 0x1b1   :  { %1830 = vmatpush1.bf16.msra.mxu1 %v6612_v51  ;;  %v6674_v51 = vld [vmem:[%s9150_s6 + $0xc0] ss:$16 sps:$4 sm:$0xff]  }
 0x1b2   :  { %1831 = vmatprep.subr.bf16.mxu1 %v6617_v52  ;;  %v6679_v52 = vld [vmem:[%s9150_s6 + $0xe4] ss:$16 sps:$4 sm:$0xff]  }
 0x1b5   :  { %1832 = vmatpush1.bf16.msra.mxu1 %v6615_v53  ;;  %v6677_v53 = vld [vmem:[%s9150_s6 + $0xe0] ss:$16 sps:$4 sm:$0xff]  }
 0x1b6   :  { %1833 = vmatprep.subr.bf16.mxu1 %v6620_v55  ;;  %v6682_v55 = vld [vmem:[%s9150_s6 + $0x104] ss:$16 sps:$4 sm:$0xff]  }
 0x1b9   :  { %1834 = vmatpush1.bf16.msra.mxu1 %v6618_v1  ;;  %v6680_v1 = vld [vmem:[%s9150_s6 + $0x100] ss:$16 sps:$4 sm:$0xff]  }
 0x1ba   :  { %1835 = vmatprep.subr.bf16.mxu1 %v6623_v57  ;;  %v6685_v57 = vld [vmem:[%s9150_s6 + $0x124] ss:$16 sps:$4 sm:$0xff]  }
 0x1bd   :  { %1836 = vmatpush1.bf16.msra.mxu1 %v6621_v58  ;;  %v6683_v58 = vld [vmem:[%s9150_s6 + $0x120] ss:$16 sps:$4 sm:$0xff]  }
 0x1be   :  { %1837 = vmatprep.subr.bf16.mxu1 %v6626_v24  ;;  %v6688_v24 = vld [vmem:[%s9150_s6 + $0x144] ss:$16 sps:$4 sm:$0xff]  }
 0x1c1   :  { %1838 = vmatpush1.bf16.msra.mxu1 %v6624_v60  ;;  %v6686_v60 = vld [vmem:[%s9150_s6 + $0x140] ss:$16 sps:$4 sm:$0xff]  }
 0x1c2   :  { %6428 = vmatprep.subr.bf16.mxu1 %v6978_v63 }
 0x1c4   :  { %1856 = vmatmul.mubr.bf16.vlgmr.msra.gmra.mrb[64].mxu1 %v1618_v62  ;;  %v6665_v62 = vld [vmem:[%s9150_s6 + $0x60] ss:$16 sps:$4 sm:$0xff]  }
 0x1c5   :  { %6429 = vmatpush3.bf16.msra.mxu1 %v6627_v61  ;;  %6436 = vmatprep.mubr.msk.bf16.mxu1 %vm6979_vm7, %v6978_v63  ;;  %v6691_v61 = vld [vmem:[%s9150_s6 + $0x164] ss:$16 sps:$4 sm:$0xff]  }
 0x1c6   :  { %6430 = vmatprep.subr.bf16.mxu1 %v6978_v63 }
 0x1c9   :  { %6431 = vmatpush3.bf16.msra.mxu1 %v6628_v0  ;;  %v6694_v0 = vld [vmem:[%s9150_s6 + $0x184] ss:$16 sps:$4 sm:$0xff]  }
 0x1ca   :  { %6432 = vmatprep.subr.bf16.mxu1 %v6978_v63 }
 0x1cd   :  { %6433 = vmatpush3.bf16.msra.mxu1 %v6629_v43  ;;  %v6692_v43 = vld [vmem:[%s9150_s6 + $0x180] ss:$16 sps:$4 sm:$0xff]  }
 0x1ce   :  { %6434 = vmatprep.subr.bf16.mxu1 %v6978_v63  ;;  %v6689_v63 = vld [vmem:[%s9150_s6 + $0x160] ss:$16 sps:$4 sm:$0xff]  }
 0x1d1   :  { %6435 = vmatpush3.bf16.msra.mxu1 %v6630_v16  ;;  %v6697_v16 = vld [vmem:[%s9150_s6 + $0x1a4] ss:$16 sps:$4 sm:$0xff]  }
 0x1d2   :  { %2067 = vmatprep.subr.bf16.mxu1 %v6634_v56  ;;  %v6698_v56 = vld [vmem:[%s9150_s6 + $0x1c0] ss:$16 sps:$4 sm:$0xff]  }
 0x1d4   :  { %6437 = vmatmul.mubr.msk.bf16.vlgmr.msra.gmra.mrb[68].mxu1 %vm1906_vm8, %v6631_v28  ;;  %v6695_v28 = vld [vmem:[%s9150_s6 + $0x1a0] ss:$16 sps:$4 sm:$0xff]  }
 0x1d5   :  { %2099 = vmatprep.mubr.bf16.mxu1 %v6977_v50  ;;  %2068 = vmatpush1.bf16.msra.mxu1 %v6632_v3  ;;  %v6640_v50 = vld [vmem:[%s9149_s5 + $0x24] ss:$8 sps:$4 sm:$0xff]  }
 0x1d6   :  { %2069 = vmatprep.subr.bf16.mxu1 %v6637_v5  ;;  %v6700_v3 = vld [vmem:[%s9150_s6 + $0x1c4] ss:$16 sps:$4 sm:$0xff]   ;;  %v6701_v5 = vld [vmem:[%s9150_s6 + $0x1e0] ss:$16 sps:$4 sm:$0xff]  }
 0x1d9   :  { %2070 = vmatpush1.bf16.msra.mxu1 %v6635_v4  ;;  %v6703_v4 = vld [vmem:[%s9150_s6 + $0x1e4] ss:$16 sps:$4 sm:$0xff]  }
 0x1da   :  { %2071 = vmatprep.subr.bf16.mxu1 %v6640_v50  ;;  %v6706_v50 = vld [vmem:[%s9150_s6 + $0xc] ss:$16 sps:$4 sm:$0xff]  }
 0x1dd   :  { %2072 = vmatpush1.bf16.msra.mxu1 %v6638_v6  ;;  %v2677_v6 = vld [vmem:[%s9151_s7] sm:$0xff] }
 0x1de   :  { %2073 = vmatprep.subr.bf16.mxu1 %v6643_v8  ;;  %v2685_v8 = vld [vmem:[%s9151_s7 + $0x40] sm:$0xff] }
 0x1e1   :  { %2074 = vmatpush1.bf16.msra.mxu1 %v6641_v2  ;;  %v2681_v2 = vld [vmem:[%s9151_s7 + $0x20] sm:$0xff] }
 0x1e2   :  { %2075 = vmatprep.subr.bf16.mxu1 %v6646_v10  ;;  %v5822_v10 = vcombine.low %v2677_v6, %v2681_v2 }
 0x1e5   :  { %2076 = vmatpush1.bf16.msra.mxu1 %v6644_v12  ;;  %v5823_v12 = vcombine.high %v2677_v6, %v2681_v2 }
 0x1e6   :  { %2077 = vmatprep.subr.bf16.mxu1 %v6649_v13  ;;  %v2689_v13 = vld [vmem:[%s9151_s7 + $0x60] sm:$0xff] }
 0x1e7   :  { %4258 = vmatprep.subr.bf16.mxu0 %v5823_v12 }
 0x1e8   :  { %4259 = vmatpush1.bf16.msra.mxu0 %v5822_v10 }
 0x1e9   :  { %2078 = vmatpush1.bf16.msra.mxu1 %v6647_v14  ;;  %v5831_v14 = vcombine.high %v2685_v8, %v2689_v13 }
 0x1ea   :  { %2079 = vmatprep.subr.bf16.mxu1 %v6652_v15  ;;  %v2693_v15 = vld [vmem:[%s9151_s7 + $0x80] sm:$0xff] }
 0x1eb   :  { %4260 = vmatprep.subr.bf16.mxu0 %v5831_v14 }
 0x1ed   :  { %2080 = vmatpush1.bf16.msra.mxu1 %v6650_v17  ;;  %v2697_v17 = vld [vmem:[%s9151_s7 + $0xa0] sm:$0xff] }
 0x1ee   :  { %2081 = vmatprep.subr.bf16.mxu1 %v6655_v21  ;;  %v5830_v21 = vcombine.low %v2685_v8, %v2689_v13 }
 0x1f0   :  { %4261 = vmatpush1.bf16.msra.mxu0 %v5830_v21 }
 0x1f1   :  { %2082 = vmatpush1.bf16.msra.mxu1 %v6653_v9  ;;  %v5839_v9 = vcombine.high %v2693_v15, %v2697_v17 }
 0x1f2   :  { %2531 = vmatprep.subr.bf16.mxu1 %v6658_v22  ;;  %v2701_v22 = vld [vmem:[%s9151_s7 + $0xc0] sm:$0xff] }
 0x1f3   :  { %4262 = vmatprep.subr.bf16.mxu0 %v5839_v9 }
 0x277   :  { %v7616_v26 = vpop.f32.mrb[60].mxu1 }
 0x278   :  { %v7618_v27 = vpop.f32.mrb[61].mxu1 }
 0x279   :  { %v7620_v54 = vpop.f32.mrb[62].mxu1 }
 0x27a   :  { %v7622_v11 = vpop.f32.mrb[63].mxu1 }
 0x297   :  { %v7624_v29 = vpop.f32.mrb[64].mxu1 }
 0x298   :  { %v7626_v20 = vpop.f32.mrb[65].mxu1 }
 0x299   :  { %v7628_v30 = vpop.f32.mrb[66].mxu1 }
 0x29a   :  { %v7630_v31 = vpop.f32.mrb[67].mxu1 }
 0x2a7   :  { %v1944_v33 = vpop.f32.mrb[68].mxu1 }
 0x2a8   :  { %v1945_v25 = vadd.f32 %v1944_v33, %v1876_v32  ;;  %v6438_v34 = vpop.f32.mrb[69].mxu1  ;;  %v5838_v33 = vcombine.low %v2693_v15, %v2697_v17 }
 0x2a9   :  { %v1947_v45 = vpop.f32.mrb[70].mxu1  ;;  %v2709_v34 = vld [vmem:[%s9151_s7 + $0x100] sm:$0xff] }
 0x2aa   :  { %v1953_v35 = vmul.f32 0.01, %v1945_v25  ;;  %v1948_v36 = vadd.f32 %v1947_v45, %v1876_v32  ;;  %v6439_v18 = vpop.f32.mrb[71].mxu1  ;;  %vm1951_vm9 = vcmp.gt.f32.partialorder %v1945_v25, 0.0  ;;  %v2705_v32 = vld [vmem:[%s9151_s7 + $0xe0] sm:$0xff]  ;;  %4263 = vmatpush1.bf16.msra.mxu0 %v5838_v33 }
 0x2ab   :  { %v2713_v45 = vld [vmem:[%s9151_s7 + $0x120] sm:$0xff] }
 0x2ac   :  { %vm1952_vm10 = vcmp.gt.f32.partialorder %v1948_v36, 0.0  ;;  %v1954_v37 = vmul.f32 0.01, %v1948_v36  ;;  %v1955_v38 = vsel %vm1951_vm9, %v1945_v25, %v1953_v35  ;;  %v5847_v25 = vcombine.high %v2701_v22, %v2705_v32  ;;  %v2717_v18 = vld [vmem:[%s9151_s7 + $0x140] sm:$0xff] }
 0x2ad   :  { %v5846_v35 = vcombine.low %v2701_v22, %v2705_v32 }
 0x2ae   :  { %v1956_v39 = vsel %vm1952_vm10, %v1948_v36, %v1954_v37  ;;  %4264 = vmatprep.subr.bf16.mxu0 %v5847_v25  ;;  %v5855_v36 = vcombine.high %v2709_v34, %v2713_v45  ;;  %v2721_v37 = vld [vmem:[%s9151_s7 + $0x160] sm:$0xff] }
 0x2af   :  { %v1957_v40 = vpack.c.bf16 %v1956_v39, %v1955_v38  ;;  %4265 = vmatpush1.bf16.msra.mxu0 %v5846_v35  ;;  %v5854_v38 = vcombine.low %v2709_v34, %v2713_v45  ;;  %v5863_v39 = vcombine.high %v2717_v18, %v2721_v37  ;;  %v6704_v35 = vld [vmem:[%s9150_s6 + $0x8] ss:$16 sps:$4 sm:$0xff]  }
 0x2b0   :  { %4266 = vmatprep.subr.bf16.mxu0 %v5855_v36  ;;  %v6709_v36 = vld [vmem:[%s9150_s6 + $0x2c] ss:$16 sps:$4 sm:$0xff]  }
 0x2b1   :  { %2100 = vmatmul.mubr.bf16.vlgmr.msra.gmra.mrb[72].mxu1 %v1957_v40  ;;  %v2729_v40 = vld [vmem:[%s9151_s7 + $0x1a0] sm:$0xff] }
 0x2b2   :  { %2532 = vmatpush1.bf16.msra.mxu1 %v6656_v59  ;;  %v2725_v59 = vld [vmem:[%s9151_s7 + $0x180] sm:$0xff] }
 0x2b3   :  { %2533 = vmatprep.subr.bf16.mxu1 %v6661_v41  ;;  %4267 = vmatpush1.bf16.msra.mxu0 %v5854_v38  ;;  %v5862_v41 = vcombine.low %v2717_v18, %v2721_v37  ;;  %v6707_v18 = vld [vmem:[%s9150_s6 + $0x28] ss:$16 sps:$4 sm:$0xff]   ;;  %v6712_v37 = vld [vmem:[%s9150_s6 + $0x4c] ss:$16 sps:$4 sm:$0xff]  }
 0x2b4   :  { %4268 = vmatprep.subr.bf16.mxu0 %v5863_v39  ;;  %v6710_v38 = vld [vmem:[%s9150_s6 + $0x48] ss:$16 sps:$4 sm:$0xff]   ;;  %v6715_v39 = vld [vmem:[%s9150_s6 + $0x6c] ss:$16 sps:$4 sm:$0xff]  }
 0x2b6   :  { %2534 = vmatpush1.bf16.msra.mxu1 %v6659_v42  ;;  %v5871_v42 = vcombine.high %v2725_v59, %v2729_v40 }
 0x2b7   :  { %2535 = vmatprep.subr.bf16.mxu1 %v6664_v7  ;;  %v2733_v7 = vld [vmem:[%s9151_s7 + $0x1c0] sm:$0xff]  ;;  %4269 = vmatpush1.bf16.msra.mxu0 %v5862_v41  ;;  %v6716_v41 = vld [vmem:[%s9150_s6 + $0x88] ss:$16 sps:$4 sm:$0xff]  }
 0x2b8   :  { %4270 = vmatprep.subr.bf16.mxu0 %v5871_v42  ;;  %v6721_v42 = vld [vmem:[%s9150_s6 + $0xac] ss:$16 sps:$4 sm:$0xff]  }
 0x2ba   :  { %2536 = vmatpush1.bf16.msra.mxu1 %v6662_v44  ;;  %v2737_v44 = vld [vmem:[%s9151_s7 + $0x1e0] sm:$0xff] }
 0x2bb   :  { %2537 = vmatprep.subr.bf16.mxu1 %v6667_v23  ;;  %v5870_v23 = vcombine.low %v2725_v59, %v2729_v40  ;;  %v6713_v59 = vld [vmem:[%s9150_s6 + $0x68] ss:$16 sps:$4 sm:$0xff]   ;;  %v6718_v40 = vld [vmem:[%s9150_s6 + $0x8c] ss:$16 sps:$4 sm:$0xff]  }
 0x2bd   :  { %4271 = vmatpush1.bf16.msra.mxu0 %v5870_v23  ;;  %v6722_v23 = vld [vmem:[%s9150_s6 + $0xc8] ss:$16 sps:$4 sm:$0xff]  }
 0x2be   :  { %2538 = vmatpush1.bf16.msra.mxu1 %v6665_v62  ;;  %v5879_v62 = vcombine.high %v2733_v7, %v2737_v44 }
 0x2bf   :  { %2539 = vmatprep.subr.bf16.mxu1 %v6670_v19  ;;  %v2741_v19 = vld [vmem:[%s9151_s7 + $0x200] sm:$0xff] }
 0x2c0   :  { %4272 = vmatprep.subr.bf16.mxu0 %v5879_v62  ;;  %v6727_v62 = vld [vmem:[%s9150_s6 + $0xec] ss:$16 sps:$4 sm:$0xff]  }
 0x2c2   :  { %2540 = vmatpush1.bf16.msra.mxu1 %v6668_v46  ;;  %v2745_v46 = vld [vmem:[%s9151_s7 + $0x220] sm:$0xff] }
 0x2c3   :  { %2541 = vmatprep.subr.bf16.mxu1 %v6673_v48  ;;  %v5878_v48 = vcombine.low %v2733_v7, %v2737_v44  ;;  %v6719_v7 = vld [vmem:[%s9150_s6 + $0xa8] ss:$16 sps:$4 sm:$0xff]   ;;  %v6724_v44 = vld [vmem:[%s9150_s6 + $0xcc] ss:$16 sps:$4 sm:$0xff]  }
 0x2c5   :  { %4273 = vmatpush1.bf16.msra.mxu0 %v5878_v48  ;;  %v6728_v48 = vld [vmem:[%s9150_s6 + $0x108] ss:$16 sps:$4 sm:$0xff]  }
 0x2c6   :  { %2542 = vmatpush1.bf16.msra.mxu1 %v6671_v49  ;;  %v5887_v49 = vcombine.high %v2741_v19, %v2745_v46 }
 0x2c7   :  { %2543 = vmatprep.subr.bf16.mxu1 %v6676_v47  ;;  %v2749_v47 = vld [vmem:[%s9151_s7 + $0x240] sm:$0xff] }
 0x2c8   :  { %4274 = vmatprep.subr.bf16.mxu0 %v5887_v49  ;;  %v6733_v49 = vld [vmem:[%s9150_s6 + $0x12c] ss:$16 sps:$4 sm:$0xff]  }
 0x2ca   :  { %2544 = vmatpush1.bf16.msra.mxu1 %v6674_v51  ;;  %v2753_v51 = vld [vmem:[%s9151_s7 + $0x260] sm:$0xff] }
 0x2cb   :  { %2545 = vmatprep.subr.bf16.mxu1 %v6679_v52  ;;  %v5886_v52 = vcombine.low %v2741_v19, %v2745_v46  ;;  %v6725_v19 = vld [vmem:[%s9150_s6 + $0xe8] ss:$16 sps:$4 sm:$0xff]   ;;  %v6730_v46 = vld [vmem:[%s9150_s6 + $0x10c] ss:$16 sps:$4 sm:$0xff]  }
 0x2cd   :  { %4275 = vmatpush1.bf16.msra.mxu0 %v5886_v52  ;;  %v6734_v52 = vld [vmem:[%s9150_s6 + $0x148] ss:$16 sps:$4 sm:$0xff]  }
 0x2ce   :  { %2546 = vmatpush1.bf16.msra.mxu1 %v6677_v53  ;;  %v5895_v53 = vcombine.high %v2749_v47, %v2753_v51 }
 0x2cf   :  { %2547 = vmatprep.subr.bf16.mxu1 %v6682_v55  ;;  %v2757_v55 = vld [vmem:[%s9151_s7 + $0x280] sm:$0xff] }
 0x2d0   :  { %4276 = vmatprep.subr.bf16.mxu0 %v5895_v53  ;;  %v6739_v53 = vld [vmem:[%s9150_s6 + $0x16c] ss:$16 sps:$4 sm:$0xff]  }
 0x2d2   :  { %2548 = vmatpush1.bf16.msra.mxu1 %v6680_v1  ;;  %v2761_v1 = vld [vmem:[%s9151_s7 + $0x2a0] sm:$0xff] }
 0x2d3   :  { %2549 = vmatprep.subr.bf16.mxu1 %v6685_v57  ;;  %v5894_v57 = vcombine.low %v2749_v47, %v2753_v51  ;;  %v6731_v47 = vld [vmem:[%s9150_s6 + $0x128] ss:$16 sps:$4 sm:$0xff]   ;;  %v6736_v51 = vld [vmem:[%s9150_s6 + $0x14c] ss:$16 sps:$4 sm:$0xff]  }
 0x2d5   :  { %4277 = vmatpush1.bf16.msra.mxu0 %v5894_v57  ;;  %v6740_v57 = vld [vmem:[%s9150_s6 + $0x188] ss:$16 sps:$4 sm:$0xff]  }
 0x2d6   :  { %2550 = vmatpush1.bf16.msra.mxu1 %v6683_v58  ;;  %v5903_v58 = vcombine.high %v2757_v55, %v2761_v1 }
 0x2d7   :  { %2551 = vmatprep.subr.bf16.mxu1 %v6688_v24  ;;  %v1545_v24 = vlaneseq }
 0x2d8   :  { %4278 = vmatprep.subr.bf16.mxu0 %v5903_v58  ;;  %v6745_v58 = vld [vmem:[%s9150_s6 + $0x1ac] ss:$16 sps:$4 sm:$0xff]  }
 0x2da   :  { %2552 = vmatpush1.bf16.msra.mxu1 %v6686_v60  ;;  %v2765_v60 = vld [vmem:[%s9151_s7 + $0x2c0] sm:$0xff] }
 0x2db   :  { %2553 = vmatprep.subr.bf16.mxu1 %v6691_v61  ;;  %v2769_v61 = vld [vmem:[%s9151_s7 + $0x2e0] sm:$0xff] }
 0x2de   :  { %2554 = vmatpush1.bf16.msra.mxu1 %v6689_v63  ;;  %v5902_v63 = vcombine.low %v2757_v55, %v2761_v1  ;;  %v6737_v55 = vld [vmem:[%s9150_s6 + $0x168] ss:$16 sps:$4 sm:$0xff]   ;;  %v6742_v1 = vld [vmem:[%s9150_s6 + $0x18c] ss:$16 sps:$4 sm:$0xff]  }
 0x2df   :  { %2555 = vmatprep.subr.bf16.mxu1 %v6694_v0  ;;  %v5911_v0 = vcombine.high %v2765_v60, %v2769_v61 }
 0x2e0   :  { %4279 = vmatpush1.bf16.msra.mxu0 %v5902_v63  ;;  %v6751_v63 = vld [vmem:[%s9150_s6 + $0x1ec] ss:$16 sps:$4 sm:$0xff]  }
 0x2e1   :  { %4280 = vmatprep.subr.bf16.mxu0 %v5911_v0  ;;  %v2678_v0 = vld [vmem:[%s9151_s7 + $0x8] sm:$0xff] }
 0x2e2   :  { %2556 = vmatpush1.bf16.msra.mxu1 %v6692_v43  ;;  %v7803_v43 = vshrl.u32 %v1545_v24, 7  ;;  %v6743_v24 = vld [vmem:[%s9150_s6 + $0x1a8] ss:$16 sps:$4 sm:$0xff]  }
 0x2e3   :  { %2557 = vmatprep.subr.bf16.mxu1 %v6697_v16  ;;  %v5910_v16 = vcombine.low %v2765_v60, %v2769_v61  ;;  %v6748_v60 = vld [vmem:[%s9150_s6 + $0x1cc] ss:$16 sps:$4 sm:$0xff]   ;;  %v6746_v61 = vld [vmem:[%s9150_s6 + $0x1c8] ss:$16 sps:$4 sm:$0xff]  }
 0x2e5   :  { %4281 = vmatpush1.bf16.msra.mxu0 %v5910_v16  ;;  %v2682_v16 = vld [vmem:[%s9151_s7 + $0x28] sm:$0xff] }
 0x2e6   :  { %2558 = vmatpush1.bf16.msra.mxu1 %v6695_v28  ;;  %v5730_v28 = vld [vmem:[%s9146_s9 + $0x3] ss:$8 sm:$0x3] }
 0x2e7   :  { %2559 = vmatprep.subr.bf16.mxu1 %v6700_v3  ;;  %v7809_v3 = vsub.s32 0, %v7803_v43 }
 0x2ea   :  { %2560 = vmatpush1.bf16.msra.mxu1 %v6698_v56  ;;  %v7812_v56 = vsub.s32 1, %v7803_v43 }
 0x2eb   :  { %2561 = vmatprep.subr.bf16.mxu1 %v6703_v4  ;;  %v1980_v4 = vrot.slane %v5730_v28, %v7809_v3 }
 0x2ee   :  { %2562 = vmatpush1.bf16.msra.mxu1 %v6701_v5  ;;  %v1984_v5 = vrot.slane %v5730_v28, %v7812_v56  ;;  %v6749_v28 = vld [vmem:[%s9150_s6 + $0x1e8] ss:$16 sps:$4 sm:$0xff]  }
 0x2ef   :  { %2574 = vmatprep.subr.bf16.mxu1 %v6706_v50 }
 0x384   :  { %v2101_v50 = vpop.f32.mrb[72].mxu1 }
 0x385   :  { %v2102_v6 = vadd.f32 %v2101_v50, %v1980_v4  ;;  %v2103_v2 = vpop.f32.mrb[73].mxu1  ;;  %v2690_v50 = vld [vmem:[%s9151_s7 + $0x68] sm:$0xff] }
 0x386   :  { %v2104_v8 = vadd.f32 %v2103_v2, %v1984_v5  ;;  %v2105_v10 = vpop.f32.mrb[74].mxu1 }
 0x387   :  { %v2114_v12 = vmul.f32 0.01, %v2102_v6  ;;  %v2106_v13 = vadd.f32 %v2105_v10, %v1980_v4  ;;  %v2107_v14 = vpop.f32.mrb[75].mxu1  ;;  %vm2110_vm11 = vcmp.gt.f32.partialorder %v2102_v6, 0.0  ;;  %v5825_v4 = vcombine.high %v2678_v0, %v2682_v16  ;;  %v2698_v10 = vld [vmem:[%s9151_s7 + $0xa8] sm:$0xff] }
 0x388   :  { %v2115_v15 = vmul.f32 0.01, %v2104_v8  ;;  %v2108_v17 = vadd.f32 %v2107_v14, %v1984_v5  ;;  %vm2111_vm12 = vcmp.gt.f32.partialorder %v2104_v8, 0.0  ;;  %v2686_v5 = vld [vmem:[%s9151_s7 + $0x48] sm:$0xff] }
 0x389   :  { %vm2112_vm13 = vcmp.gt.f32.partialorder %v2106_v13, 0.0  ;;  %v2116_v21 = vmul.f32 0.01, %v2106_v13  ;;  %v2118_v22 = vsel %vm2110_vm11, %v2102_v6, %v2114_v12  ;;  %v5824_v6 = vcombine.low %v2678_v0, %v2682_v16  ;;  %v2702_v14 = vld [vmem:[%s9151_s7 + $0xc8] sm:$0xff]  ;;  %v2781_v16 = vld [vmem:[%s9151_s7 + $0x340] sm:$0xff] }
 0x38a   :  { %vm2113_vm14 = vcmp.gt.f32.partialorder %v2108_v17, 0.0  ;;  %v2117_v9 = vmul.f32 0.01, %v2108_v17  ;;  %v2119_v25 = vsel %vm2111_vm12, %v2104_v8, %v2115_v15  ;;  %v5833_v2 = vcombine.high %v2686_v5, %v2690_v50  ;;  %v2694_v8 = vld [vmem:[%s9151_s7 + $0x88] sm:$0xff] }
 0x38b   :  { %v2120_v32 = vsel %vm2112_vm13, %v2106_v13, %v2116_v21  ;;  %v5832_v12 = vcombine.low %v2686_v5, %v2690_v50  ;;  %v5841_v13 = vcombine.high %v2694_v8, %v2698_v10  ;;  %v2706_v15 = vld [vmem:[%s9151_s7 + $0xe8] sm:$0xff] }
 0x38c   :  { %v7816_v33 = vpack.c.bf16 %v2120_v32, %v2118_v22  ;;  %v2121_v34 = vsel %vm2113_vm14, %v2108_v17, %v2117_v9  ;;  %v5840_v17 = vcombine.low %v2694_v8, %v2698_v10  ;;  %v5849_v21 = vcombine.high %v2702_v14, %v2706_v15  ;;  %v2710_v9 = vld [vmem:[%s9151_s7 + $0x108] sm:$0xff] }
 0x38d   :  { %v2123_v45 = vpack.c.bf16 %v2121_v34, %v2119_v25  ;;  %v2714_v22 = vld [vmem:[%s9151_s7 + $0x128] sm:$0xff]  ;;  %v5848_v32 = vcombine.low %v2702_v14, %v2706_v15  ;;  %v2797_v14 = vld [vmem:[%s9151_s7 + $0x3c0] sm:$0xff] }
 0x38e   :  { %v2718_v25 = vld [vmem:[%s9151_s7 + $0x148] sm:$0xff]  ;;  %v2801_v15 = vld [vmem:[%s9151_s7 + $0x3e0] sm:$0xff] }
 0x38f   :  { %2563 = vmatprep.mubr.bf16.mxu1 %v2123_v45  ;;  %v2722_v34 = vld [vmem:[%s9151_s7 + $0x168] sm:$0xff] }
 0x390   :  { %2564 = vmatmul.mubr.bf16.vlgmr.msra.gmra.mrb[76].mxu1 %v7816_v33  ;;  %v2778_v0 = vld [vmem:[%s9151_s7 + $0x328] sm:$0xff] }
 0x391   :  { %2575 = vmatpush1.bf16.msra.mxu1 %v6704_v35  ;;  %2606 = vmatprep.mubr.bf16.mxu1 %v2123_v45  ;;  %v5856_v45 = vcombine.low %v2710_v9, %v2714_v22  ;;  %v5865_v35 = vcombine.high %v2718_v25, %v2722_v34 }
 0x392   :  { %2576 = vmatprep.subr.bf16.mxu1 %v6709_v36  ;;  %v2726_v36 = vld [vmem:[%s9151_s7 + $0x188] sm:$0xff] }
 0x395   :  { %2577 = vmatpush1.bf16.msra.mxu1 %v6707_v18  ;;  %v2730_v18 = vld [vmem:[%s9151_s7 + $0x1a8] sm:$0xff] }
 0x396   :  { %2578 = vmatprep.subr.bf16.mxu1 %v6712_v37  ;;  %v5864_v37 = vcombine.low %v2718_v25, %v2722_v34  ;;  %v5942_v34 = vcombine.low %v2797_v14, %v2801_v15 }
 0x399   :  { %2579 = vmatpush1.bf16.msra.mxu1 %v6710_v38  ;;  %v5873_v38 = vcombine.high %v2726_v36, %v2730_v18 }
 0x39a   :  { %2580 = vmatprep.subr.bf16.mxu1 %v6715_v39  ;;  %v2734_v39 = vld [vmem:[%s9151_s7 + $0x1c8] sm:$0xff] }
 0x39d   :  { %2581 = vmatpush1.bf16.msra.mxu1 %v6713_v59  ;;  %v2738_v59 = vld [vmem:[%s9151_s7 + $0x1e8] sm:$0xff] }
 0x39e   :  { %2582 = vmatprep.subr.bf16.mxu1 %v6718_v40  ;;  %v5872_v40 = vcombine.low %v2726_v36, %v2730_v18  ;;  %v2802_v36 = vld [vmem:[%s9151_s7 + $0x3e8] sm:$0xff] }
 0x3a1   :  { %2583 = vmatpush1.bf16.msra.mxu1 %v6716_v41  ;;  %v5881_v41 = vcombine.high %v2734_v39, %v2738_v59 }
 0x3a2   :  { %2584 = vmatprep.subr.bf16.mxu1 %v6721_v42  ;;  %v2742_v42 = vld [vmem:[%s9151_s7 + $0x208] sm:$0xff] }
 0x3a5   :  { %2585 = vmatpush1.bf16.msra.mxu1 %v6719_v7  ;;  %v2746_v7 = vld [vmem:[%s9151_s7 + $0x228] sm:$0xff] }
 0x3a6   :  { %2586 = vmatprep.subr.bf16.mxu1 %v6724_v44  ;;  %v5880_v44 = vcombine.low %v2734_v39, %v2738_v59  ;;  %v8046_v39 = vld [vmem:[%s9151_s7 + $0x408] sm:$0xff] }
 0x3a9   :  { %2587 = vmatpush1.bf16.msra.mxu1 %v6722_v23  ;;  %v5889_v23 = vcombine.high %v2742_v42, %v2746_v7 }
 0x3aa   :  { %2588 = vmatprep.subr.bf16.mxu1 %v6727_v62  ;;  %v2750_v62 = vld [vmem:[%s9151_s7 + $0x248] sm:$0xff] }
 0x3ad   :  { %2589 = vmatpush1.bf16.msra.mxu1 %v6725_v19  ;;  %v2754_v19 = vld [vmem:[%s9151_s7 + $0x268] sm:$0xff] }
 0x3ae   :  { %2590 = vmatprep.subr.bf16.mxu1 %v6730_v46  ;;  %v5888_v46 = vcombine.low %v2742_v42, %v2746_v7 }
 0x3b1   :  { %2591 = vmatpush1.bf16.msra.mxu1 %v6728_v48  ;;  %v5897_v48 = vcombine.high %v2750_v62, %v2754_v19 }
 0x3b2   :  { %2592 = vmatprep.subr.bf16.mxu1 %v6733_v49  ;;  %v2758_v49 = vld [vmem:[%s9151_s7 + $0x288] sm:$0xff] }
 0x3b5   :  { %2593 = vmatpush1.bf16.msra.mxu1 %v6731_v47  ;;  %v2762_v47 = vld [vmem:[%s9151_s7 + $0x2a8] sm:$0xff] }
 0x3b6   :  { %2594 = vmatprep.subr.bf16.mxu1 %v6736_v51  ;;  %v5896_v51 = vcombine.low %v2750_v62, %v2754_v19  ;;  %v8064_v62 = vld [vmem:[%s9146_s9 + $0x4] ss:$8 sm:$0xf] }
 0x3b7   :  { %v2194_v19 = vrot.slane %v8064_v62, %v7809_v3 }
 0x3b9   :  { %2595 = vmatpush1.bf16.msra.mxu1 %v6734_v52  ;;  %v5905_v52 = vcombine.high %v2758_v49, %v2762_v47 }
 0x3ba   :  { %2596 = vmatprep.subr.bf16.mxu1 %v6739_v53  ;;  %v2766_v53 = vld [vmem:[%s9151_s7 + $0x2c8] sm:$0xff] }
 0x3bd   :  { %2597 = vmatpush1.bf16.msra.mxu1 %v6737_v55  ;;  %v2770_v55 = vld [vmem:[%s9151_s7 + $0x2e8] sm:$0xff] }
 0x3be   :  { %2598 = vmatprep.subr.bf16.mxu1 %v6742_v1  ;;  %v2773_v1 = vld [vmem:[%s9151_s7 + $0x300] sm:$0xff] }
 0x3c1   :  { %2599 = vmatpush1.bf16.msra.mxu1 %v6740_v57  ;;  %v2777_v57 = vld [vmem:[%s9151_s7 + $0x320] sm:$0xff] }
 0x3c2   :  { %2600 = vmatprep.subr.bf16.mxu1 %v6745_v58  ;;  %v5904_v58 = vcombine.low %v2758_v49, %v2762_v47 }
 0x3c5   :  { %2601 = vmatpush1.bf16.msra.mxu1 %v6743_v24  ;;  %v5919_v24 = vcombine.high %v2773_v1, %v2777_v57 }
 0x3c6   :  { %2602 = vmatprep.subr.bf16.mxu1 %v6748_v60  ;;  %v5913_v60 = vcombine.high %v2766_v53, %v2770_v55 }
 0x3c7   :  { %4282 = vmatprep.subr.bf16.mxu0 %v5919_v24 }
 0x3c9   :  { %2603 = vmatpush1.bf16.msra.mxu1 %v6746_v61  ;;  %v5918_v61 = vcombine.low %v2773_v1, %v2777_v57 }
 0x3ca   :  { %2604 = vmatprep.subr.bf16.mxu1 %v6751_v63  ;;  %v2774_v63 = vld [vmem:[%s9151_s7 + $0x308] sm:$0xff] }
 0x3cb   :  { %4283 = vmatpush1.bf16.msra.mxu0 %v5918_v61  ;;  %v5921_v10 = vcombine.high %v2774_v63, %v2778_v0 }
 0x3cd   :  { %2605 = vmatpush1.bf16.msra.mxu1 %v6749_v28  ;;  %v2785_v28 = vld [vmem:[%s9151_s7 + $0x360] sm:$0xff] }
 0x3ce   :  { %4344 = vmatprep.subr.bf16.mxu1 %v5825_v4  ;;  %v2789_v4 = vld [vmem:[%s9151_s7 + $0x380] sm:$0xff]  ;;  %v5926_v5 = vcombine.low %v2781_v16, %v2785_v28  ;;  %v5927_v50 = vcombine.high %v2781_v16, %v2785_v28 }
 0x3d0   :  { %2607 = vmatmul.mubr.bf16.vlgmr.msra.gmra.mrb[80].mxu1 %v7816_v33  ;;  %v5857_v33 = vcombine.high %v2710_v9, %v2714_v22  ;;  %4284 = vmatprep.subr.bf16.mxu0 %v5927_v50  ;;  %v5943_v22 = vcombine.high %v2797_v14, %v2801_v15 }
 0x3d1   :  { %4345 = vmatpush1.bf16.msra.mxu1 %v5824_v6  ;;  %v5912_v6 = vcombine.low %v2766_v53, %v2770_v55  ;;  %4285 = vmatpush1.bf16.msra.mxu0 %v5926_v5 }
 0x3d2   :  { %4346 = vmatprep.subr.bf16.mxu1 %v5833_v2  ;;  %v2793_v2 = vld [vmem:[%s9151_s7 + $0x3a0] sm:$0xff] }
 0x3d3   :  { %v5935_v8 = vcombine.high %v2789_v4, %v2793_v2 }
 0x3d5   :  { %4347 = vmatpush1.bf16.msra.mxu1 %v5832_v12  ;;  %v2782_v12 = vld [vmem:[%s9151_s7 + $0x348] sm:$0xff]  ;;  %4286 = vmatprep.subr.bf16.mxu0 %v5935_v8 }
 0x3d6   :  { %4348 = vmatprep.subr.bf16.mxu1 %v5841_v13  ;;  %v2786_v13 = vld [vmem:[%s9151_s7 + $0x368] sm:$0xff] }
 0x3d7   :  { %v5929_v9 = vcombine.high %v2782_v12, %v2786_v13  ;;  %v5928_v25 = vcombine.low %v2782_v12, %v2786_v13 }
 0x3d9   :  { %4349 = vmatpush1.bf16.msra.mxu1 %v5840_v17  ;;  %v5934_v17 = vcombine.low %v2789_v4, %v2793_v2 }
 0x3da   :  { %4350 = vmatprep.subr.bf16.mxu1 %v5849_v21  ;;  %v5920_v21 = vcombine.low %v2774_v63, %v2778_v0 }
 0x3db   :  { %4287 = vmatpush1.bf16.msra.mxu0 %v5934_v17 }
 0x3dc   :  { %4288 = vmatprep.subr.bf16.mxu0 %v5943_v22 }
 0x3dd   :  { %4351 = vmatpush1.bf16.msra.mxu1 %v5848_v32  ;;  %v2790_v32 = vld [vmem:[%s9151_s7 + $0x388] sm:$0xff] }
 0x3de   :  { %4352 = vmatprep.subr.bf16.mxu1 %v5857_v33  ;;  %v2794_v33 = vld [vmem:[%s9151_s7 + $0x3a8] sm:$0xff] }
 0x3df   :  { %v5936_v18 = vcombine.low %v2790_v32, %v2794_v33  ;;  %4289 = vmatpush1.bf16.msra.mxu0 %v5942_v34 }
 0x3e1   :  { %4353 = vmatpush1.bf16.msra.mxu1 %v5856_v45  ;;  %v5937_v45 = vcombine.high %v2790_v32, %v2794_v33 }
 0x3e2   :  { %4354 = vmatprep.subr.bf16.mxu1 %v5865_v35  ;;  %v2798_v35 = vld [vmem:[%s9151_s7 + $0x3c8] sm:$0xff] }
 0x3e3   :  { %v5945_v59 = vcombine.high %v2798_v35, %v2802_v36 }
 0x3e5   :  { %4355 = vmatpush1.bf16.msra.mxu1 %v5864_v37  ;;  %v8036_v37 = vld [vmem:[%s9151_s7 + $0x400] sm:$0xff] }
 0x3e6   :  { %4356 = vmatprep.subr.bf16.mxu1 %v5873_v38  ;;  %v8041_v38 = vld [vmem:[%s9151_s7 + $0x420] sm:$0xff] }
 0x3e7   :  { %v5950_v42 = vcombine.low %v8036_v37, %v8041_v38 }
 0x3e9   :  { %4357 = vmatpush1.bf16.msra.mxu1 %v5872_v40  ;;  %v5951_v40 = vcombine.high %v8036_v37, %v8041_v38  ;;  %v2830_v37 = vld [vmem:[%s9151_s7 + $0x4c8] sm:$0xff] }
 0x3ea   :  { %4358 = vmatprep.subr.bf16.mxu1 %v5881_v41  ;;  %v8053_v41 = vld [vmem:[%s9151_s7 + $0x428] sm:$0xff] }
 0x3eb   :  { %v5952_v7 = vcombine.low %v8046_v39, %v8053_v41  ;;  %4301 = vmatprep.subr.bf16.mxu0 %v5951_v40  ;;  %v2822_v40 = vld [vmem:[%s9151_s7 + $0x488] sm:$0xff] }
 0x3ec   :  { %v2834_v38 = vld [vmem:[%s9151_s7 + $0x4e8] sm:$0xff] }
 0x3ed   :  { %4359 = vmatpush1.bf16.msra.mxu1 %v5880_v44  ;;  %v5944_v44 = vcombine.low %v2798_v35, %v2802_v36 }
 0x3ee   :  { %4360 = vmatprep.subr.bf16.mxu1 %v5889_v23  ;;  %v5953_v23 = vcombine.high %v8046_v39, %v8053_v41 }
 0x3f1   :  { %4361 = vmatpush1.bf16.msra.mxu1 %v5888_v46  ;;  %v2198_v46 = vrot.slane %v8064_v62, %v7812_v56 }
 0x3f2   :  { %4362 = vmatprep.subr.bf16.mxu1 %v5897_v48 }
 0x3f5   :  { %4363 = vmatpush1.bf16.msra.mxu1 %v5896_v51 }
 0x3f6   :  { %4364 = vmatprep.subr.bf16.mxu1 %v5905_v52 }
 0x3f9   :  { %4365 = vmatpush1.bf16.msra.mxu1 %v5904_v58 }
 0x3fa   :  { %4366 = vmatprep.subr.bf16.mxu1 %v5913_v60 }
 0x3fd   :  { %4367 = vmatpush1.bf16.msra.mxu1 %v5912_v6  ;;  %v8073_v6 = vld [vmem:[%s9146_s9 + $0x1] ss:$8 sm:$0xf] }
 0x3fe   :  { %4368 = vmatprep.subr.bf16.mxu1 %v5921_v10  ;;  %v1548_v2 = vrot.slane %v8073_v6, %v7809_v3  ;;  %v1552_v8 = vrot.slane %v8073_v6, %v7812_v56 }
 0x400   :  { %v1815_v10 = vadd.f32 %v7616_v26, %v1548_v2  ;;  %v1817_v13 = vadd.f32 %v7618_v27, %v1552_v8  ;;  %v1819_v15 = vadd.f32 %v7620_v54, %v1548_v2  ;;  %v2817_v26 = vld [vmem:[%s9151_s7 + $0x460] sm:$0xff]  ;;  %v2814_v27 = vld [vmem:[%s9151_s7 + $0x448] sm:$0xff] }
 0x401   :  { %4369 = vmatpush1.bf16.msra.mxu1 %v5920_v21  ;;  %v2818_v54 = vld [vmem:[%s9151_s7 + $0x468] sm:$0xff]  ;;  %v2857_v2 = vld [vmem:[%s9151_s7 + $0x5a0] sm:$0xff] }
 0x402   :  { %4370 = vmatprep.subr.bf16.mxu1 %v5929_v9  ;;  %v1821_v9 = vadd.f32 %v7622_v11, %v1552_v8  ;;  %v5961_v36 = vcombine.high %v2814_v27, %v2818_v54  ;;  %v2854_v8 = vld [vmem:[%s9151_s7 + $0x588] sm:$0xff] }
 0x405   :  { %4371 = vmatpush1.bf16.msra.mxu1 %v5928_v25  ;;  %v2813_v25 = vld [vmem:[%s9151_s7 + $0x440] sm:$0xff] }
 0x406   :  { %4372 = vmatprep.subr.bf16.mxu1 %v5937_v45  ;;  %v5959_v35 = vcombine.high %v2813_v25, %v2817_v26 }
 0x409   :  { %4373 = vmatpush1.bf16.msra.mxu1 %v5936_v18  ;;  %v2821_v18 = vld [vmem:[%s9151_s7 + $0x480] sm:$0xff] }
 0x40a   :  { %4374 = vmatprep.subr.bf16.mxu1 %v5945_v59  ;;  %v2825_v59 = vld [vmem:[%s9151_s7 + $0x4a0] sm:$0xff] }
 0x40b   :  { %v5966_v39 = vcombine.low %v2821_v18, %v2825_v59 }
 0x40d   :  { %4375 = vmatpush1.bf16.msra.mxu1 %v5944_v44  ;;  %v2826_v44 = vld [vmem:[%s9151_s7 + $0x4a8] sm:$0xff] }
 0x40e   :  { %4387 = vmatprep.subr.bf16.mxu1 %v5953_v23  ;;  %v5958_v23 = vcombine.low %v2813_v25, %v2817_v26  ;;  %v5968_v41 = vcombine.low %v2822_v40, %v2826_v44  ;;  %v8182_v25 = vsub.s32 2, %v7803_v43 }
 0x463   :  { %v2565_v48 = vpop.f32.mrb[76].mxu1 }
 0x464   :  { %v2566_v49 = vadd.f32 %v2565_v48, %v2194_v19  ;;  %v2567_v47 = vpop.f32.mrb[77].mxu1  ;;  %v5969_v48 = vcombine.high %v2822_v40, %v2826_v44 }
 0x465   :  { %v2568_v51 = vadd.f32 %v2567_v47, %v2198_v46  ;;  %v2569_v52 = vpop.f32.mrb[78].mxu1  ;;  %v2833_v47 = vld [vmem:[%s9151_s7 + $0x4e0] sm:$0xff] }
 0x466   :  { %v5812_v53 = vmul.f32 -1.442695, %v2566_v49  ;;  %v2570_v55 = vadd.f32 %v2569_v52, %v2194_v19  ;;  %v2571_v1 = vpop.f32.mrb[79].mxu1  ;;  %v5960_v19 = vcombine.low %v2814_v27, %v2818_v54  ;;  %v2829_v49 = vld [vmem:[%s9151_s7 + $0x4c0] sm:$0xff]  ;;  %v8188_v54 = vsub.s32 3, %v7803_v43 }
 0x467   :  { %v5813_v57 = vmul.f32 -1.442695, %v2568_v51  ;;  %v2572_v58 = vadd.f32 %v2571_v1, %v2198_v46  ;;  %v5967_v46 = vcombine.high %v2821_v18, %v2825_v59  ;;  %v2837_v51 = vld [vmem:[%s9151_s7 + $0x500] sm:$0xff]  ;;  %v5974_v1 = vcombine.low %v2829_v49, %v2833_v47  ;;  %v2874_v18 = vld [vmem:[%s9151_s7 + $0x628] sm:$0xff] }
 0x468   :  { %6944 = vpow2.f32 %v5812_v53  ;;  %v5816_v24 = vmul.f32 -1.442695, %v2570_v55  ;;  %v2841_v52 = vld [vmem:[%s9151_s7 + $0x520] sm:$0xff]  ;;  %v2838_v53 = vld [vmem:[%s9151_s7 + $0x508] sm:$0xff]  ;;  %v2202_v59 = vrot.slane %v8064_v62, %v8182_v25  ;;  %v2206_v40 = vrot.slane %v8064_v62, %v8188_v54 }
 0x469   :  { %6946 = vpow2.f32 %v5813_v57  ;;  %v5817_v60 = vmul.f32 -1.442695, %v2572_v58  ;;  %v2842_v55 = vld [vmem:[%s9151_s7 + $0x528] sm:$0xff]  ;;  %v5976_v57 = vcombine.low %v2830_v37, %v2834_v38  ;;  %v5983_v58 = vcombine.high %v2837_v51, %v2841_v52  ;;  %v2869_v27 = vld [vmem:[%s9151_s7 + $0x600] sm:$0xff] }
 0x46a   :  { %6948 = vpow2.f32 %v5816_v24  ;;  %v5985_v24 = vcombine.high %v2838_v53, %v2842_v55  ;;  %v2882_v62 = vld [vmem:[%s9151_s7 + $0x668] sm:$0xff] }
 0x46b   :  { %6950 = vpow2.f32 %v5817_v60  ;;  %v2845_v60 = vld [vmem:[%s9151_s7 + $0x540] sm:$0xff] }
 0x472   :  { %v6945_v61 = vpop.eup %6944 }
 0x473   :  { %v6947_v63 = vpop.eup %6946  ;;  %v2641_v0 = vadd.f32 1.0, %v6945_v61  ;;  %v2849_v61 = vld [vmem:[%s9151_s7 + $0x560] sm:$0xff] }
 0x474   :  { %v6949_v16 = vpop.eup %6948  ;;  %v2642_v28 = vadd.f32 1.0, %v6947_v63  ;;  %v2846_v63 = vld [vmem:[%s9151_s7 + $0x548] sm:$0xff] }
 0x475   :  { %v6951_v4 = vpop.eup %6950  ;;  %6952 = vrcp.f32 %v2641_v0  ;;  %v2645_v5 = vadd.f32 1.0, %v6949_v16  ;;  %v2850_v0 = vld [vmem:[%s9151_s7 + $0x568] sm:$0xff]  ;;  %v5982_v16 = vcombine.low %v2837_v51, %v2841_v52 }
 0x476   :  { %6954 = vrcp.f32 %v2642_v28  ;;  %v2646_v50 = vadd.f32 1.0, %v6951_v4  ;;  %v5984_v28 = vcombine.low %v2838_v53, %v2842_v55  ;;  %v5991_v4 = vcombine.high %v2845_v60, %v2849_v61 }
 0x477   :  { %6956 = vrcp.f32 %v2645_v5  ;;  %v5993_v5 = vcombine.high %v2846_v63, %v2850_v0 }
 0x478   :  { %6958 = vrcp.f32 %v2646_v50  ;;  %v2853_v50 = vld [vmem:[%s9151_s7 + $0x580] sm:$0xff] }
 0x47f   :  { %v6953_v12 = vpop.eup %6952 }
 0x480   :  { %v6955_v14 = vpop.eup %6954  ;;  %v2665_v17 = vmul.f32 %v6953_v12, %v1815_v10  ;;  %v2858_v10 = vld [vmem:[%s9151_s7 + $0x5a8] sm:$0xff]  ;;  %v5990_v12 = vcombine.low %v2845_v60, %v2849_v61  ;;  %v2889_v61 = vld [vmem:[%s9151_s7 + $0x6a0] sm:$0xff] }
 0x481   :  { %v6957_v21 = vpop.eup %6956  ;;  %v2666_v22 = vmul.f32 %v6955_v14, %v1817_v13  ;;  %v5992_v13 = vcombine.low %v2846_v63, %v2850_v0  ;;  %v5999_v14 = vcombine.high %v2853_v50, %v2857_v2  ;;  %v2886_v63 = vld [vmem:[%s9151_s7 + $0x688] sm:$0xff] }
 0x482   :  { %v6959_v32 = vpop.eup %6958  ;;  %v2669_v33 = vmul.f32 %v6957_v21, %v1819_v15  ;;  %v6001_v15 = vcombine.high %v2854_v8, %v2858_v10  ;;  %v2865_v21 = vld [vmem:[%s9151_s7 + $0x5e0] sm:$0xff]  ;;  %v2890_v0 = vld [vmem:[%s9151_s7 + $0x6a8] sm:$0xff] }
 0x483   :  { %v2670_v34 = vmul.f32 %v6959_v32, %v1821_v9  ;;  %v2862_v9 = vld [vmem:[%s9151_s7 + $0x5c8] sm:$0xff]  ;;  %v5998_v32 = vcombine.low %v2853_v50, %v2857_v2  ;;  %v6033_v2 = vcombine.high %v2886_v63, %v2890_v0 }
 0x484   :  { %v8095_v11 = vpack.c.bf16 %v2669_v33, %v2665_v17  ;;  %v2861_v17 = vld [vmem:[%s9151_s7 + $0x5c0] sm:$0xff]  ;;  %v6000_v33 = vcombine.low %v2854_v8, %v2858_v10 }
 0x485   :  { %v8097_v45 = vpack.c.bf16 %v2670_v34, %v2666_v22  ;;  %v2866_v22 = vld [vmem:[%s9151_s7 + $0x5e8] sm:$0xff]  ;;  %v6007_v34 = vcombine.high %v2861_v17, %v2865_v21  ;;  %v6006_v44 = vcombine.low %v2861_v17, %v2865_v21  ;;  %v2893_v8 = vld [vmem:[%s9151_s7 + $0x6c0] sm:$0xff] }
 0x486   :  { %v6009_v26 = vcombine.high %v2862_v9, %v2866_v22  ;;  %v2897_v10 = vld [vmem:[%s9151_s7 + $0x6e0] sm:$0xff] }
 0x487   :  { %4290 = vmatprep.mubr.bf16.mxu0 %v8097_v45  ;;  %4376 = vmatprep.mubr.bf16.mxu1 %v8097_v45  ;;  %v6039_v17 = vcombine.high %v2893_v8, %v2897_v10 }
 0x488   :  { %4291 = vmatmul.mubr.bf16.vlgmr.msra.gmra.mrb[68].mxu0 %v8095_v11  ;;  %4377 = vmatmul.mubr.bf16.vlgmr.msra.gmra.mrb[84].mxu1 %v8095_v11 }
 0x489   :  { %4302 = vmatpush1.bf16.msra.mxu0 %v5950_v42  ;;  %4388 = vmatpush1.bf16.msra.mxu1 %v5952_v7  ;;  %v5975_v42 = vcombine.high %v2829_v49, %v2833_v47  ;;  %v5977_v7 = vcombine.high %v2830_v37, %v2834_v38  ;;  %v2881_v47 = vld [vmem:[%s9151_s7 + $0x660] sm:$0xff]  ;;  %v2878_v37 = vld [vmem:[%s9151_s7 + $0x648] sm:$0xff] }
 0x48a   :  { %4303 = vmatprep.subr.bf16.mxu0 %v5959_v35  ;;  %4389 = vmatprep.subr.bf16.mxu1 %v5961_v36  ;;  %v2873_v35 = vld [vmem:[%s9151_s7 + $0x620] sm:$0xff]  ;;  %v2870_v36 = vld [vmem:[%s9151_s7 + $0x608] sm:$0xff] }
 0x48b   :  { %v6016_v51 = vcombine.low %v2870_v36, %v2874_v18 }
 0x48d   :  { %4304 = vmatpush1.bf16.msra.mxu0 %v5958_v23  ;;  %4390 = vmatpush1.bf16.msra.mxu1 %v5960_v19  ;;  %v6008_v23 = vcombine.low %v2862_v9, %v2866_v22  ;;  %v6015_v19 = vcombine.high %v2869_v27, %v2873_v35  ;;  %v2901_v9 = vld [vmem:[%s9151_s7 + $0x700] sm:$0xff] }
 0x48e   :  { %4305 = vmatprep.subr.bf16.mxu0 %v5967_v46  ;;  %4391 = vmatprep.subr.bf16.mxu1 %v5969_v48  ;;  %v6017_v46 = vcombine.high %v2870_v36, %v2874_v18  ;;  %v2877_v48 = vld [vmem:[%s9151_s7 + $0x640] sm:$0xff] }
 0x48f   :  { %v2905_v22 = vld [vmem:[%s9151_s7 + $0x720] sm:$0xff] }
 0x490   :  { %v2909_v18 = vld [vmem:[%s9151_s7 + $0x740] sm:$0xff] }
 0x491   :  { %4306 = vmatpush1.bf16.msra.mxu0 %v5966_v39  ;;  %4392 = vmatpush1.bf16.msra.mxu1 %v5968_v41 }
 0x492   :  { %4307 = vmatprep.subr.bf16.mxu0 %v5975_v42  ;;  %4393 = vmatprep.subr.bf16.mxu1 %v5977_v7  ;;  %v6014_v7 = vcombine.low %v2869_v27, %v2873_v35  ;;  %v6047_v35 = vcombine.high %v2901_v9, %v2905_v22 }
 0x495   :  { %4308 = vmatpush1.bf16.msra.mxu0 %v5974_v1  ;;  %4394 = vmatpush1.bf16.msra.mxu1 %v5976_v57  ;;  %v6023_v1 = vcombine.high %v2877_v48, %v2881_v47  ;;  %v6025_v57 = vcombine.high %v2878_v37, %v2882_v62 }
 0x496   :  { %4309 = vmatprep.subr.bf16.mxu0 %v5983_v58  ;;  %4395 = vmatprep.subr.bf16.mxu1 %v5985_v24  ;;  %v2885_v58 = vld [vmem:[%s9151_s7 + $0x680] sm:$0xff] }
 0x497   :  { %v6031_v50 = vcombine.high %v2885_v58, %v2889_v61 }
 0x499   :  { %4310 = vmatpush1.bf16.msra.mxu0 %v5982_v16  ;;  %4396 = vmatpush1.bf16.msra.mxu1 %v5984_v28 }
 0x49a   :  { %4311 = vmatprep.subr.bf16.mxu0 %v5991_v4  ;;  %4397 = vmatprep.subr.bf16.mxu1 %v5993_v5  ;;  %v6022_v4 = vcombine.low %v2877_v48, %v2881_v47  ;;  %v6024_v5 = vcombine.low %v2878_v37, %v2882_v62  ;;  %v6046_v37 = vcombine.low %v2901_v9, %v2905_v22 }
 0x49d   :  { %4312 = vmatpush1.bf16.msra.mxu0 %v5990_v12  ;;  %4398 = vmatpush1.bf16.msra.mxu1 %v5992_v13  ;;  %v2894_v12 = vld [vmem:[%s9151_s7 + $0x6c8] sm:$0xff] }
 0x49e   :  { %4313 = vmatprep.subr.bf16.mxu0 %v5999_v14  ;;  %4399 = vmatprep.subr.bf16.mxu1 %v6001_v15  ;;  %v2898_v13 = vld [vmem:[%s9151_s7 + $0x6e8] sm:$0xff]  ;;  %v6030_v14 = vcombine.low %v2885_v58, %v2889_v61  ;;  %v6032_v15 = vcombine.low %v2886_v63, %v2890_v0  ;;  %v2929_v61 = vld [vmem:[%s9151_s7 + $0x7e0] sm:$0xff] }
 0x49f   :  { %v6041_v21 = vcombine.high %v2894_v12, %v2898_v13  ;;  %v2926_v63 = vld [vmem:[%s9151_s7 + $0x7c8] sm:$0xff] }
 0x4a0   :  { %v2930_v0 = vld [vmem:[%s9151_s7 + $0x7e8] sm:$0xff] }
 0x4a1   :  { %4314 = vmatpush1.bf16.msra.mxu0 %v5998_v32  ;;  %4400 = vmatpush1.bf16.msra.mxu1 %v6000_v33  ;;  %v2902_v32 = vld [vmem:[%s9151_s7 + $0x708] sm:$0xff]  ;;  %v6072_v9 = vcombine.low %v2926_v63, %v2930_v0 }
 0x4a2   :  { %4315 = vmatprep.subr.bf16.mxu0 %v6007_v34  ;;  %4401 = vmatprep.subr.bf16.mxu1 %v6009_v26  ;;  %v2906_v33 = vld [vmem:[%s9151_s7 + $0x728] sm:$0xff]  ;;  %v6038_v34 = vcombine.low %v2893_v8, %v2897_v10  ;;  %v6040_v26 = vcombine.low %v2894_v12, %v2898_v13  ;;  %v2683_v10 = vld [vmem:[%s9151_s7 + $0x30] sm:$0xff]  ;;  %v2680_v12 = vld [vmem:[%s9151_s7 + $0x18] sm:$0xff] }
 0x4a3   :  { %v2608_v49 = vpop.f32.mrb[80].mxu1  ;;  %v6049_v36 = vcombine.high %v2902_v32, %v2906_v33  ;;  %v6048_v62 = vcombine.low %v2902_v32, %v2906_v33 }
 0x4a4   :  { %v2609_v38 = vadd.f32 %v2608_v49, %v2202_v59  ;;  %v2610_v39 = vpop.f32.mrb[81].mxu1 }
 0x4a5   :  { %v2611_v41 = vadd.f32 %v2610_v39, %v2206_v40  ;;  %v2612_v42 = vpop.f32.mrb[82].mxu1  ;;  %4316 = vmatpush1.bf16.msra.mxu0 %v6006_v44  ;;  %4402 = vmatpush1.bf16.msra.mxu1 %v6008_v23  ;;  %v2913_v44 = vld [vmem:[%s9151_s7 + $0x760] sm:$0xff]  ;;  %v2910_v23 = vld [vmem:[%s9151_s7 + $0x748] sm:$0xff] }
 0x4a6   :  { %v5814_v52 = vmul.f32 -1.442695, %v2609_v38  ;;  %v2613_v53 = vadd.f32 %v2612_v42, %v2202_v59  ;;  %v2614_v55 = vpop.f32.mrb[83].mxu1  ;;  %4317 = vmatprep.subr.bf16.mxu0 %v6015_v19  ;;  %4403 = vmatprep.subr.bf16.mxu1 %v6017_v46  ;;  %v2914_v19 = vld [vmem:[%s9151_s7 + $0x768] sm:$0xff]  ;;  %v6055_v39 = vcombine.high %v2909_v18, %v2913_v44  ;;  %v2917_v42 = vld [vmem:[%s9151_s7 + $0x780] sm:$0xff] }
 0x4a7   :  { %v5815_v24 = vmul.f32 -1.442695, %v2611_v41  ;;  %v2615_v60 = vadd.f32 %v2614_v55, %v2206_v40  ;;  %v6057_v41 = vcombine.high %v2910_v23, %v2914_v19  ;;  %v6056_v55 = vcombine.low %v2910_v23, %v2914_v19 }
 0x4a8   :  { %6960 = vpow2.f32 %v5814_v52  ;;  %v5818_v16 = vmul.f32 -1.442695, %v2613_v53  ;;  %v2922_v52 = vld [vmem:[%s9151_s7 + $0x7a8] sm:$0xff]  ;;  %v6054_v53 = vcombine.low %v2909_v18, %v2913_v44  ;;  %v2692_v18 = vld [vmem:[%s9151_s7 + $0x78] sm:$0xff] }
 0x4a9   :  { %6962 = vpow2.f32 %v5815_v24  ;;  %v5819_v28 = vmul.f32 -1.442695, %v2615_v60  ;;  %4318 = vmatpush1.bf16.msra.mxu0 %v6014_v7  ;;  %4404 = vmatpush1.bf16.msra.mxu1 %v6016_v51  ;;  %v2921_v7 = vld [vmem:[%s9151_s7 + $0x7a0] sm:$0xff]  ;;  %v2918_v51 = vld [vmem:[%s9151_s7 + $0x788] sm:$0xff]  ;;  %v1560_v60 = vrot.slane %v8073_v6, %v8188_v54 }
 0x4aa   :  { %6964 = vpow2.f32 %v5818_v16  ;;  %4319 = vmatprep.subr.bf16.mxu0 %v6023_v1  ;;  %4405 = vmatprep.subr.bf16.mxu1 %v6025_v57  ;;  %v1556_v1 = vrot.slane %v8073_v6, %v8182_v25  ;;  %v6063_v57 = vcombine.high %v2917_v42, %v2921_v7  ;;  %v6065_v58 = vcombine.high %v2918_v51, %v2922_v52  ;;  %v2925_v24 = vld [vmem:[%s9151_s7 + $0x7c0] sm:$0xff] }
 0x4ab   :  { %6966 = vpow2.f32 %v5819_v28  ;;  %v6062_v16 = vcombine.low %v2917_v42, %v2921_v7  ;;  %v6064_v28 = vcombine.low %v2918_v51, %v2922_v52  ;;  %v6071_v6 = vcombine.high %v2925_v24, %v2929_v61  ;;  %v2707_v42 = vld [vmem:[%s9151_s7 + $0xf0] sm:$0xff]  ;;  %v2704_v7 = vld [vmem:[%s9151_s7 + $0xd8] sm:$0xff] }
 0x4ac   :  { %v1860_v8 = vadd.f32 %v7626_v20, %v1560_v60  ;;  %v6070_v20 = vcombine.low %v2925_v24, %v2929_v61  ;;  %v2711_v52 = vld [vmem:[%s9151_s7 + $0x110] sm:$0xff] }
 0x4ad   :  { %4320 = vmatpush1.bf16.msra.mxu0 %v6022_v4  ;;  %4406 = vmatpush1.bf16.msra.mxu1 %v6024_v5  ;;  %v1858_v4 = vadd.f32 %v7624_v29, %v1556_v1  ;;  %v6073_v5 = vcombine.high %v2926_v63, %v2930_v0  ;;  %v2684_v29 = vld [vmem:[%s9151_s7 + $0x38] sm:$0xff]  ;;  %v2719_v61 = vld [vmem:[%s9151_s7 + $0x150] sm:$0xff] }
 0x4ae   :  { %4321 = vmatprep.subr.bf16.mxu0 %v6031_v50  ;;  %4407 = vmatprep.subr.bf16.mxu1 %v6033_v2  ;;  %v2679_v50 = vld [vmem:[%s9151_s7 + $0x10] sm:$0xff]  ;;  %v5828_v44 = vcombine.low %v2680_v12, %v2684_v29 }
 0x4af   :  { %v2723_v63 = vld [vmem:[%s9151_s7 + $0x170] sm:$0xff] }
 0x4b1   :  { %4322 = vmatpush1.bf16.msra.mxu0 %v6030_v14  ;;  %4408 = vmatpush1.bf16.msra.mxu1 %v6032_v15  ;;  %v1862_v14 = vadd.f32 %v7628_v30, %v1556_v1  ;;  %v1864_v15 = vadd.f32 %v7630_v31, %v1560_v60  ;;  %v2687_v30 = vld [vmem:[%s9151_s7 + $0x50] sm:$0xff] }
 0x4b2   :  { %v6961_v27 = vpop.eup %6960  ;;  %4323 = vmatprep.subr.bf16.mxu0 %v6039_v17  ;;  %4409 = vmatprep.subr.bf16.mxu1 %v6041_v21  ;;  %v2691_v31 = vld [vmem:[%s9151_s7 + $0x70] sm:$0xff] }
 0x4b3   :  { %v6963_v59 = vpop.eup %6962  ;;  %v2643_v40 = vadd.f32 1.0, %v6961_v27  ;;  %v5835_v23 = vcombine.high %v2687_v30, %v2691_v31 }
 0x4b4   :  { %v6965_v46 = vpop.eup %6964  ;;  %v2644_v48 = vadd.f32 1.0, %v6963_v59 }
 0x4b5   :  { %v6967_v49 = vpop.eup %6966  ;;  %6968 = vrcp.f32 %v2643_v40  ;;  %v2647_v47 = vadd.f32 1.0, %v6965_v46  ;;  %4324 = vmatpush1.bf16.msra.mxu0 %v6038_v34  ;;  %4410 = vmatpush1.bf16.msra.mxu1 %v6040_v26  ;;  %v5827_v34 = vcombine.high %v2679_v50, %v2683_v10  ;;  %v5829_v26 = vcombine.high %v2680_v12, %v2684_v29  ;;  %v2695_v46 = vld [vmem:[%s9151_s7 + $0x90] sm:$0xff]  ;;  %v2728_v12 = vld [vmem:[%s9151_s7 + $0x198] sm:$0xff] }
 0x4b6   :  { %6970 = vrcp.f32 %v2644_v48  ;;  %v2648_v38 = vadd.f32 1.0, %v6967_v49  ;;  %4325 = vmatprep.subr.bf16.mxu0 %v6047_v35  ;;  %4411 = vmatprep.subr.bf16.mxu1 %v6049_v36  ;;  %v2688_v36 = vld [vmem:[%s9151_s7 + $0x58] sm:$0xff]  ;;  %v5826_v40 = vcombine.low %v2679_v50, %v2683_v10  ;;  %v2699_v48 = vld [vmem:[%s9151_s7 + $0xb0] sm:$0xff]  ;;  %v5867_v10 = vcombine.high %v2719_v61, %v2723_v63 }
 0x4b7   :  { %6972 = vrcp.f32 %v2647_v47  ;;  %v5837_v19 = vcombine.high %v2688_v36, %v2692_v18  ;;  %v2696_v49 = vld [vmem:[%s9151_s7 + $0x98] sm:$0xff]  ;;  %v5842_v51 = vcombine.low %v2695_v46, %v2699_v48  ;;  %v2727_v50 = vld [vmem:[%s9151_s7 + $0x190] sm:$0xff] }
 0x4b8   :  { %6974 = vrcp.f32 %v2648_v38  ;;  %v2700_v47 = vld [vmem:[%s9151_s7 + $0xb8] sm:$0xff]  ;;  %v5843_v38 = vcombine.high %v2695_v46, %v2699_v48 }
 0x4b9   :  { %4326 = vmatpush1.bf16.msra.mxu0 %v6046_v37  ;;  %4412 = vmatpush1.bf16.msra.mxu1 %v6048_v62  ;;  %v5834_v37 = vcombine.low %v2687_v30, %v2691_v31  ;;  %v5836_v62 = vcombine.low %v2688_v36, %v2692_v18  ;;  %v2732_v29 = vld [vmem:[%s9151_s7 + $0x1b8] sm:$0xff] }
 0x4ba   :  { %4327 = vmatprep.subr.bf16.mxu0 %v6055_v39  ;;  %4413 = vmatprep.subr.bf16.mxu1 %v6057_v41  ;;  %v2703_v39 = vld [vmem:[%s9151_s7 + $0xd0] sm:$0xff]  ;;  %v5845_v41 = vcombine.high %v2696_v49, %v2700_v47  ;;  %v2744_v31 = vld [vmem:[%s9151_s7 + $0x218] sm:$0xff] }
 0x4bb   :  { %v5851_v1 = vcombine.high %v2703_v39, %v2707_v42  ;;  %v5850_v60 = vcombine.low %v2703_v39, %v2707_v42  ;;  %v2748_v36 = vld [vmem:[%s9151_s7 + $0x238] sm:$0xff] }
 0x4bc   :  { %v2752_v48 = vld [vmem:[%s9151_s7 + $0x258] sm:$0xff]  ;;  %v5892_v39 = vcombine.low %v2744_v31, %v2748_v36 }
 0x4bd   :  { %4328 = vmatpush1.bf16.msra.mxu0 %v6054_v53  ;;  %4414 = vmatpush1.bf16.msra.mxu1 %v6056_v55  ;;  %v2715_v53 = vld [vmem:[%s9151_s7 + $0x130] sm:$0xff]  ;;  %v5844_v55 = vcombine.low %v2696_v49, %v2700_v47  ;;  %v2756_v49 = vld [vmem:[%s9151_s7 + $0x278] sm:$0xff]  ;;  %v5893_v47 = vcombine.high %v2744_v31, %v2748_v36 }
 0x4be   :  { %4329 = vmatprep.subr.bf16.mxu0 %v6063_v57  ;;  %4415 = vmatprep.subr.bf16.mxu1 %v6065_v58  ;;  %v2712_v57 = vld [vmem:[%s9151_s7 + $0x118] sm:$0xff] }
 0x4bf   :  { %v6969_v2 = vpop.eup %6968  ;;  %v2716_v58 = vld [vmem:[%s9151_s7 + $0x138] sm:$0xff] }
 0x4c0   :  { %v6971_v13 = vpop.eup %6970  ;;  %v2667_v17 = vmul.f32 %v6969_v2, %v1858_v4  ;;  %v2724_v4 = vld [vmem:[%s9151_s7 + $0x178] sm:$0xff]  ;;  %v2731_v2 = vld [vmem:[%s9151_s7 + $0x1b0] sm:$0xff] }
 0x4c1   :  { %v6973_v21 = vpop.eup %6972  ;;  %4330 = vmatpush1.bf16.msra.mxu0 %v6062_v16  ;;  %4416 = vmatpush1.bf16.msra.mxu1 %v6064_v28  ;;  %v2668_v22 = vmul.f32 %v6971_v13, %v1860_v8  ;;  %v5859_v16 = vcombine.high %v2711_v52, %v2715_v53  ;;  %v2720_v28 = vld [vmem:[%s9151_s7 + $0x158] sm:$0xff]  ;;  %v5860_v8 = vcombine.low %v2712_v57, %v2716_v58 }
 0x4c2   :  { %v6975_v32 = vpop.eup %6974  ;;  %4331 = vmatprep.subr.bf16.mxu0 %v6071_v6  ;;  %4417 = vmatprep.subr.bf16.mxu1 %v6073_v5  ;;  %v2671_v33 = vmul.f32 %v6973_v21, %v1862_v14  ;;  %v5861_v6 = vcombine.high %v2712_v57, %v2716_v58  ;;  %v5858_v5 = vcombine.low %v2711_v52, %v2715_v53  ;;  %v2760_v42 = vld [vmem:[%s9151_s7 + $0x298] sm:$0xff]  ;;  %v2767_v52 = vld [vmem:[%s9151_s7 + $0x2d0] sm:$0xff] }
 0x4c3   :  { %v2672_v27 = vmul.f32 %v6975_v32, %v1864_v15  ;;  %v5869_v13 = vcombine.high %v2720_v28, %v2724_v4  ;;  %v5866_v14 = vcombine.low %v2719_v61, %v2723_v63  ;;  %v2735_v15 = vld [vmem:[%s9151_s7 + $0x1d0] sm:$0xff]  ;;  %v5868_v21 = vcombine.low %v2720_v28, %v2724_v4  ;;  %v2768_v57 = vld [vmem:[%s9151_s7 + $0x2d8] sm:$0xff] }
 0x4c4   :  { %v8310_v35 = vpack.c.bf16 %v2671_v33, %v2667_v17  ;;  %v2739_v17 = vld [vmem:[%s9151_s7 + $0x1f0] sm:$0xff]  ;;  %v5877_v32 = vcombine.high %v2728_v12, %v2732_v29  ;;  %v5874_v33 = vcombine.low %v2727_v50, %v2731_v2  ;;  %v2772_v58 = vld [vmem:[%s9151_s7 + $0x2f8] sm:$0xff] }
 0x4c5   :  { %4332 = vmatpush1.bf16.msra.mxu0 %v6070_v20  ;;  %4418 = vmatpush1.bf16.msra.mxu1 %v6072_v9  ;;  %v8321_v59 = vpack.c.bf16 %v2672_v27, %v2668_v22  ;;  %v5875_v20 = vcombine.high %v2727_v50, %v2731_v2  ;;  %v2736_v9 = vld [vmem:[%s9151_s7 + $0x1d8] sm:$0xff]  ;;  %v5876_v27 = vcombine.low %v2728_v12, %v2732_v29  ;;  %v2771_v53 = vld [vmem:[%s9151_s7 + $0x2f0] sm:$0xff] }
 0x4c6   :  { %4430 = vmatprep.subr.bf16.mxu0 %v5827_v34  ;;  %4516 = vmatprep.subr.bf16.mxu1 %v5829_v26  ;;  %v2740_v22 = vld [vmem:[%s9151_s7 + $0x1f8] sm:$0xff]  ;;  %v2743_v34 = vld [vmem:[%s9151_s7 + $0x210] sm:$0xff]  ;;  %v5883_v30 = vcombine.high %v2735_v15, %v2739_v17 }
 0x4c7   :  { %4333 = vmatprep.mubr.bf16.mxu0 %v8321_v59  ;;  %4419 = vmatprep.mubr.bf16.mxu1 %v8321_v59  ;;  %v2747_v26 = vld [vmem:[%s9151_s7 + $0x230] sm:$0xff]  ;;  %v5885_v18 = vcombine.high %v2736_v9, %v2740_v22  ;;  %v2776_v28 = vld [vmem:[%s9151_s7 + $0x318] sm:$0xff] }
 0x4c8   :  { %4334 = vmatmul.mubr.bf16.vlgmr.msra.gmra.mrb[68].mxu0 %v8310_v35  ;;  %4420 = vmatmul.mubr.bf16.vlgmr.msra.gmra.mrb[84].mxu1 %v8310_v35  ;;  %v5891_v46 = vcombine.high %v2743_v34, %v2747_v26  ;;  %v2775_v61 = vld [vmem:[%s9151_s7 + $0x310] sm:$0xff]  ;;  %v2780_v4 = vld [vmem:[%s9151_s7 + $0x338] sm:$0xff] }
 0x4c9   :  { %4431 = vmatpush1.bf16.msra.mxu0 %v5826_v40  ;;  %4462 = vmatprep.mubr.bf16.mxu0 %v8097_v45  ;;  %v5882_v40 = vcombine.low %v2735_v15, %v2739_v17  ;;  %v2779_v63 = vld [vmem:[%s9151_s7 + $0x330] sm:$0xff]  ;;  %v2784_v12 = vld [vmem:[%s9151_s7 + $0x358] sm:$0xff] }
 0x4ca   :  { %4517 = vmatpush1.bf16.msra.mxu1 %v5828_v44  ;;  %4548 = vmatprep.mubr.bf16.mxu1 %v8097_v45  ;;  %v2708_v45 = vld [vmem:[%s9151_s7 + $0xf8] sm:$0xff]  ;;  %v2751_v44 = vld [vmem:[%s9151_s7 + $0x250] sm:$0xff] }
 0x4cb   :  { %4432 = vmatprep.subr.bf16.mxu0 %v5835_v23  ;;  %4518 = vmatprep.subr.bf16.mxu1 %v5837_v19  ;;  %v5853_v24 = vcombine.high %v2704_v7, %v2708_v45  ;;  %v5852_v0 = vcombine.low %v2704_v7, %v2708_v45  ;;  %v2755_v23 = vld [vmem:[%s9151_s7 + $0x270] sm:$0xff]  ;;  %v5884_v19 = vcombine.low %v2736_v9, %v2740_v22  ;;  %v2764_v7 = vld [vmem:[%s9151_s7 + $0x2b8] sm:$0xff] }
 0x4cc   :  { %v5901_v45 = vcombine.high %v2752_v48, %v2756_v49  ;;  %v2783_v50 = vld [vmem:[%s9151_s7 + $0x350] sm:$0xff]  ;;  %v2788_v29 = vld [vmem:[%s9151_s7 + $0x378] sm:$0xff] }
 0x4cd   :  { %4433 = vmatpush1.bf16.msra.mxu0 %v5834_v37  ;;  %v5890_v37 = vcombine.low %v2743_v34, %v2747_v26  ;;  %v2787_v2 = vld [vmem:[%s9151_s7 + $0x370] sm:$0xff]  ;;  %v2792_v9 = vld [vmem:[%s9151_s7 + $0x398] sm:$0xff]  ;;  %v5932_v26 = vcombine.low %v2784_v12, %v2788_v29 }
 0x4ce   :  { %4519 = vmatpush1.bf16.msra.mxu1 %v5836_v62  ;;  %4434 = vmatprep.subr.bf16.mxu0 %v5843_v38  ;;  %v2759_v62 = vld [vmem:[%s9151_s7 + $0x290] sm:$0xff]  ;;  %v2796_v22 = vld [vmem:[%s9151_s7 + $0x3b8] sm:$0xff] }
 0x4cf   :  { %4520 = vmatprep.subr.bf16.mxu1 %v5845_v41  ;;  %v2763_v38 = vld [vmem:[%s9151_s7 + $0x2b0] sm:$0xff]  ;;  %v5899_v41 = vcombine.high %v2751_v44, %v2755_v23  ;;  %v2800_v31 = vld [vmem:[%s9151_s7 + $0x3d8] sm:$0xff] }
 0x4d0   :  { %v2791_v15 = vld [vmem:[%s9151_s7 + $0x390] sm:$0xff]  ;;  %v2804_v36 = vld [vmem:[%s9151_s7 + $0x3f8] sm:$0xff] }
 0x4d1   :  { %4435 = vmatpush1.bf16.msra.mxu0 %v5842_v51  ;;  %v5898_v51 = vcombine.low %v2751_v44, %v2755_v23  ;;  %v2795_v17 = vld [vmem:[%s9151_s7 + $0x3b0] sm:$0xff]  ;;  %v5940_v44 = vcombine.low %v2792_v9, %v2796_v22 }
 0x4d2   :  { %4521 = vmatpush1.bf16.msra.mxu1 %v5844_v55  ;;  %4436 = vmatprep.subr.bf16.mxu0 %v5851_v1  ;;  %v5900_v55 = vcombine.low %v2752_v48, %v2756_v49  ;;  %v5907_v1 = vcombine.high %v2759_v62, %v2763_v38  ;;  %v2799_v34 = vld [vmem:[%s9151_s7 + $0x3d0] sm:$0xff]  ;;  %v2808_v49 = vld [vmem:[%s9151_s7 + $0x418] sm:$0xff] }
 0x4d3   :  { %4522 = vmatprep.subr.bf16.mxu1 %v5853_v24  ;;  %v5909_v24 = vcombine.high %v2760_v42, %v2764_v7  ;;  %v2811_v48 = vld [vmem:[%s9151_s7 + $0x430] sm:$0xff] }
 0x4d5   :  { %4437 = vmatpush1.bf16.msra.mxu0 %v5850_v60  ;;  %v5906_v60 = vcombine.low %v2759_v62, %v2763_v38  ;;  %v5948_v62 = vcombine.low %v2800_v31, %v2804_v36 }
 0x4d6   :  { %4523 = vmatpush1.bf16.msra.mxu1 %v5852_v0  ;;  %4438 = vmatprep.subr.bf16.mxu0 %v5859_v16  ;;  %v5908_v0 = vcombine.low %v2760_v42, %v2764_v7  ;;  %v5915_v16 = vcombine.high %v2767_v52, %v2771_v53  ;;  %v2819_v42 = vld [vmem:[%s9151_s7 + $0x470] sm:$0xff] }
 0x4d7   :  { %4524 = vmatprep.subr.bf16.mxu1 %v5861_v6  ;;  %v5917_v6 = vcombine.high %v2768_v57, %v2772_v58 }
 0x4d9   :  { %4439 = vmatpush1.bf16.msra.mxu0 %v5858_v5  ;;  %v5914_v5 = vcombine.low %v2767_v52, %v2771_v53 }
 0x4da   :  { %4525 = vmatpush1.bf16.msra.mxu1 %v5860_v8  ;;  %4440 = vmatprep.subr.bf16.mxu0 %v5867_v10  ;;  %v5916_v8 = vcombine.low %v2768_v57, %v2772_v58  ;;  %v5923_v10 = vcombine.high %v2775_v61, %v2779_v63  ;;  %v2824_v58 = vld [vmem:[%s9151_s7 + $0x498] sm:$0xff] }
 0x4db   :  { %4526 = vmatprep.subr.bf16.mxu1 %v5869_v13  ;;  %v5925_v13 = vcombine.high %v2776_v28, %v2780_v4 }
 0x4dd   :  { %4441 = vmatpush1.bf16.msra.mxu0 %v5866_v14  ;;  %v5922_v14 = vcombine.low %v2775_v61, %v2779_v63 }
 0x4de   :  { %4527 = vmatpush1.bf16.msra.mxu1 %v5868_v21  ;;  %4442 = vmatprep.subr.bf16.mxu0 %v5875_v20  ;;  %v5924_v21 = vcombine.low %v2776_v28, %v2780_v4  ;;  %v5931_v20 = vcombine.high %v2783_v50, %v2787_v2  ;;  %v2835_v28 = vld [vmem:[%s9151_s7 + $0x4f0] sm:$0xff]  ;;  %v2836_v4 = vld [vmem:[%s9151_s7 + $0x4f8] sm:$0xff] }
 0x4df   :  { %4528 = vmatprep.subr.bf16.mxu1 %v5877_v32  ;;  %v5933_v32 = vcombine.high %v2784_v12, %v2788_v29  ;;  %v2844_v12 = vld [vmem:[%s9151_s7 + $0x538] sm:$0xff] }
 0x4e1   :  { %4443 = vmatpush1.bf16.msra.mxu0 %v5874_v33  ;;  %v5930_v33 = vcombine.low %v2783_v50, %v2787_v2  ;;  %v2839_v2 = vld [vmem:[%s9151_s7 + $0x510] sm:$0xff] }
 0x4e2   :  { %4529 = vmatpush1.bf16.msra.mxu1 %v5876_v27  ;;  %4444 = vmatprep.subr.bf16.mxu0 %v5883_v30  ;;  %v5939_v27 = vcombine.high %v2791_v15, %v2795_v17  ;;  %v2803_v30 = vld [vmem:[%s9151_s7 + $0x3f0] sm:$0xff] }
 0x4e3   :  { %4530 = vmatprep.subr.bf16.mxu1 %v5885_v18  ;;  %v5941_v18 = vcombine.high %v2792_v9, %v2796_v22  ;;  %v5947_v23 = vcombine.high %v2799_v34, %v2803_v30  ;;  %v2852_v9 = vld [vmem:[%s9151_s7 + $0x578] sm:$0xff] }
 0x4e5   :  { %4445 = vmatpush1.bf16.msra.mxu0 %v5882_v40  ;;  %v5938_v40 = vcombine.low %v2791_v15, %v2795_v17  ;;  %v2847_v17 = vld [vmem:[%s9151_s7 + $0x550] sm:$0xff] }
 0x4e6   :  { %4531 = vmatpush1.bf16.msra.mxu1 %v5884_v19  ;;  %4446 = vmatprep.subr.bf16.mxu0 %v5891_v46  ;;  %v5949_v19 = vcombine.high %v2800_v31, %v2804_v36  ;;  %v2807_v46 = vld [vmem:[%s9151_s7 + $0x410] sm:$0xff]  ;;  %v2860_v31 = vld [vmem:[%s9151_s7 + $0x5b8] sm:$0xff] }
 0x4e7   :  { %4532 = vmatprep.subr.bf16.mxu1 %v5893_v47  ;;  %v2812_v47 = vld [vmem:[%s9151_s7 + $0x438] sm:$0xff]  ;;  %v5955_v38 = vcombine.high %v2807_v46, %v2811_v48  ;;  %v5954_v7 = vcombine.low %v2807_v46, %v2811_v48 }
 0x4e8   :  { %v5956_v52 = vcombine.low %v2808_v49, %v2812_v47  ;;  %v2864_v46 = vld [vmem:[%s9151_s7 + $0x5d8] sm:$0xff] }
 0x4e9   :  { %4447 = vmatpush1.bf16.msra.mxu0 %v5890_v37  ;;  %v5946_v37 = vcombine.low %v2799_v34, %v2803_v30  ;;  %v2856_v30 = vld [vmem:[%s9151_s7 + $0x598] sm:$0xff] }
 0x4ea   :  { %4533 = vmatpush1.bf16.msra.mxu1 %v5892_v39  ;;  %4448 = vmatprep.subr.bf16.mxu0 %v5899_v41  ;;  %v5957_v39 = vcombine.high %v2808_v49, %v2812_v47  ;;  %v2815_v41 = vld [vmem:[%s9151_s7 + $0x450] sm:$0xff]  ;;  %v2868_v48 = vld [vmem:[%s9151_s7 + $0x5f8] sm:$0xff]  ;;  %v6004_v47 = vcombine.low %v2856_v30, %v2860_v31 }
 0x4eb   :  { %4534 = vmatprep.subr.bf16.mxu1 %v5901_v45  ;;  %v2816_v45 = vld [vmem:[%s9151_s7 + $0x458] sm:$0xff]  ;;  %v5963_v53 = vcombine.high %v2815_v41, %v2819_v42 }
 0x4ed   :  { %4449 = vmatpush1.bf16.msra.mxu0 %v5898_v51  ;;  %v2820_v51 = vld [vmem:[%s9151_s7 + $0x478] sm:$0xff] }
 0x4ee   :  { %4535 = vmatpush1.bf16.msra.mxu1 %v5900_v55  ;;  %4450 = vmatprep.subr.bf16.mxu0 %v5907_v1  ;;  %v2823_v55 = vld [vmem:[%s9151_s7 + $0x490] sm:$0xff]  ;;  %v5965_v57 = vcombine.high %v2816_v45, %v2820_v51  ;;  %v5964_v61 = vcombine.low %v2816_v45, %v2820_v51  ;;  %v6012_v45 = vcombine.low %v2864_v46, %v2868_v48 }
 0x4ef   :  { %4536 = vmatprep.subr.bf16.mxu1 %v5909_v24  ;;  %v2827_v1 = vld [vmem:[%s9151_s7 + $0x4b0] sm:$0xff]  ;;  %v2828_v24 = vld [vmem:[%s9151_s7 + $0x4b8] sm:$0xff] }
 0x4f0   :  { %v5971_v63 = vcombine.high %v2823_v55, %v2827_v1 }
 0x4f1   :  { %4451 = vmatpush1.bf16.msra.mxu0 %v5906_v60  ;;  %v5962_v60 = vcombine.low %v2815_v41, %v2819_v42  ;;  %v2872_v41 = vld [vmem:[%s9151_s7 + $0x618] sm:$0xff] }
 0x4f2   :  { %4537 = vmatpush1.bf16.msra.mxu1 %v5908_v0  ;;  %4452 = vmatprep.subr.bf16.mxu0 %v5915_v16  ;;  %v5973_v0 = vcombine.high %v2824_v58, %v2828_v24  ;;  %v2831_v16 = vld [vmem:[%s9151_s7 + $0x4d0] sm:$0xff]  ;;  %v2876_v42 = vld [vmem:[%s9151_s7 + $0x638] sm:$0xff] }
 0x4f3   :  { %4538 = vmatprep.subr.bf16.mxu1 %v5917_v6  ;;  %v5972_v6 = vcombine.low %v2824_v58, %v2828_v24  ;;  %v5978_v29 = vcombine.low %v2831_v16, %v2835_v28  ;;  %v6020_v24 = vcombine.low %v2872_v41, %v2876_v42 }
 0x4f5   :  { %4453 = vmatpush1.bf16.msra.mxu0 %v5914_v5  ;;  %v5979_v5 = vcombine.high %v2831_v16, %v2835_v28  ;;  %v2888_v16 = vld [vmem:[%s9151_s7 + $0x698] sm:$0xff] }
 0x4f6   :  { %4539 = vmatpush1.bf16.msra.mxu1 %v5916_v8  ;;  %4454 = vmatprep.subr.bf16.mxu0 %v5923_v10  ;;  %v2843_v8 = vld [vmem:[%s9151_s7 + $0x530] sm:$0xff]  ;;  %v2840_v10 = vld [vmem:[%s9151_s7 + $0x518] sm:$0xff] }
 0x4f7   :  { %4540 = vmatprep.subr.bf16.mxu1 %v5925_v13  ;;  %v5989_v15 = vcombine.high %v2840_v10, %v2844_v12  ;;  %v5986_v22 = vcombine.low %v2839_v2, %v2843_v8  ;;  %v2892_v28 = vld [vmem:[%s9151_s7 + $0x6b8] sm:$0xff] }
 0x4f9   :  { %4455 = vmatpush1.bf16.msra.mxu0 %v5922_v14  ;;  %v5987_v14 = vcombine.high %v2839_v2, %v2843_v8  ;;  %v2896_v2 = vld [vmem:[%s9151_s7 + $0x6d8] sm:$0xff] }
 0x4fa   :  { %4541 = vmatpush1.bf16.msra.mxu1 %v5924_v21  ;;  %4456 = vmatprep.subr.bf16.mxu0 %v5931_v20  ;;  %v2851_v21 = vld [vmem:[%s9151_s7 + $0x570] sm:$0xff]  ;;  %v2848_v20 = vld [vmem:[%s9151_s7 + $0x558] sm:$0xff] }
 0x4fb   :  { %4542 = vmatprep.subr.bf16.mxu1 %v5933_v32  ;;  %v5988_v32 = vcombine.low %v2840_v10, %v2844_v12  ;;  %v5997_v34 = vcombine.high %v2848_v20, %v2852_v9  ;;  %v5994_v36 = vcombine.low %v2847_v17, %v2851_v21  ;;  %v2900_v8 = vld [vmem:[%s9151_s7 + $0x6f8] sm:$0xff]  ;;  %v6036_v12 = vcombine.low %v2888_v16, %v2892_v28 }
 0x4fd   :  { %4457 = vmatpush1.bf16.msra.mxu0 %v5930_v33  ;;  %v5995_v33 = vcombine.high %v2847_v17, %v2851_v21  ;;  %v2904_v17 = vld [vmem:[%s9151_s7 + $0x718] sm:$0xff] }
 0x4fe   :  { %4543 = vmatpush1.bf16.msra.mxu1 %v5932_v26  ;;  %4458 = vmatprep.subr.bf16.mxu0 %v5939_v27  ;;  %v2855_v26 = vld [vmem:[%s9151_s7 + $0x590] sm:$0xff]  ;;  %v2908_v21 = vld [vmem:[%s9151_s7 + $0x738] sm:$0xff] }
 0x4ff   :  { %4544 = vmatprep.subr.bf16.mxu1 %v5941_v18  ;;  %v2859_v27 = vld [vmem:[%s9151_s7 + $0x5b0] sm:$0xff]  ;;  %v5996_v18 = vcombine.low %v2848_v20, %v2852_v9  ;;  %v6044_v9 = vcombine.low %v2896_v2, %v2900_v8 }
 0x500   :  { %v6002_v49 = vcombine.low %v2855_v26, %v2859_v27 }
 0x501   :  { %4459 = vmatpush1.bf16.msra.mxu0 %v5938_v40  ;;  %v6003_v40 = vcombine.high %v2855_v26, %v2859_v27  ;;  %v2912_v26 = vld [vmem:[%s9151_s7 + $0x758] sm:$0xff] }
 0x502   :  { %4545 = vmatpush1.bf16.msra.mxu1 %v5940_v44  ;;  %4460 = vmatprep.subr.bf16.mxu0 %v5947_v23  ;;  %v6005_v44 = vcombine.high %v2856_v30, %v2860_v31  ;;  %v2863_v23 = vld [vmem:[%s9151_s7 + $0x5d0] sm:$0xff]  ;;  %v2916_v27 = vld [vmem:[%s9151_s7 + $0x778] sm:$0xff]  ;;  %v6052_v31 = vcombine.low %v2904_v17, %v2908_v21 }
 0x503   :  { %4546 = vmatprep.subr.bf16.mxu1 %v5949_v19  ;;  %v2867_v19 = vld [vmem:[%s9151_s7 + $0x5f0] sm:$0xff] }
 0x505   :  { %4461 = vmatpush1.bf16.msra.mxu0 %v5946_v37  ;;  %v6011_v37 = vcombine.high %v2863_v23, %v2867_v19 }
 0x506   :  { %4547 = vmatpush1.bf16.msra.mxu1 %v5948_v62  ;;  %4473 = vmatprep.subr.bf16.mxu0 %v5955_v38  ;;  %v6013_v62 = vcombine.high %v2864_v46, %v2868_v48  ;;  %v2871_v38 = vld [vmem:[%s9151_s7 + $0x610] sm:$0xff]  ;;  %v6060_v48 = vcombine.low %v2912_v26, %v2916_v27 }
 0x507   :  { %4559 = vmatprep.subr.bf16.mxu1 %v5957_v39  ;;  %v2875_v39 = vld [vmem:[%s9151_s7 + $0x630] sm:$0xff] }
 0x508   :  { %4463 = vmatmul.mubr.bf16.vlgmr.msra.gmra.mrb[72].mxu0 %v8095_v11  ;;  %v6019_v51 = vcombine.high %v2871_v38, %v2875_v39  ;;  %v6018_v58 = vcombine.low %v2871_v38, %v2875_v39  ;;  %v2928_v38 = vld [vmem:[%s9151_s7 + $0x7d8] sm:$0xff] }
 0x509   :  { %4549 = vmatmul.mubr.bf16.vlgmr.msra.gmra.mrb[88].mxu1 %v8095_v11  ;;  %4474 = vmatpush1.bf16.msra.mxu0 %v5954_v7  ;;  %v2832_v11 = vld [vmem:[%s9151_s7 + $0x4d8] sm:$0xff]  ;;  %v6010_v7 = vcombine.low %v2863_v23, %v2867_v19 }
 0x50a   :  { %4505 = vmatprep.mubr.bf16.mxu0 %v8321_v59  ;;  %4560 = vmatpush1.bf16.msra.mxu1 %v5956_v52  ;;  %v5981_v50 = vcombine.high %v2832_v11, %v2836_v4  ;;  %v5980_v13 = vcombine.low %v2832_v11, %v2836_v4  ;;  %v6021_v52 = vcombine.high %v2872_v41, %v2876_v42  ;;  %v2920_v23 = vld [vmem:[%s9151_s7 + $0x798] sm:$0xff] }
 0x50b   :  { %4591 = vmatprep.mubr.bf16.mxu1 %v8321_v59  ;;  %4475 = vmatprep.subr.bf16.mxu0 %v5963_v53  ;;  %v5970_v59 = vcombine.low %v2823_v55, %v2827_v1  ;;  %v2879_v53 = vld [vmem:[%s9151_s7 + $0x650] sm:$0xff]  ;;  %v2880_v1 = vld [vmem:[%s9151_s7 + $0x658] sm:$0xff] }
 0x50c   :  { %4561 = vmatprep.subr.bf16.mxu1 %v5965_v57  ;;  %v2883_v55 = vld [vmem:[%s9151_s7 + $0x670] sm:$0xff]  ;;  %v2884_v57 = vld [vmem:[%s9151_s7 + $0x678] sm:$0xff] }
 0x50d   :  { %4476 = vmatpush1.bf16.msra.mxu0 %v5962_v60  ;;  %v6027_v60 = vcombine.high %v2879_v53, %v2883_v55  ;;  %v6026_v11 = vcombine.low %v2879_v53, %v2883_v55  ;;  %v6028_v4 = vcombine.low %v2880_v1, %v2884_v57  ;;  %v2924_v19 = vld [vmem:[%s9151_s7 + $0x7b8] sm:$0xff]  ;;  %v6754_v53 = vld [vmem:[%s9152_s8 + $0x4] ss:$8 sps:$4 sm:$0xff]   ;;  %v6752_v55 = vld [vmem:[%s9152_s8] ss:$8 sps:$4 sm:$0xff]  }
 0x50e   :  { %4562 = vmatpush1.bf16.msra.mxu1 %v5964_v61  ;;  %4477 = vmatprep.subr.bf16.mxu0 %v5971_v63  ;;  %v6029_v61 = vcombine.high %v2880_v1, %v2884_v57  ;;  %v2887_v63 = vld [vmem:[%s9151_s7 + $0x690] sm:$0xff]  ;;  %v2932_v39 = vld [vmem:[%s9151_s7 + $0x7f8] sm:$0xff]  ;;  %v6068_v42 = vcombine.low %v2920_v23, %v2924_v19 }
 0x50f   :  { %4563 = vmatprep.subr.bf16.mxu1 %v5973_v0  ;;  %v2891_v0 = vld [vmem:[%s9151_s7 + $0x6b0] sm:$0xff] }
 0x510   :  { %v6034_v10 = vcombine.low %v2887_v63, %v2891_v0  ;;  %v6757_v1 = vld [vmem:[%s9152_s8 + $0x14] ss:$8 sps:$4 sm:$0xff]   ;;  %v6755_v57 = vld [vmem:[%s9152_s8 + $0x10] ss:$8 sps:$4 sm:$0xff]  }
 0x511   :  { %4478 = vmatpush1.bf16.msra.mxu0 %v5970_v59  ;;  %v6035_v59 = vcombine.high %v2887_v63, %v2891_v0  ;;  %v6764_v63 = vld [vmem:[%s9152_s8 + $0x40] ss:$8 sps:$4 sm:$0xff]   ;;  %v6769_v0 = vld [vmem:[%s9152_s8 + $0x54] ss:$8 sps:$4 sm:$0xff]  }
 0x512   :  { %4564 = vmatpush1.bf16.msra.mxu1 %v5972_v6  ;;  %4479 = vmatprep.subr.bf16.mxu0 %v5979_v5  ;;  %v6037_v6 = vcombine.high %v2888_v16, %v2892_v28  ;;  %v2895_v5 = vld [vmem:[%s9151_s7 + $0x6d0] sm:$0xff]  ;;  %v6772_v28 = vld [vmem:[%s9152_s8 + $0x64] ss:$8 sps:$4 sm:$0xff]  }
 0x513   :  { %4565 = vmatprep.subr.bf16.mxu1 %v5981_v50  ;;  %v2899_v50 = vld [vmem:[%s9151_s7 + $0x6f0] sm:$0xff] }
 0x514   :  { %v6042_v20 = vcombine.low %v2895_v5, %v2899_v50  ;;  %v6767_v16 = vld [vmem:[%s9152_s8 + $0x50] ss:$8 sps:$4 sm:$0xff]  }
 0x515   :  { %4480 = vmatpush1.bf16.msra.mxu0 %v5978_v29  ;;  %v6043_v29 = vcombine.high %v2895_v5, %v2899_v50  ;;  %v6776_v5 = vld [vmem:[%s9152_s8 + $0x80] ss:$8 sps:$4 sm:$0xff]   ;;  %v6781_v50 = vld [vmem:[%s9152_s8 + $0x94] ss:$8 sps:$4 sm:$0xff]  }
 0x516   :  { %4566 = vmatpush1.bf16.msra.mxu1 %v5980_v13  ;;  %4481 = vmatprep.subr.bf16.mxu0 %v5987_v14  ;;  %v6045_v13 = vcombine.high %v2896_v2, %v2900_v8  ;;  %v2903_v14 = vld [vmem:[%s9151_s7 + $0x710] sm:$0xff]  ;;  %v6784_v8 = vld [vmem:[%s9152_s8 + $0xa4] ss:$8 sps:$4 sm:$0xff]  }
 0x517   :  { %4567 = vmatprep.subr.bf16.mxu1 %v5989_v15  ;;  %v2907_v15 = vld [vmem:[%s9151_s7 + $0x730] sm:$0xff] }
 0x518   :  { %v6050_v30 = vcombine.low %v2903_v14, %v2907_v15  ;;  %v6779_v2 = vld [vmem:[%s9152_s8 + $0x90] ss:$8 sps:$4 sm:$0xff]  }
 0x519   :  { %4482 = vmatpush1.bf16.msra.mxu0 %v5986_v22  ;;  %v6051_v22 = vcombine.high %v2903_v14, %v2907_v15  ;;  %v6788_v14 = vld [vmem:[%s9152_s8 + $0xc0] ss:$8 sps:$4 sm:$0xff]   ;;  %v6793_v15 = vld [vmem:[%s9152_s8 + $0xd4] ss:$8 sps:$4 sm:$0xff]  }
 0x51a   :  { %4568 = vmatpush1.bf16.msra.mxu1 %v5988_v32  ;;  %4483 = vmatprep.subr.bf16.mxu0 %v5995_v33  ;;  %v6053_v32 = vcombine.high %v2904_v17, %v2908_v21  ;;  %v2911_v33 = vld [vmem:[%s9151_s7 + $0x750] sm:$0xff]  ;;  %v6796_v21 = vld [vmem:[%s9152_s8 + $0xe4] ss:$8 sps:$4 sm:$0xff]  }
 0x51b   :  { %4569 = vmatprep.subr.bf16.mxu1 %v5997_v34  ;;  %v2915_v34 = vld [vmem:[%s9151_s7 + $0x770] sm:$0xff] }
 0x51c   :  { %v6058_v46 = vcombine.low %v2911_v33, %v2915_v34  ;;  %v6791_v17 = vld [vmem:[%s9152_s8 + $0xd0] ss:$8 sps:$4 sm:$0xff]  }
 0x51d   :  { %4484 = vmatpush1.bf16.msra.mxu0 %v5994_v36  ;;  %v6059_v36 = vcombine.high %v2911_v33, %v2915_v34  ;;  %v5820_v33 = vld [vmem:[%s9146_s9 + $0x5] ss:$8 sm:$0xf] }
 0x51e   :  { %4570 = vmatpush1.bf16.msra.mxu1 %v5996_v18  ;;  %4485 = vmatprep.subr.bf16.mxu0 %v6003_v40  ;;  %v6061_v18 = vcombine.high %v2912_v26, %v2916_v27  ;;  %v2919_v40 = vld [vmem:[%s9151_s7 + $0x790] sm:$0xff] }
 0x51f   :  { %4571 = vmatprep.subr.bf16.mxu1 %v6005_v44  ;;  %v2923_v44 = vld [vmem:[%s9151_s7 + $0x7b0] sm:$0xff] }
 0x520   :  { %v6066_v41 = vcombine.low %v2919_v40, %v2923_v44  ;;  %v5821_v34 = vld [vmem:[%s9146_s9 + $0x5] ss:$8 sm:$0xf0] }
 0x521   :  { %4486 = vmatpush1.bf16.msra.mxu0 %v6002_v49  ;;  %v6067_v49 = vcombine.high %v2919_v40, %v2923_v44  ;;  %v8800_v26 = vor.u32 %v5821_v34, %v5820_v33  ;;  %v6827_v33 = vld [vmem:[%s9152_s8 + $0x190] ss:$8 sps:$4 sm:$0xff]   ;;  %v6832_v34 = vld [vmem:[%s9152_s8 + $0x1a4] ss:$8 sps:$4 sm:$0xff]  }
 0x522   :  { %4572 = vmatpush1.bf16.msra.mxu1 %v6004_v47  ;;  %4487 = vmatprep.subr.bf16.mxu0 %v6011_v37  ;;  %v6069_v47 = vcombine.high %v2920_v23, %v2924_v19  ;;  %v2927_v37 = vld [vmem:[%s9151_s7 + $0x7d0] sm:$0xff] }
 0x523   :  { %4573 = vmatprep.subr.bf16.mxu1 %v6013_v62  ;;  %v2931_v62 = vld [vmem:[%s9151_s7 + $0x7f0] sm:$0xff]  ;;  %v2941_v27 = vrot.slane %v8800_v26, %v7809_v3 }
 0x525   :  { %4488 = vmatpush1.bf16.msra.mxu0 %v6010_v7  ;;  %v6075_v7 = vcombine.high %v2927_v37, %v2931_v62 }
 0x526   :  { %4574 = vmatpush1.bf16.msra.mxu1 %v6012_v45  ;;  %4489 = vmatprep.subr.bf16.mxu0 %v6019_v51  ;;  %v6077_v45 = vcombine.high %v2928_v38, %v2932_v39  ;;  %v6074_v51 = vcombine.low %v2927_v37, %v2931_v62 }
 0x527   :  { %4575 = vmatprep.subr.bf16.mxu1 %v6021_v52  ;;  %v6076_v52 = vcombine.low %v2928_v38, %v2932_v39 }
 0x529   :  { %4490 = vmatpush1.bf16.msra.mxu0 %v6018_v58  ;;  %v6760_v58 = vld [vmem:[%s9152_s8 + $0x24] ss:$8 sps:$4 sm:$0xff]  }
 0x52a   :  { %4576 = vmatpush1.bf16.msra.mxu1 %v6020_v24  ;;  %4491 = vmatprep.subr.bf16.mxu0 %v6027_v60  ;;  %v6758_v24 = vld [vmem:[%s9152_s8 + $0x20] ss:$8 sps:$4 sm:$0xff]   ;;  %v6761_v60 = vld [vmem:[%s9152_s8 + $0x30] ss:$8 sps:$4 sm:$0xff]  }
 0x52b   :  { %4577 = vmatprep.subr.bf16.mxu1 %v6029_v61  ;;  %v6766_v61 = vld [vmem:[%s9152_s8 + $0x44] ss:$8 sps:$4 sm:$0xff]  }
 0x52d   :  { %4492 = vmatpush1.bf16.msra.mxu0 %v6026_v11  ;;  %v6770_v11 = vld [vmem:[%s9152_s8 + $0x60] ss:$8 sps:$4 sm:$0xff]  }
 0x52e   :  { %4578 = vmatpush1.bf16.msra.mxu1 %v6028_v4  ;;  %4493 = vmatprep.subr.bf16.mxu0 %v6035_v59  ;;  %v6775_v4 = vld [vmem:[%s9152_s8 + $0x74] ss:$8 sps:$4 sm:$0xff]   ;;  %v6773_v59 = vld [vmem:[%s9152_s8 + $0x70] ss:$8 sps:$4 sm:$0xff]  }
 0x52f   :  { %4579 = vmatprep.subr.bf16.mxu1 %v6037_v6  ;;  %v6778_v6 = vld [vmem:[%s9152_s8 + $0x84] ss:$8 sps:$4 sm:$0xff]  }
 0x531   :  { %4494 = vmatpush1.bf16.msra.mxu0 %v6034_v10  ;;  %v6782_v10 = vld [vmem:[%s9152_s8 + $0xa0] ss:$8 sps:$4 sm:$0xff]  }
 0x532   :  { %4580 = vmatpush1.bf16.msra.mxu1 %v6036_v12  ;;  %4495 = vmatprep.subr.bf16.mxu0 %v6043_v29  ;;  %v6787_v12 = vld [vmem:[%s9152_s8 + $0xb4] ss:$8 sps:$4 sm:$0xff]   ;;  %v6785_v29 = vld [vmem:[%s9152_s8 + $0xb0] ss:$8 sps:$4 sm:$0xff]  }
 0x533   :  { %4581 = vmatprep.subr.bf16.mxu1 %v6045_v13  ;;  %v6790_v13 = vld [vmem:[%s9152_s8 + $0xc4] ss:$8 sps:$4 sm:$0xff]  }
 0x535   :  { %4496 = vmatpush1.bf16.msra.mxu0 %v6042_v20  ;;  %v6794_v20 = vld [vmem:[%s9152_s8 + $0xe0] ss:$8 sps:$4 sm:$0xff]  }
 0x536   :  { %4582 = vmatpush1.bf16.msra.mxu1 %v6044_v9  ;;  %4497 = vmatprep.subr.bf16.mxu0 %v6051_v22  ;;  %v6799_v9 = vld [vmem:[%s9152_s8 + $0xf4] ss:$8 sps:$4 sm:$0xff]   ;;  %v6797_v22 = vld [vmem:[%s9152_s8 + $0xf0] ss:$8 sps:$4 sm:$0xff]  }
 0x537   :  { %4583 = vmatprep.subr.bf16.mxu1 %v6053_v32  ;;  %v6802_v32 = vld [vmem:[%s9152_s8 + $0x104] ss:$8 sps:$4 sm:$0xff]  }
 0x539   :  { %4498 = vmatpush1.bf16.msra.mxu0 %v6050_v30  ;;  %v2949_v30 = vrot.slane %v8800_v26, %v8182_v25 }
 0x53a   :  { %4584 = vmatpush1.bf16.msra.mxu1 %v6052_v31  ;;  %4499 = vmatprep.subr.bf16.mxu0 %v6059_v36  ;;  %v2945_v31 = vrot.slane %v8800_v26, %v7812_v56  ;;  %v2953_v36 = vrot.slane %v8800_v26, %v8188_v54 }
 0x53b   :  { %4585 = vmatprep.subr.bf16.mxu1 %v6061_v18 }
 0x53d   :  { %4500 = vmatpush1.bf16.msra.mxu0 %v6058_v46 }
 0x53e   :  { %4586 = vmatpush1.bf16.msra.mxu1 %v6060_v48  ;;  %4501 = vmatprep.subr.bf16.mxu0 %v6067_v49 }
 0x53f   :  { %4587 = vmatprep.subr.bf16.mxu1 %v6069_v47 }
 0x541   :  { %4502 = vmatpush1.bf16.msra.mxu0 %v6066_v41 }
 0x542   :  { %4588 = vmatpush1.bf16.msra.mxu1 %v6068_v42  ;;  %4503 = vmatprep.subr.bf16.mxu0 %v6075_v7 }
 0x543   :  { %4589 = vmatprep.subr.bf16.mxu1 %v6077_v45 }
 0x545   :  { %4504 = vmatpush1.bf16.msra.mxu0 %v6074_v51 }
 0x546   :  { %4590 = vmatpush1.bf16.msra.mxu1 %v6076_v52  ;;  %5439 = vmatprep.subr.bf16.mxu0 %v6754_v53 }
 0x548   :  { %4506 = vmatmul.mubr.bf16.vlgmr.msra.gmra.mrb[72].mxu0 %v8310_v35 }
 0x549   :  { %4592 = vmatmul.mubr.bf16.vlgmr.msra.gmra.mrb[88].mxu1 %v8310_v35  ;;  %5440 = vmatpush1.bf16.msra.mxu0 %v6752_v55  ;;  %v6763_v35 = vld [vmem:[%s9152_s8 + $0x34] ss:$8 sps:$4 sm:$0xff]  }
 0x54a   :  { %5441 = vmatprep.subr.bf16.mxu0 %v6757_v1 }
 0x54d   :  { %5442 = vmatpush1.bf16.msra.mxu0 %v6755_v57 }
 0x54e   :  { %5443 = vmatprep.subr.bf16.mxu0 %v6760_v58 }
 0x551   :  { %5444 = vmatpush1.bf16.msra.mxu0 %v6758_v24 }
 0x552   :  { %5445 = vmatprep.subr.bf16.mxu0 %v6763_v35 }
 0x555   :  { %5446 = vmatpush1.bf16.msra.mxu0 %v6761_v60 }
 0x556   :  { %5447 = vmatprep.subr.bf16.mxu0 %v6766_v61 }
 0x559   :  { %5448 = vmatpush1.bf16.msra.mxu0 %v6764_v63 }
 0x55a   :  { %5449 = vmatprep.subr.bf16.mxu0 %v6769_v0 }
 0x55d   :  { %5450 = vmatpush1.bf16.msra.mxu0 %v6767_v16 }
 0x55e   :  { %5451 = vmatprep.subr.bf16.mxu0 %v6772_v28 }
 0x561   :  { %5452 = vmatpush1.bf16.msra.mxu0 %v6770_v11 }
 0x562   :  { %5453 = vmatprep.subr.bf16.mxu0 %v6775_v4  ;;  %v6800_v4 = vld [vmem:[%s9152_s8 + $0x100] ss:$8 sps:$4 sm:$0xff]  }
 0x565   :  { %5454 = vmatpush1.bf16.msra.mxu0 %v6773_v59 }
 0x566   :  { %5455 = vmatprep.subr.bf16.mxu0 %v6778_v6  ;;  %v6805_v6 = vld [vmem:[%s9152_s8 + $0x114] ss:$8 sps:$4 sm:$0xff]  }
 0x569   :  { %5456 = vmatpush1.bf16.msra.mxu0 %v6776_v5  ;;  %v6803_v5 = vld [vmem:[%s9152_s8 + $0x110] ss:$8 sps:$4 sm:$0xff]  }
 0x56a   :  { %5457 = vmatprep.subr.bf16.mxu0 %v6781_v50  ;;  %v6808_v50 = vld [vmem:[%s9152_s8 + $0x124] ss:$8 sps:$4 sm:$0xff]  }
 0x56d   :  { %5458 = vmatpush1.bf16.msra.mxu0 %v6779_v2  ;;  %v6806_v2 = vld [vmem:[%s9152_s8 + $0x120] ss:$8 sps:$4 sm:$0xff]  }
 0x56e   :  { %5459 = vmatprep.subr.bf16.mxu0 %v6784_v8  ;;  %v6811_v8 = vld [vmem:[%s9152_s8 + $0x134] ss:$8 sps:$4 sm:$0xff]  }
 0x571   :  { %5460 = vmatpush1.bf16.msra.mxu0 %v6782_v10  ;;  %v6809_v10 = vld [vmem:[%s9152_s8 + $0x130] ss:$8 sps:$4 sm:$0xff]  }
 0x572   :  { %5461 = vmatprep.subr.bf16.mxu0 %v6787_v12  ;;  %v6814_v12 = vld [vmem:[%s9152_s8 + $0x144] ss:$8 sps:$4 sm:$0xff]  }
 0x575   :  { %5462 = vmatpush1.bf16.msra.mxu0 %v6785_v29  ;;  %v6812_v29 = vld [vmem:[%s9152_s8 + $0x140] ss:$8 sps:$4 sm:$0xff]  }
 0x576   :  { %5463 = vmatprep.subr.bf16.mxu0 %v6790_v13  ;;  %v6817_v13 = vld [vmem:[%s9152_s8 + $0x154] ss:$8 sps:$4 sm:$0xff]  }
 0x579   :  { %5464 = vmatpush1.bf16.msra.mxu0 %v6788_v14  ;;  %v6815_v14 = vld [vmem:[%s9152_s8 + $0x150] ss:$8 sps:$4 sm:$0xff]  }
 0x57a   :  { %5465 = vmatprep.subr.bf16.mxu0 %v6793_v15  ;;  %v6820_v15 = vld [vmem:[%s9152_s8 + $0x164] ss:$8 sps:$4 sm:$0xff]  }
 0x57d   :  { %5466 = vmatpush1.bf16.msra.mxu0 %v6791_v17  ;;  %v6818_v17 = vld [vmem:[%s9152_s8 + $0x160] ss:$8 sps:$4 sm:$0xff]  }
 0x57e   :  { %5467 = vmatprep.subr.bf16.mxu0 %v6796_v21  ;;  %v6823_v21 = vld [vmem:[%s9152_s8 + $0x174] ss:$8 sps:$4 sm:$0xff]  }
 0x581   :  { %5468 = vmatpush1.bf16.msra.mxu0 %v6794_v20  ;;  %v6821_v20 = vld [vmem:[%s9152_s8 + $0x170] ss:$8 sps:$4 sm:$0xff]  }
 0x582   :  { %5469 = vmatprep.subr.bf16.mxu0 %v6799_v9  ;;  %v6826_v9 = vld [vmem:[%s9152_s8 + $0x184] ss:$8 sps:$4 sm:$0xff]  }
 0x585   :  { %5470 = vmatpush1.bf16.msra.mxu0 %v6797_v22  ;;  %v6824_v22 = vld [vmem:[%s9152_s8 + $0x180] ss:$8 sps:$4 sm:$0xff]  }
 0x586   :  { %5482 = vmatprep.subr.bf16.mxu0 %v6802_v32  ;;  %v6829_v32 = vld [vmem:[%s9152_s8 + $0x194] ss:$8 sps:$4 sm:$0xff]  }
 0x59b   :  { %v4335_v18 = vpop.f32.mrb[68].mxu0  ;;  %v4421_v40 = vpop.f32.mrb[84].mxu1 }
 0x59c   :  { %v6456_v44 = vadd.f32 %v4335_v18, %v2941_v27  ;;  %v6460_v23 = vadd.f32 %v4421_v40, %v2949_v30  ;;  %v4337_v19 = vpop.f32.mrb[69].mxu0  ;;  %v4423_v46 = vpop.f32.mrb[85].mxu1  ;;  %v6836_v18 = vld [vmem:[%s9152_s8 + $0x1c0] ss:$8 sps:$4 sm:$0xff]   ;;  %v6841_v40 = vld [vmem:[%s9152_s8 + $0x1d4] ss:$8 sps:$4 sm:$0xff]  }
 0x59d   :  { %v6457_v48 = vadd.f32 %v4337_v19, %v2945_v31  ;;  %v6461_v49 = vadd.f32 %v4423_v46, %v2953_v36  ;;  %v4339_v47 = vpop.f32.mrb[70].mxu0  ;;  %v4425_v37 = vpop.f32.mrb[86].mxu1  ;;  %v6842_v19 = vld [vmem:[%s9152_s8 + $0x1e0] ss:$8 sps:$4 sm:$0xff]   ;;  %v6847_v46 = vld [vmem:[%s9152_s8 + $0x1f4] ss:$8 sps:$4 sm:$0xff]  }
 0x59e   :  { %vm4602_vm15 = vcmp.gt.f32.partialorder %v6456_v44, 0.0  ;;  %v4618_v62 = vmul.f32 0.01, %v6456_v44  ;;  %vm4604_vm0 = vcmp.gt.f32.partialorder %v6460_v23, 0.0  ;;  %v4620_v25 = vmul.f32 0.01, %v6460_v23 }
 0x59f   :  { %vm4603_vm1 = vcmp.gt.f32.partialorder %v6457_v48, 0.0  ;;  %v4619_v38 = vmul.f32 0.01, %v6457_v48  ;;  %vm4605_vm2 = vcmp.gt.f32.partialorder %v6461_v49, 0.0  ;;  %v4621_v39 = vmul.f32 0.01, %v6461_v49 }
 0x5a0   :  { %v6458_v41 = vadd.f32 %v4339_v47, %v2941_v27  ;;  %v6462_v54 = vadd.f32 %v4425_v37, %v2949_v30  ;;  %v4341_v42 = vpop.f32.mrb[71].mxu0  ;;  %v4427_v7 = vpop.f32.mrb[87].mxu1  ;;  %v4634_v45 = vsel %vm4602_vm15, %v6456_v44, %v4618_v62  ;;  %v8810_v51 = vsel %vm4604_vm0, %v6460_v23, %v4620_v25  ;;  %v6830_v27 = vld [vmem:[%s9152_s8 + $0x1a0] ss:$8 sps:$4 sm:$0xff]   ;;  %v6835_v30 = vld [vmem:[%s9152_s8 + $0x1b4] ss:$8 sps:$4 sm:$0xff]  }
 0x5a1   :  { %v6459_v52 = vadd.f32 %v4341_v42, %v2945_v31  ;;  %v6463_v53 = vadd.f32 %v4427_v7, %v2953_v36  ;;  %v4635_v60 = vsel %vm4603_vm1, %v6457_v48, %v4619_v38  ;;  %v4637_v61 = vsel %vm4605_vm2, %v6461_v49, %v4621_v39  ;;  %v6833_v31 = vld [vmem:[%s9152_s8 + $0x1b0] ss:$8 sps:$4 sm:$0xff]   ;;  %v6838_v36 = vld [vmem:[%s9152_s8 + $0x1c4] ss:$8 sps:$4 sm:$0xff]   ;;  %v6848_v47 = vld [vmem:[%s9152_s8 + $0x200] ss:$8 sps:$4 sm:$0xff]  }
 0x5a2   :  { %vm4610_vm3 = vcmp.gt.f32.partialorder %v6458_v41, 0.0  ;;  %v4626_v55 = vmul.f32 0.01, %v6458_v41  ;;  %vm4612_vm4 = vcmp.gt.f32.partialorder %v6462_v54, 0.0  ;;  %v4628_v1 = vmul.f32 0.01, %v6462_v54 }
 0x5a3   :  { %vm4611_vm5 = vcmp.gt.f32.partialorder %v6459_v52, 0.0  ;;  %v4627_v57 = vmul.f32 0.01, %v6459_v52  ;;  %vm4613_vm6 = vcmp.gt.f32.partialorder %v6463_v53, 0.0  ;;  %v4629_v58 = vmul.f32 0.01, %v6463_v53 }
 0x5a4   :  { %v4642_v24 = vsel %vm4610_vm3, %v6458_v41, %v4626_v55  ;;  %v8812_v35 = vsel %vm4612_vm4, %v6462_v54, %v4628_v1  ;;  %v6839_v44 = vld [vmem:[%s9152_s8 + $0x1d0] ss:$8 sps:$4 sm:$0xff]   ;;  %v6844_v23 = vld [vmem:[%s9152_s8 + $0x1e4] ss:$8 sps:$4 sm:$0xff]   ;;  %v6853_v37 = vld [vmem:[%s9152_s8 + $0x214] ss:$8 sps:$4 sm:$0xff]  }
 0x5a5   :  { %v4650_v63 = vpack.c.bf16 %v4642_v24, %v4634_v45  ;;  %v4652_v0 = vpack.c.bf16 %v8812_v35, %v8810_v51  ;;  %v4643_v16 = vsel %vm4611_vm5, %v6459_v52, %v4627_v57  ;;  %v4645_v28 = vsel %vm4613_vm6, %v6463_v53, %v4629_v58  ;;  %v6845_v48 = vld [vmem:[%s9152_s8 + $0x1f0] ss:$8 sps:$4 sm:$0xff]   ;;  %v6850_v49 = vld [vmem:[%s9152_s8 + $0x204] ss:$8 sps:$4 sm:$0xff]   ;;  %v6854_v38 = vld [vmem:[%s9152_s8 + $0x220] ss:$8 sps:$4 sm:$0xff]  }
 0x5a6   :  { %v4651_v11 = vpack.c.bf16 %v4643_v16, %v4635_v60  ;;  %v4653_v59 = vpack.c.bf16 %v4645_v28, %v4637_v61  ;;  %v6851_v62 = vld [vmem:[%s9152_s8 + $0x210] ss:$8 sps:$4 sm:$0xff]   ;;  %v6856_v25 = vld [vmem:[%s9152_s8 + $0x224] ss:$8 sps:$4 sm:$0xff]   ;;  %v6859_v39 = vld [vmem:[%s9152_s8 + $0x234] ss:$8 sps:$4 sm:$0xff]  }
 0x5a7   :  { %v6857_v41 = vld [vmem:[%s9152_s8 + $0x230] ss:$8 sps:$4 sm:$0xff]   ;;  %v6862_v54 = vld [vmem:[%s9152_s8 + $0x244] ss:$8 sps:$4 sm:$0xff]   ;;  %v6860_v42 = vld [vmem:[%s9152_s8 + $0x240] ss:$8 sps:$4 sm:$0xff]  }
 0x5a8   :  { %5471 = vmatprep.mubr.bf16.mxu0 %v4651_v11  ;;  %v6865_v7 = vld [vmem:[%s9152_s8 + $0x254] ss:$8 sps:$4 sm:$0xff]   ;;  %v6863_v45 = vld [vmem:[%s9152_s8 + $0x250] ss:$8 sps:$4 sm:$0xff]   ;;  %v6868_v51 = vld [vmem:[%s9152_s8 + $0x264] ss:$8 sps:$4 sm:$0xff]  }
 0x5a9   :  { %5472 = vmatmul.mubr.bf16.vlgmr.msra.gmra.mrb[76].mxu0 %v4650_v63  ;;  %v6866_v52 = vld [vmem:[%s9152_s8 + $0x260] ss:$8 sps:$4 sm:$0xff]   ;;  %v6871_v53 = vld [vmem:[%s9152_s8 + $0x274] ss:$8 sps:$4 sm:$0xff]   ;;  %v6869_v55 = vld [vmem:[%s9152_s8 + $0x270] ss:$8 sps:$4 sm:$0xff]  }
 0x5aa   :  { %5483 = vmatpush1.bf16.msra.mxu0 %v6800_v4  ;;  %5514 = vmatprep.mubr.bf16.mxu0 %v4653_v59  ;;  %v6874_v1 = vld [vmem:[%s9152_s8 + $0x284] ss:$8 sps:$4 sm:$0xff]   ;;  %v6872_v57 = vld [vmem:[%s9152_s8 + $0x280] ss:$8 sps:$4 sm:$0xff]   ;;  %v6877_v58 = vld [vmem:[%s9152_s8 + $0x294] ss:$8 sps:$4 sm:$0xff]  }
 0x5ab   :  { %5484 = vmatprep.subr.bf16.mxu0 %v6805_v6  ;;  %v6875_v24 = vld [vmem:[%s9152_s8 + $0x290] ss:$8 sps:$4 sm:$0xff]   ;;  %v6880_v35 = vld [vmem:[%s9152_s8 + $0x2a4] ss:$8 sps:$4 sm:$0xff]   ;;  %v6878_v60 = vld [vmem:[%s9152_s8 + $0x2a0] ss:$8 sps:$4 sm:$0xff]  }
 0x5ac   :  { %v6883_v61 = vld [vmem:[%s9152_s8 + $0x2b4] ss:$8 sps:$4 sm:$0xff]   ;;  %v6881_v63 = vld [vmem:[%s9152_s8 + $0x2b0] ss:$8 sps:$4 sm:$0xff]   ;;  %v2956_v16 = vsub.s32 4, %v7803_v43  ;;  %v2964_v28 = vsub.s32 6, %v7803_v43 }
 0x5ad   :  { %v2960_v11 = vsub.s32 5, %v7803_v43  ;;  %v6884_v4 = vld [vmem:[%s9152_s8 + $0x2c0] ss:$8 sps:$4 sm:$0xff]   ;;  %v2968_v59 = vsub.s32 7, %v7803_v43  ;;  %v6889_v6 = vld [vmem:[%s9152_s8 + $0x2d4] ss:$8 sps:$4 sm:$0xff]  }
 0x5ae   :  { %5485 = vmatpush1.bf16.msra.mxu0 %v6803_v5  ;;  %v2957_v5 = vrot.slane %v8800_v26, %v2956_v16  ;;  %v6911_v16 = vld [vmem:[%s9152_s8 + $0x350] ss:$8 sps:$4 sm:$0xff]  }
 0x5af   :  { %5486 = vmatprep.subr.bf16.mxu0 %v6808_v50  ;;  %v2965_v50 = vrot.slane %v8800_v26, %v2964_v28  ;;  %v6916_v28 = vld [vmem:[%s9152_s8 + $0x364] ss:$8 sps:$4 sm:$0xff]  }
 0x5b2   :  { %5487 = vmatpush1.bf16.msra.mxu0 %v6806_v2  ;;  %v2961_v2 = vrot.slane %v8800_v26, %v2960_v11  ;;  %v6914_v11 = vld [vmem:[%s9152_s8 + $0x360] ss:$8 sps:$4 sm:$0xff]  }
 0x5b3   :  { %5488 = vmatprep.subr.bf16.mxu0 %v6811_v8  ;;  %v6887_v8 = vld [vmem:[%s9152_s8 + $0x2d0] ss:$8 sps:$4 sm:$0xff]  }
 0x5b6   :  { %5489 = vmatpush1.bf16.msra.mxu0 %v6809_v10  ;;  %v2969_v10 = vrot.slane %v8800_v26, %v2968_v59  ;;  %v6890_v26 = vld [vmem:[%s9152_s8 + $0x2e0] ss:$8 sps:$4 sm:$0xff]   ;;  %v6917_v59 = vld [vmem:[%s9152_s8 + $0x370] ss:$8 sps:$4 sm:$0xff]  }
 0x5b7   :  { %5490 = vmatprep.subr.bf16.mxu0 %v6814_v12  ;;  %v6892_v12 = vld [vmem:[%s9152_s8 + $0x2e4] ss:$8 sps:$4 sm:$0xff]  }
 0x5ba   :  { %5491 = vmatpush1.bf16.msra.mxu0 %v6812_v29 }
 0x5bb   :  { %5492 = vmatprep.subr.bf16.mxu0 %v6817_v13 }
 0x5be   :  { %5493 = vmatpush1.bf16.msra.mxu0 %v6815_v14 }
 0x5bf   :  { %5494 = vmatprep.subr.bf16.mxu0 %v6820_v15 }
 0x5c2   :  { %5495 = vmatpush1.bf16.msra.mxu0 %v6818_v17 }
 0x5c3   :  { %5496 = vmatprep.subr.bf16.mxu0 %v6823_v21 }
 0x5c6   :  { %5497 = vmatpush1.bf16.msra.mxu0 %v6821_v20 }
 0x5c7   :  { %5498 = vmatprep.subr.bf16.mxu0 %v6826_v9 }
 0x5ca   :  { %5499 = vmatpush1.bf16.msra.mxu0 %v6824_v22 }
 0x5cb   :  { %5500 = vmatprep.subr.bf16.mxu0 %v6829_v32 }
 0x5ce   :  { %5501 = vmatpush1.bf16.msra.mxu0 %v6827_v33 }
 0x5cf   :  { %5502 = vmatprep.subr.bf16.mxu0 %v6832_v34 }
 0x5d2   :  { %5503 = vmatpush1.bf16.msra.mxu0 %v6830_v27  ;;  %v6895_v27 = vld [vmem:[%s9152_s8 + $0x2f4] ss:$8 sps:$4 sm:$0xff]  }
 0x5d3   :  { %5504 = vmatprep.subr.bf16.mxu0 %v6835_v30 }
 0x5d6   :  { %5505 = vmatpush1.bf16.msra.mxu0 %v6833_v31 }
 0x5d7   :  { %5506 = vmatprep.subr.bf16.mxu0 %v6838_v36 }
 0x5da   :  { %5507 = vmatpush1.bf16.msra.mxu0 %v6836_v18 }
 0x5db   :  { %5508 = vmatprep.subr.bf16.mxu0 %v6841_v40 }
 0x5de   :  { %5509 = vmatpush1.bf16.msra.mxu0 %v6839_v44 }
 0x5df   :  { %5510 = vmatprep.subr.bf16.mxu0 %v6844_v23 }
 0x5e2   :  { %5511 = vmatpush1.bf16.msra.mxu0 %v6842_v19 }
 0x5e3   :  { %5512 = vmatprep.subr.bf16.mxu0 %v6847_v46 }
 0x5e6   :  { %5513 = vmatpush1.bf16.msra.mxu0 %v6845_v48  ;;  %v6893_v48 = vld [vmem:[%s9152_s8 + $0x2f0] ss:$8 sps:$4 sm:$0xff]  }
 0x5e7   :  { %5525 = vmatprep.subr.bf16.mxu0 %v6850_v49 }
 0x5e9   :  { %5515 = vmatmul.mubr.bf16.vlgmr.msra.gmra.mrb[76].mxu0 %v4652_v0  ;;  %v6886_v0 = vld [vmem:[%s9152_s8 + $0x2c4] ss:$8 sps:$4 sm:$0xff]  }
 0x5ea   :  { %5526 = vmatpush1.bf16.msra.mxu0 %v6848_v47 }
 0x5eb   :  { %5527 = vmatprep.subr.bf16.mxu0 %v6853_v37  ;;  %v6898_v37 = vld [vmem:[%s9152_s8 + $0x304] ss:$8 sps:$4 sm:$0xff]  }
 0x5ee   :  { %5528 = vmatpush1.bf16.msra.mxu0 %v6851_v62 }
 0x5ef   :  { %5529 = vmatprep.subr.bf16.mxu0 %v6856_v25 }
 0x5f2   :  { %5530 = vmatpush1.bf16.msra.mxu0 %v6854_v38 }
 0x5f3   :  { %5531 = vmatprep.subr.bf16.mxu0 %v6859_v39 }
 0x5f6   :  { %5532 = vmatpush1.bf16.msra.mxu0 %v6857_v41 }
 0x5f7   :  { %5533 = vmatprep.subr.bf16.mxu0 %v6862_v54 }
 0x5fa   :  { %5534 = vmatpush1.bf16.msra.mxu0 %v6860_v42 }
 0x5fb   :  { %5535 = vmatprep.subr.bf16.mxu0 %v6865_v7 }
 0x5fe   :  { %5536 = vmatpush1.bf16.msra.mxu0 %v6863_v45 }
 0x5ff   :  { %5537 = vmatprep.subr.bf16.mxu0 %v6868_v51 }
 0x602   :  { %5538 = vmatpush1.bf16.msra.mxu0 %v6866_v52 }
 0x603   :  { %5539 = vmatprep.subr.bf16.mxu0 %v6871_v53  ;;  %v6896_v53 = vld [vmem:[%s9152_s8 + $0x300] ss:$8 sps:$4 sm:$0xff]  }
 0x606   :  { %5540 = vmatpush1.bf16.msra.mxu0 %v6869_v55 }
 0x607   :  { %5541 = vmatprep.subr.bf16.mxu0 %v6874_v1  ;;  %v6901_v1 = vld [vmem:[%s9152_s8 + $0x314] ss:$8 sps:$4 sm:$0xff]  }
 0x60a   :  { %5542 = vmatpush1.bf16.msra.mxu0 %v6872_v57  ;;  %v6899_v57 = vld [vmem:[%s9152_s8 + $0x310] ss:$8 sps:$4 sm:$0xff]  }
 0x60b   :  { %5543 = vmatprep.subr.bf16.mxu0 %v6877_v58  ;;  %v6904_v58 = vld [vmem:[%s9152_s8 + $0x324] ss:$8 sps:$4 sm:$0xff]  }
 0x60e   :  { %5544 = vmatpush1.bf16.msra.mxu0 %v6875_v24  ;;  %v6902_v24 = vld [vmem:[%s9152_s8 + $0x320] ss:$8 sps:$4 sm:$0xff]  }
 0x60f   :  { %5545 = vmatprep.subr.bf16.mxu0 %v6880_v35  ;;  %v6907_v35 = vld [vmem:[%s9152_s8 + $0x334] ss:$8 sps:$4 sm:$0xff]  }
 0x612   :  { %5546 = vmatpush1.bf16.msra.mxu0 %v6878_v60  ;;  %v6905_v60 = vld [vmem:[%s9152_s8 + $0x330] ss:$8 sps:$4 sm:$0xff]  }
 0x613   :  { %5547 = vmatprep.subr.bf16.mxu0 %v6883_v61  ;;  %v6910_v61 = vld [vmem:[%s9152_s8 + $0x344] ss:$8 sps:$4 sm:$0xff]  }
 0x616   :  { %5548 = vmatpush1.bf16.msra.mxu0 %v6881_v63  ;;  %v6908_v63 = vld [vmem:[%s9152_s8 + $0x340] ss:$8 sps:$4 sm:$0xff]  }
 0x617   :  { %5549 = vmatprep.subr.bf16.mxu0 %v6886_v0  ;;  %v6913_v0 = vld [vmem:[%s9152_s8 + $0x354] ss:$8 sps:$4 sm:$0xff]  }
 0x61a   :  { %5550 = vmatpush1.bf16.msra.mxu0 %v6884_v4  ;;  %v6919_v4 = vld [vmem:[%s9152_s8 + $0x374] ss:$8 sps:$4 sm:$0xff]  }
 0x61b   :  { %5551 = vmatprep.subr.bf16.mxu0 %v6889_v6  ;;  %v4507_v43 = vpop.f32.mrb[72].mxu0  ;;  %v6922_v6 = vld [vmem:[%s9152_s8 + $0x384] ss:$8 sps:$4 sm:$0xff]  }
 0x61c   :  { %v6464_v29 = vadd.f32 %v4507_v43, %v2957_v5  ;;  %v4593_v13 = vpop.f32.mrb[88].mxu1  ;;  %v4509_v14 = vpop.f32.mrb[73].mxu0  ;;  %v6931_v43 = vld [vmem:[%s9152_s8 + $0x3b4] ss:$8 sps:$4 sm:$0xff]  }
 0x61d   :  { %v6468_v15 = vadd.f32 %v4593_v13, %v2965_v50  ;;  %v6465_v17 = vadd.f32 %v4509_v14, %v2961_v2  ;;  %v4595_v21 = vpop.f32.mrb[89].mxu1  ;;  %v4511_v20 = vpop.f32.mrb[74].mxu0  ;;  %v6932_v13 = vld [vmem:[%s9152_s8 + $0x3c0] ss:$8 sps:$4 sm:$0xff]   ;;  %v6937_v14 = vld [vmem:[%s9152_s8 + $0x3d4] ss:$8 sps:$4 sm:$0xff]  }
 0x61e   :  { %v4622_v9 = vmul.f32 0.01, %v6464_v29  ;;  %5552 = vmatpush1.bf16.msra.mxu0 %v6887_v8  ;;  %v6469_v22 = vadd.f32 %v4595_v21, %v2969_v10  ;;  %v6466_v32 = vadd.f32 %v4511_v20, %v2957_v5  ;;  %v4597_v33 = vpop.f32.mrb[90].mxu1  ;;  %v4513_v34 = vpop.f32.mrb[75].mxu0  ;;  %vm4606_vm7 = vcmp.gt.f32.partialorder %v6464_v29, 0.0 }
 0x61f   :  { %5553 = vmatprep.subr.bf16.mxu0 %v6892_v12  ;;  %vm4608_vm8 = vcmp.gt.f32.partialorder %v6468_v15, 0.0  ;;  %v4624_v30 = vmul.f32 0.01, %v6468_v15  ;;  %vm4607_vm9 = vcmp.gt.f32.partialorder %v6465_v17, 0.0  ;;  %v4599_v31 = vpop.f32.mrb[91].mxu1  ;;  %v6470_v40 = vadd.f32 %v4597_v33, %v2965_v50 }
 0x620   :  { %vm4614_vm10 = vcmp.gt.f32.partialorder %v6466_v32, 0.0  ;;  %v4623_v36 = vmul.f32 0.01, %v6465_v17  ;;  %v4630_v18 = vmul.f32 0.01, %v6466_v32  ;;  %v6467_v44 = vadd.f32 %v4513_v34, %v2961_v2 }
 0x621   :  { %v4638_v23 = vsel %vm4606_vm7, %v6464_v29, %v4622_v9  ;;  %vm4609_vm11 = vcmp.gt.f32.partialorder %v6469_v22, 0.0  ;;  %v4625_v19 = vmul.f32 0.01, %v6469_v22  ;;  %v6471_v46 = vadd.f32 %v4599_v31, %v2969_v10  ;;  %v6920_v5 = vld [vmem:[%s9152_s8 + $0x380] ss:$8 sps:$4 sm:$0xff]  }
 0x622   :  { %5554 = vmatpush1.bf16.msra.mxu0 %v6890_v26  ;;  %v4646_v49 = vsel %vm4614_vm10, %v6466_v32, %v4630_v18  ;;  %vm4616_vm12 = vcmp.gt.f32.partialorder %v6470_v40, 0.0  ;;  %v4632_v47 = vmul.f32 0.01, %v6470_v40  ;;  %vm4615_vm13 = vcmp.gt.f32.partialorder %v6467_v44, 0.0  ;;  %v6925_v50 = vld [vmem:[%s9152_s8 + $0x394] ss:$8 sps:$4 sm:$0xff]  }
 0x623   :  { %5555 = vmatprep.subr.bf16.mxu0 %v6895_v27  ;;  %v4654_v62 = vpack.c.bf16 %v4646_v49, %v4638_v23  ;;  %v4631_v25 = vmul.f32 0.01, %v6467_v44  ;;  %vm4617_vm14 = vcmp.gt.f32.partialorder %v6471_v46, 0.0  ;;  %v4633_v38 = vmul.f32 0.01, %v6471_v46 }
 0x624   :  { %v9022_v39 = vsel %vm4608_vm8, %v6468_v15, %v4624_v30  ;;  %v9024_v41 = vsel %vm4616_vm12, %v6470_v40, %v4632_v47  ;;  %v4639_v54 = vsel %vm4607_vm9, %v6465_v17, %v4623_v36  ;;  %v4641_v45 = vsel %vm4609_vm11, %v6469_v22, %v4625_v19  ;;  %v6923_v2 = vld [vmem:[%s9152_s8 + $0x390] ss:$8 sps:$4 sm:$0xff]   ;;  %v6928_v8 = vld [vmem:[%s9152_s8 + $0x3a4] ss:$8 sps:$4 sm:$0xff]   ;;  %v6926_v10 = vld [vmem:[%s9152_s8 + $0x3a0] ss:$8 sps:$4 sm:$0xff]  }
 0x625   :  { %v4656_v42 = vpack.c.bf16 %v9024_v41, %v9022_v39  ;;  %v4647_v7 = vsel %vm4615_vm13, %v6467_v44, %v4631_v25  ;;  %v4649_v51 = vsel %vm4617_vm14, %v6471_v46, %v4633_v38  ;;  %v6929_v12 = vld [vmem:[%s9152_s8 + $0x3b0] ss:$8 sps:$4 sm:$0xff]   ;;  %v6934_v29 = vld [vmem:[%s9152_s8 + $0x3c4] ss:$8 sps:$4 sm:$0xff]   ;;  %v6938_v21 = vld [vmem:[%s9152_s8 + $0x3e0] ss:$8 sps:$4 sm:$0xff]  }
 0x626   :  { %5556 = vmatpush1.bf16.msra.mxu0 %v6893_v48  ;;  %v4655_v52 = vpack.c.bf16 %v4647_v7, %v4639_v54  ;;  %v4657_v55 = vpack.c.bf16 %v4649_v51, %v4641_v45  ;;  %v6935_v15 = vld [vmem:[%s9152_s8 + $0x3d0] ss:$8 sps:$4 sm:$0xff]   ;;  %v6940_v17 = vld [vmem:[%s9152_s8 + $0x3e4] ss:$8 sps:$4 sm:$0xff]   ;;  %v6943_v20 = vld [vmem:[%s9152_s8 + $0x3f4] ss:$8 sps:$4 sm:$0xff]  }
 0x627   :  { %5568 = vmatprep.subr.bf16.mxu0 %v6898_v37  ;;  %v6941_v9 = vld [vmem:[%s9152_s8 + $0x3f0] ss:$8 sps:$4 sm:$0xff]   ;;  %v6078_v22 = vld [vmem:[%s9146_s9 + $0x6] ss:$8 sm:$0x3] }
 0x628   :  { %5557 = vmatprep.mubr.bf16.mxu0 %v4655_v52  ;;  %v4792_v32 = vrot.slane %v6078_v22, %v7809_v3  ;;  %v4796_v33 = vrot.slane %v6078_v22, %v7812_v56 }
 0x629   :  { %5558 = vmatmul.mubr.bf16.vlgmr.msra.gmra.mrb[76].mxu0 %v4654_v62 }
 0x62a   :  { %5569 = vmatpush1.bf16.msra.mxu0 %v6896_v53  ;;  %5600 = vmatprep.mubr.bf16.mxu0 %v4657_v55 }
 0x62b   :  { %5570 = vmatprep.subr.bf16.mxu0 %v6901_v1 }
 0x62e   :  { %5571 = vmatpush1.bf16.msra.mxu0 %v6899_v57 }
 0x62f   :  { %5572 = vmatprep.subr.bf16.mxu0 %v6904_v58 }
 0x632   :  { %5573 = vmatpush1.bf16.msra.mxu0 %v6902_v24 }
 0x633   :  { %5574 = vmatprep.subr.bf16.mxu0 %v6907_v35 }
 0x636   :  { %5575 = vmatpush1.bf16.msra.mxu0 %v6905_v60 }
 0x637   :  { %5576 = vmatprep.subr.bf16.mxu0 %v6910_v61 }
 0x63a   :  { %5577 = vmatpush1.bf16.msra.mxu0 %v6908_v63 }
 0x63b   :  { %5578 = vmatprep.subr.bf16.mxu0 %v6913_v0 }
 0x63e   :  { %5579 = vmatpush1.bf16.msra.mxu0 %v6911_v16 }
 0x63f   :  { %5580 = vmatprep.subr.bf16.mxu0 %v6916_v28 }
 0x642   :  { %5581 = vmatpush1.bf16.msra.mxu0 %v6914_v11 }
 0x643   :  { %5582 = vmatprep.subr.bf16.mxu0 %v6919_v4 }
 0x646   :  { %5583 = vmatpush1.bf16.msra.mxu0 %v6917_v59 }
 0x647   :  { %5584 = vmatprep.subr.bf16.mxu0 %v6922_v6 }
 0x64a   :  { %5585 = vmatpush1.bf16.msra.mxu0 %v6920_v5 }
 0x64b   :  { %5586 = vmatprep.subr.bf16.mxu0 %v6925_v50 }
 0x64e   :  { %5587 = vmatpush1.bf16.msra.mxu0 %v6923_v2 }
 0x64f   :  { %5588 = vmatprep.subr.bf16.mxu0 %v6928_v8 }
 0x652   :  { %5589 = vmatpush1.bf16.msra.mxu0 %v6926_v10 }
 0x653   :  { %5590 = vmatprep.subr.bf16.mxu0 %v6931_v43 }
 0x656   :  { %5591 = vmatpush1.bf16.msra.mxu0 %v6929_v12 }
 0x657   :  { %5592 = vmatprep.subr.bf16.mxu0 %v6934_v29 }
 0x65a   :  { %5593 = vmatpush1.bf16.msra.mxu0 %v6932_v13 }
 0x65b   :  { %5594 = vmatprep.subr.bf16.mxu0 %v6937_v14 }
 0x65e   :  { %5595 = vmatpush1.bf16.msra.mxu0 %v6935_v15 }
 0x65f   :  { %5596 = vmatprep.subr.bf16.mxu0 %v6940_v17 }
 0x662   :  { %5597 = vmatpush1.bf16.msra.mxu0 %v6938_v21 }
 0x663   :  { %5598 = vmatprep.subr.bf16.mxu0 %v6943_v20 }
 0x666   :  { %5599 = vmatpush1.bf16.msra.mxu0 %v6941_v9 }
 0x669   :  { %5601 = vmatmul.mubr.bf16.vlgmr.msra.gmra.mrb[76].mxu0 %v4656_v42 }
 0x73c   :  { %v5602_v34 = vpop.f32.mrb[76].mxu0 }
 0x73d   :  { %v6472_v26 = vadd.f32 %v5602_v34, %v4792_v32  ;;  %v5604_v27 = vpop.f32.mrb[77].mxu0 }
 0x73e   :  { %v6473_v30 = vadd.f32 %v5604_v27, %v4796_v33  ;;  %v5606_v31 = vpop.f32.mrb[78].mxu0 }
 0x73f   :  { %5611 = vst [vmem:[%s9153_s10] sm:$0xff] %v6472_v26  ;;  %v6474_v36 = vadd.f32 %v5606_v31, %v4792_v32  ;;  %v5608_v18 = vpop.f32.mrb[79].mxu0 }
 0x740   :  { %5612 = vst [vmem:[%s9153_s10 + $0x8] sm:$0xff] %v6473_v30  ;;  %v6475_v40 = vadd.f32 %v5608_v18, %v4796_v33 }
 0x741   :  { %5613 = vst [vmem:[%s9153_s10 + $0x10] sm:$0xff] %v6474_v36 }
 0x742   :  { %5614 = vst [vmem:[%s9153_s10 + $0x18] sm:$0xff] %v6475_v40 }

</bundles_post_ra>
